<compile_context>
chip_gen: v5e
topology: v5e:2x2
jax: 0.10.0
libtpu: 0.0.40
codegen_flags: <defaults>
</compile_context>

<pallas_src>
import functools

import jax
import jax.numpy as jnp
from jax import lax
from jax.experimental import pallas as pl
from jax.experimental.pallas import tpu as pltpu

POOL = 4
NEURONS = 38
DT = 4
N_STEPS = 30


# ---------------------------------------------------------------------------
# Shared math helpers: used both inside the Pallas kernel and by the pure-JAX
# reference in __main__, so both sides trace the identical op sequence.
# ---------------------------------------------------------------------------
def _softplus(v):
    # Stable softplus; equal to torch.nn.functional.softplus on this range.
    return jnp.maximum(v, 0.0) + jnp.log(1.0 + jnp.exp(-jnp.abs(v)))


def _spiking_loop(x_fc, l_rows, h_rows, n_steps):
    """30-step GLM spiking recurrence driven by a fixed (B, N) input x_fc.

    l_rows[d] == l_weight[:, d] as a (1, N) row, h_rows[d] == h_weight[d]
    broadcast to (1, N).  The dt-deep history is a tuple of dt (B, N) planes,
    so torch.roll over the history axis becomes static carry re-wiring.
    """
    dt = len(l_rows)
    zeros = jnp.zeros_like(x_fc)

    def step(_, carry):
        count, hist = carry
        row_sum = zeros        # sum_d hist_d * l_weight[:, d]  -> (B, N)
        self_sum = zeros       # sum_d hist_d * h_weight[d]     -> (B, N)
        for d in range(dt):
            row_sum = row_sum + hist[d] * l_rows[d]
            self_sum = self_sum + hist[d] * h_rows[d]
        total = jnp.sum(row_sum, axis=1, keepdims=True)          # (B, 1)
        current = x_fc + (total - row_sum) + self_sum
        rate = jnp.exp(current)
        thr = jnp.mean(rate, keepdims=True)                      # global mean, (1, 1)
        spike = jnp.where(rate > thr, 1.0, 0.0).astype(x_fc.dtype)
        hist = tuple(hist[1:]) + (spike,)                        # roll(-1, dt) + set last
        return count + spike, hist

    # TODO(synk): for large B, re-lay the recurrence as (N, B) (batch on the
    # lane axis) or unroll only 2-4x to bound live vregs; at small B it is
    # latency-bound on the exp -> reduce -> compare chain so full unroll wins.
    init = (zeros, tuple(zeros for _ in range(dt)))
    count, _ = lax.fori_loop(0, n_steps, step, init, unroll=True)
    return count


def _ru(v, m):
    return -(-v // m) * m


def _pick_tk(d, target=512):
    """Largest multiple-of-128 divisor of d that is <= target, else d itself."""
    best = d
    for cand in range(128, min(target, d) + 1, 128):
        if d % cand == 0:
            best = cand
    return best


# ---------------------------------------------------------------------------
# Single fused kernel: (folded-pool) fc + 30-step spiking recurrence + softplus.
# Grid is the K (feature) axis of the contraction only.
# ---------------------------------------------------------------------------
def _make_fused_kernel(debug):
    def kernel(x_ref, w_ref, b_ref, l_ref, h_ref, *rest):
        if debug:
            out_ref, xfc_ref, acc_ref = rest
        else:
            out_ref, acc_ref = rest
            xfc_ref = None

        k = pl.program_id(0)

        @pl.when(k == 0)
        def _init():
            acc_ref[...] = jnp.zeros_like(acc_ref)

        # Plain (B, tk) @ (tk, N) MXU feed, f32 accumulation in VMEM scratch.
        acc_ref[...] += jnp.dot(x_ref[...], w_ref[...],
                                preferred_element_type=jnp.float32)

        @pl.when(k == pl.num_programs(0) - 1)
        def _finalize():
            x_fc = acc_ref[...] + b_ref[...]
            if debug:
                xfc_ref[...] = x_fc
            dt = l_ref.shape[0]
            l_rows = [l_ref[pl.ds(d, 1), :] for d in range(dt)]  # (1, N) static slices
            h_rows = [h_ref[pl.ds(d, 1), :] for d in range(dt)]
            count = _spiking_loop(x_fc, l_rows, h_rows, N_STEPS)
            out_ref[...] = _softplus(count)

    return kernel


def fused_glm(x_flat, w_eff_t, b2, l_t, h_b, *, debug=False):
    B, D = x_flat.shape
    Dw, N = w_eff_t.shape
    assert D == Dw
    dt = l_t.shape[0]

    tk = _pick_tk(D)
    kt = D // tk

    out_shape = [jax.ShapeDtypeStruct((B, N), jnp.float32)]        # softplus(count)
    out_specs = [pl.BlockSpec((B, N), lambda k: (0, 0))]
    if debug:                                                      # gated x_fc export
        out_shape.append(jax.ShapeDtypeStruct((B, N), jnp.float32))
        out_specs.append(pl.BlockSpec((B, N), lambda k: (0, 0)))

    cost = pl.CostEstimate(
        flops=2 * B * D * N + N_STEPS * B * N * (4 * dt + 8),
        transcendentals=(N_STEPS + 2) * B * N,
        bytes_accessed=4 * (B * D + D * N + len(out_shape) * B * N + 2 * dt * N + N),
    )

    # Padded-VMEM footprint of the double-buffered blocks + accumulator/outputs.
    vmem_bytes = 4 * (2 * _ru(B, 8) * _ru(tk, 128)
                      + 2 * _ru(tk, 8) * _ru(N, 128)
                      + (1 + len(out_shape)) * _ru(B, 8) * _ru(N, 128)
                      + 3 * _ru(dt, 8) * _ru(N, 128))
    vmem_limit = int(min(max(2 * vmem_bytes, 4 << 20), 32 << 20))

    # TODO(synk): on v7x, split the D axis across the two TensorCores
    # (pl.core_map + core_barrier on the partial x_fc); B cannot be split
    # because the spike threshold is a global mean over (B, N).
    outs = pl.pallas_call(
        _make_fused_kernel(debug),
        out_shape=tuple(out_shape),
        grid=(kt,),
        in_specs=[
            pl.BlockSpec((B, tk), lambda k: (0, k)),     # x_flat  (B, D), K-tiled
            pl.BlockSpec((tk, N), lambda k: (k, 0)),     # W_eff^T (D, N), K-tiled
            pl.BlockSpec((1, N), lambda k: (0, 0)),      # bias
            pl.BlockSpec((dt, N), lambda k: (0, 0)),     # l_weight^T
            pl.BlockSpec((dt, N), lambda k: (0, 0)),     # h_weight broadcast
        ],
        out_specs=tuple(out_specs),
        scratch_shapes=[pltpu.VMEM((B, N), jnp.float32)],
        compiler_params=pltpu.CompilerParams(
            dimension_semantics=("arbitrary",),          # K is a reduction axis
            vmem_limit_bytes=vmem_limit),
        cost_estimate=cost,
    )(x_flat, w_eff_t, b2, l_t, h_b)
    return outs if debug else outs[0]


# ---------------------------------------------------------------------------
# Wrapper: fold the (linear) 4x4 average pool into the fc weight and call the
# fused kernel.  avg_pool2d(x,4) -> flatten -> fc == x_flat @ W_eff^T + b with
# W_eff[n, c, h, w] = w_fc[n, c, h//4, w//4] / 16.
# ---------------------------------------------------------------------------
def _fold_pool_into_fc(w_fc, C, H, W):
    N, Dp = w_fc.shape
    Hp, Wp = H // POOL, W // POOL
    assert Dp == C * Hp * Wp
    w4 = (w_fc.astype(jnp.float32) * (1.0 / (POOL * POOL))).reshape(N, C, Hp, 1, Wp, 1)
    w_eff = jnp.broadcast_to(w4, (N, C, Hp, POOL, Wp, POOL)).reshape(N, C * H * W)
    # Pre-transposed to (D, N) so the in-kernel matmul needs no weight relayout.
    return jnp.transpose(w_eff)


@functools.partial(jax.jit, static_argnames=("debug",))
def glm_ni1_forward(x, w_fc, b_fc, l_weight, h_weight, *, debug=False):
    """softplus(spike_count) of GLM_NI1.forward.  debug=True also returns x_fc."""
    B, C, H, W = x.shape
    N = w_fc.shape[0]
    dt = h_weight.shape[0]
    x_flat = x.reshape(B, C * H * W).astype(jnp.float32)   # free metadata reshape
    # NOTE: W_eff depends only on the weights; in a deployed model hoist/cache it
    # outside the per-step jit instead of rebuilding every call.
    w_eff_t = _fold_pool_into_fc(w_fc, C, H, W)                            # (D, N)
    b2 = b_fc.reshape(1, N).astype(jnp.float32)
    l_t = jnp.transpose(l_weight).astype(jnp.float32)                      # (dt, N)
    h_b = jnp.broadcast_to(h_weight.astype(jnp.float32)[:, None], (dt, N))
    return fused_glm(x_flat, w_eff_t, b2, l_t, h_b, debug=debug)


if __name__ == "__main__":
    key = jax.random.PRNGKey(0)
    kx, kw, kb, kl, kh = jax.random.split(key, 5)

    # Small-scale analog of the real module (input (B,1,256,256), fc(64*64, 38)):
    # here (B, 1, 64, 64) -> pooled (B, 1, 16, 16) -> fc(256, 38).
    B, C, H, W = 2, 1, 64, 64
    Dp = C * (H // POOL) * (W // POOL)

    x = jax.random.normal(kx, (B, C, H, W), jnp.float32)
    # nn.Linear-style init for fc; torch.rand-style [0, 1) for the GLM weights,
    # quantized to multiples of 1/256 so the partial sums inside the spike
    # dynamics are exact in f32 and the hard (rate > mean) threshold cannot flip
    # between kernel and reference due to reduction-order rounding.
    bound = 1.0 / (Dp ** 0.5)
    w_fc = jax.random.uniform(kw, (NEURONS, Dp), jnp.float32, -bound, bound)
    b_fc = jax.random.uniform(kb, (NEURONS,), jnp.float32, -bound, bound)
    l_weight = jnp.floor(jax.random.uniform(kl, (NEURONS, DT), jnp.float32) * 256.0) / 256.0
    h_weight = jnp.floor(jax.random.uniform(kh, (DT,), jnp.float32) * 256.0) / 256.0

    # Production path (single fused kernel, no debug export).
    out = glm_ni1_forward(x, w_fc, b_fc, l_weight, h_weight)
    out = jax.block_until_ready(out)
    assert out.shape == (B, NEURONS)
    assert bool(jnp.all(jnp.isfinite(out)))

    # Debug path: also exports the in-kernel x_fc so the hard-threshold
    # recurrence check is driven by the kernel's own activations.
    out_dbg, x_fc = jax.block_until_ready(
        glm_ni1_forward(x, w_fc, b_fc, l_weight, h_weight, debug=True))

    # ---- plain-JAX reference checks --------------------------------------
    # 1) folded 4x4 avg-pool + fc (tolerance covers MXU bf16-pass f32 matmul)
    pooled_ref = x.reshape(B, C, H // POOL, POOL, W // POOL, POOL).mean(axis=(3, 5))
    xf_ref = pooled_ref.reshape(B, -1) @ w_fc.T + b_fc
    assert jnp.allclose(x_fc, xf_ref, atol=5e-2, rtol=5e-2), "fc/pool mismatch"

    # 2) spiking recurrence + softplus driven by the kernel's own fc output,
    #    using the same helper so both sides trace identical op sequences.
    l_t = jnp.transpose(l_weight)
    h_b = jnp.broadcast_to(h_weight[:, None], (DT, NEURONS))
    l_rows = [l_t[d:d + 1, :] for d in range(DT)]
    h_rows = [h_b[d:d + 1, :] for d in range(DT)]
    out_ref = _softplus(_spiking_loop(x_fc, l_rows, h_rows, N_STEPS))
    assert jnp.allclose(out_dbg, out_ref, atol=1e-3, rtol=1e-3), "recurrence mismatch"

    print("KERNEL_OK")
</pallas_src>

<mosaic_0001>
module attributes {stable_mosaic.version = 11 : i64} {
  func.func @kernel(%arg0: i32, %arg1: memref<2x512xf32, #tpu.memory_space<vmem>>, %arg2: memref<512x38xf32, #tpu.memory_space<vmem>>, %arg3: memref<1x38xf32, #tpu.memory_space<vmem>>, %arg4: memref<4x38xf32, #tpu.memory_space<vmem>>, %arg5: memref<4x38xf32, #tpu.memory_space<vmem>>, %arg6: memref<2x38xf32, #tpu.memory_space<vmem>>, %arg7: memref<2x38xf32, #tpu.memory_space<vmem>>) attributes {dimension_semantics = [#tpu.dimension_semantics<arbitrary>], iteration_bounds = array<i64: 8>, scalar_prefetch = 0 : i64, scratch_operands = 1 : i64, tpu.core_type = #tpu.core_type<tc>, window_params = [{transform_indices = @transform_0, window_bounds = array<i64: 2, 512>}, {transform_indices = @transform_1, window_bounds = array<i64: 512, 38>}, {pipeline_mode = #tpu.pipeline_mode<synchronous>, transform_indices = @transform_2, window_bounds = array<i64: 1, 38>}, {pipeline_mode = #tpu.pipeline_mode<synchronous>, transform_indices = @transform_3, window_bounds = array<i64: 4, 38>}, {pipeline_mode = #tpu.pipeline_mode<synchronous>, transform_indices = @transform_4, window_bounds = array<i64: 4, 38>}, {pipeline_mode = #tpu.pipeline_mode<synchronous>, transform_indices = @transform_5, window_bounds = array<i64: 2, 38>}]} {
    %c0_i32 = arith.constant 0 : i32
    %0 = arith.cmpi eq, %arg0, %c0_i32 : i32
    %1 = arith.extui %0 : i1 to i32
    %c0_i32_0 = arith.constant 0 : i32
    %2 = arith.cmpi ne, %1, %c0_i32_0 : i32
    scf.if %2 {
      %cst_9 = arith.constant 0.000000e+00 : f32
      %12 = vector.broadcast %cst_9 : f32 to vector<2x38xf32>
      %c0_10 = arith.constant 0 : index
      %c0_11 = arith.constant 0 : index
      %13 = vector.load %arg7[%c0_10, %c0_11] : memref<2x38xf32, #tpu.memory_space<vmem>>, vector<2x38xf32>
      tpu.vector_store %arg7[%c0_10, %c0_11], %12 {strides = array<i32>} : memref<2x38xf32, #tpu.memory_space<vmem>>, vector<2x38xf32>,
    } else {
    }
    %c0 = arith.constant 0 : index
    %c0_1 = arith.constant 0 : index
    %3 = vector.load %arg7[%c0, %c0_1] : memref<2x38xf32, #tpu.memory_space<vmem>>, vector<2x38xf32>
    %c0_2 = arith.constant 0 : index
    %c0_3 = arith.constant 0 : index
    %4 = vector.load %arg1[%c0_2, %c0_3] : memref<2x512xf32, #tpu.memory_space<vmem>>, vector<2x512xf32>
    %c0_4 = arith.constant 0 : index
    %c0_5 = arith.constant 0 : index
    %5 = vector.load %arg2[%c0_4, %c0_5] : memref<512x38xf32, #tpu.memory_space<vmem>>, vector<512x38xf32>
    %cst = arith.constant dense<0.000000e+00> : vector<2x38xf32>
    %6 = tpu.matmul %4, %5, %cst {dimension_numbers = #tpu.dot_dimension_numbers<[1], [0], [0], [1], [0, 0, 1, 1], [], []>} : vector<2x512xf32>, vector<512x38xf32>, vector<2x38xf32> -> vector<2x38xf32>
    %7 = arith.addf %3, %6 : vector<2x38xf32>
    %c0_6 = arith.constant 0 : index
    %c0_7 = arith.constant 0 : index
    %8 = vector.load %arg7[%c0_6, %c0_7] : memref<2x38xf32, #tpu.memory_space<vmem>>, vector<2x38xf32>
    tpu.vector_store %arg7[%c0_6, %c0_7], %7 {strides = array<i32>} : memref<2x38xf32, #tpu.memory_space<vmem>>, vector<2x38xf32>,
    %c7_i32 = arith.constant 7 : i32
    %9 = arith.cmpi eq, %arg0, %c7_i32 : i32
    %10 = arith.extui %9 : i1 to i32
    %c0_i32_8 = arith.constant 0 : i32
    %11 = arith.cmpi ne, %10, %c0_i32_8 : i32
    scf.if %11 {
      %c0_9 = arith.constant 0 : index
      %c0_10 = arith.constant 0 : index
      %12 = vector.load %arg7[%c0_9, %c0_10] : memref<2x38xf32, #tpu.memory_space<vmem>>, vector<2x38xf32>
      %c0_11 = arith.constant 0 : index
      %c0_12 = arith.constant 0 : index
      %13 = vector.load %arg3[%c0_11, %c0_12] : memref<1x38xf32, #tpu.memory_space<vmem>>, vector<1x38xf32>
      %14 = vector.broadcast %13 : vector<1x38xf32> to vector<2x38xf32>
      %15 = arith.addf %12, %14 : vector<2x38xf32>
      %c0_13 = arith.constant 0 : index
      %c0_14 = arith.constant 0 : index
      %16 = vector.load %arg4[%c0_13, %c0_14] : memref<4x38xf32, #tpu.memory_space<vmem>>, vector<1x38xf32>
      %c1 = arith.constant 1 : index
      %c0_15 = arith.constant 0 : index
      %17 = vector.load %arg4[%c1, %c0_15] : memref<4x38xf32, #tpu.memory_space<vmem>>, vector<1x38xf32>
      %c2 = arith.constant 2 : index
      %c0_16 = arith.constant 0 : index
      %18 = vector.load %arg4[%c2, %c0_16] : memref<4x38xf32, #tpu.memory_space<vmem>>, vector<1x38xf32>
      %c3 = arith.constant 3 : index
      %c0_17 = arith.constant 0 : index
      %19 = vector.load %arg4[%c3, %c0_17] : memref<4x38xf32, #tpu.memory_space<vmem>>, vector<1x38xf32>
      %c0_18 = arith.constant 0 : index
      %c0_19 = arith.constant 0 : index
      %20 = vector.load %arg5[%c0_18, %c0_19] : memref<4x38xf32, #tpu.memory_space<vmem>>, vector<1x38xf32>
      %c1_20 = arith.constant 1 : index
      %c0_21 = arith.constant 0 : index
      %21 = vector.load %arg5[%c1_20, %c0_21] : memref<4x38xf32, #tpu.memory_space<vmem>>, vector<1x38xf32>
      %c2_22 = arith.constant 2 : index
      %c0_23 = arith.constant 0 : index
      %22 = vector.load %arg5[%c2_22, %c0_23] : memref<4x38xf32, #tpu.memory_space<vmem>>, vector<1x38xf32>
      %c3_24 = arith.constant 3 : index
      %c0_25 = arith.constant 0 : index
      %23 = vector.load %arg5[%c3_24, %c0_25] : memref<4x38xf32, #tpu.memory_space<vmem>>, vector<1x38xf32>
      %cst_26 = arith.constant 0.000000e+00 : f32
      %24 = vector.broadcast %cst_26 : f32 to vector<2x38xf32>
      %c0_i32_27 = arith.constant 0 : i32
      %25 = vector.broadcast %16 : vector<1x38xf32> to vector<2x38xf32>
      %26 = arith.mulf %24, %25 : vector<2x38xf32>
      %27 = arith.addf %24, %26 : vector<2x38xf32>
      %28 = vector.broadcast %20 : vector<1x38xf32> to vector<2x38xf32>
      %29 = arith.mulf %24, %28 : vector<2x38xf32>
      %30 = arith.addf %24, %29 : vector<2x38xf32>
      %31 = vector.broadcast %17 : vector<1x38xf32> to vector<2x38xf32>
      %32 = arith.mulf %24, %31 : vector<2x38xf32>
      %33 = arith.addf %27, %32 : vector<2x38xf32>
      %34 = vector.broadcast %21 : vector<1x38xf32> to vector<2x38xf32>
      %35 = arith.mulf %24, %34 : vector<2x38xf32>
      %36 = arith.addf %30, %35 : vector<2x38xf32>
      %37 = vector.broadcast %18 : vector<1x38xf32> to vector<2x38xf32>
      %38 = arith.mulf %24, %37 : vector<2x38xf32>
      %39 = arith.addf %33, %38 : vector<2x38xf32>
      %40 = vector.broadcast %22 : vector<1x38xf32> to vector<2x38xf32>
      %41 = arith.mulf %24, %40 : vector<2x38xf32>
      %42 = arith.addf %36, %41 : vector<2x38xf32>
      %43 = vector.broadcast %19 : vector<1x38xf32> to vector<2x38xf32>
      %44 = arith.mulf %24, %43 : vector<2x38xf32>
      %45 = arith.addf %39, %44 : vector<2x38xf32>
      %46 = vector.broadcast %23 : vector<1x38xf32> to vector<2x38xf32>
      %47 = arith.mulf %24, %46 : vector<2x38xf32>
      %48 = arith.addf %42, %47 : vector<2x38xf32>
      %cst_28 = arith.constant dense<0.000000e+00> : vector<2xf32>
      %49 = vector.multi_reduction <add>, %45, %cst_28 [1] : vector<2x38xf32> to vector<2xf32>
      %50 = vector.shape_cast %49 : vector<2xf32> to vector<2x1xf32>
      %51 = vector.broadcast %50 : vector<2x1xf32> to vector<2x38xf32>
      %52 = arith.subf %51, %45 : vector<2x38xf32>
      %53 = arith.addf %15, %52 : vector<2x38xf32>
      %54 = arith.addf %53, %48 : vector<2x38xf32>
      %55 = math.exp %54 : vector<2x38xf32>
      %56 = vector.shape_cast %55 : vector<2x38xf32> to vector<1x2x38xf32>
      %cst_29 = arith.constant dense<0.000000e+00> : vector<1xf32>
      %57 = vector.multi_reduction <add>, %56, %cst_29 [1, 2] : vector<1x2x38xf32> to vector<1xf32>
      %58 = vector.shape_cast %57 : vector<1xf32> to vector<1x1x1xf32>
      %59 = vector.extract %58[0, 0, 0] : f32 from vector<1x1x1xf32>
      %60 = vector.broadcast %59 : f32 to vector<1x1xf32>
      %cst_30 = arith.constant 7.600000e+01 : f32
      %61 = vector.broadcast %cst_30 : f32 to vector<1x1xf32>
      %62 = arith.divf %60, %61 : vector<1x1xf32>
      %63 = vector.broadcast %62 : vector<1x1xf32> to vector<2x38xf32>
      %64 = arith.cmpf ogt, %55, %63 : vector<2x38xf32>
      %cst_31 = arith.constant 1.000000e+00 : f32
      %cst_32 = arith.constant 0.000000e+00 : f32
      %65 = vector.broadcast %cst_31 : f32 to vector<2x38xf32>
      %66 = vector.broadcast %cst_32 : f32 to vector<2x38xf32>
      %67 = arith.select %64, %65, %66 : vector<2x38xi1>, vector<2x38xf32>
      %68 = arith.addf %24, %67 : vector<2x38xf32>
      %c1_i32 = arith.constant 1 : i32
      %69 = vector.broadcast %16 : vector<1x38xf32> to vector<2x38xf32>
      %70 = arith.mulf %24, %69 : vector<2x38xf32>
      %71 = arith.addf %24, %70 : vector<2x38xf32>
      %72 = vector.broadcast %20 : vector<1x38xf32> to vector<2x38xf32>
      %73 = arith.mulf %24, %72 : vector<2x38xf32>
      %74 = arith.addf %24, %73 : vector<2x38xf32>
      %75 = vector.broadcast %17 : vector<1x38xf32> to vector<2x38xf32>
      %76 = arith.mulf %24, %75 : vector<2x38xf32>
      %77 = arith.addf %71, %76 : vector<2x38xf32>
      %78 = vector.broadcast %21 : vector<1x38xf32> to vector<2x38xf32>
      %79 = arith.mulf %24, %78 : vector<2x38xf32>
      %80 = arith.addf %74, %79 : vector<2x38xf32>
      %81 = vector.broadcast %18 : vector<1x38xf32> to vector<2x38xf32>
      %82 = arith.mulf %24, %81 : vector<2x38xf32>
      %83 = arith.addf %77, %82 : vector<2x38xf32>
      %84 = vector.broadcast %22 : vector<1x38xf32> to vector<2x38xf32>
      %85 = arith.mulf %24, %84 : vector<2x38xf32>
      %86 = arith.addf %80, %85 : vector<2x38xf32>
      %87 = vector.broadcast %19 : vector<1x38xf32> to vector<2x38xf32>
      %88 = arith.mulf %67, %87 : vector<2x38xf32>
      %89 = arith.addf %83, %88 : vector<2x38xf32>
      %90 = vector.broadcast %23 : vector<1x38xf32> to vector<2x38xf32>
      %91 = arith.mulf %67, %90 : vector<2x38xf32>
      %92 = arith.addf %86, %91 : vector<2x38xf32>
      %cst_33 = arith.constant dense<0.000000e+00> : vector<2xf32>
      %93 = vector.multi_reduction <add>, %89, %cst_33 [1] : vector<2x38xf32> to vector<2xf32>
      %94 = vector.shape_cast %93 : vector<2xf32> to vector<2x1xf32>
      %95 = vector.broadcast %94 : vector<2x1xf32> to vector<2x38xf32>
      %96 = arith.subf %95, %89 : vector<2x38xf32>
      %97 = arith.addf %15, %96 : vector<2x38xf32>
      %98 = arith.addf %97, %92 : vector<2x38xf32>
      %99 = math.exp %98 : vector<2x38xf32>
      %100 = vector.shape_cast %99 : vector<2x38xf32> to vector<1x2x38xf32>
      %cst_34 = arith.constant dense<0.000000e+00> : vector<1xf32>
      %101 = vector.multi_reduction <add>, %100, %cst_34 [1, 2] : vector<1x2x38xf32> to vector<1xf32>
      %102 = vector.shape_cast %101 : vector<1xf32> to vector<1x1x1xf32>
      %103 = vector.extract %102[0, 0, 0] : f32 from vector<1x1x1xf32>
      %104 = vector.broadcast %103 : f32 to vector<1x1xf32>
      %cst_35 = arith.constant 7.600000e+01 : f32
      %105 = vector.broadcast %cst_35 : f32 to vector<1x1xf32>
      %106 = arith.divf %104, %105 : vector<1x1xf32>
      %107 = vector.broadcast %106 : vector<1x1xf32> to vector<2x38xf32>
      %108 = arith.cmpf ogt, %99, %107 : vector<2x38xf32>
      %cst_36 = arith.constant 1.000000e+00 : f32
      %cst_37 = arith.constant 0.000000e+00 : f32
      %109 = vector.broadcast %cst_36 : f32 to vector<2x38xf32>
      %110 = vector.broadcast %cst_37 : f32 to vector<2x38xf32>
      %111 = arith.select %108, %109, %110 : vector<2x38xi1>, vector<2x38xf32>
      %112 = arith.addf %68, %111 : vector<2x38xf32>
      %c2_i32 = arith.constant 2 : i32
      %113 = vector.broadcast %16 : vector<1x38xf32> to vector<2x38xf32>
      %114 = arith.mulf %24, %113 : vector<2x38xf32>
      %115 = arith.addf %24, %114 : vector<2x38xf32>
      %116 = vector.broadcast %20 : vector<1x38xf32> to vector<2x38xf32>
      %117 = arith.mulf %24, %116 : vector<2x38xf32>
      %118 = arith.addf %24, %117 : vector<2x38xf32>
      %119 = vector.broadcast %17 : vector<1x38xf32> to vector<2x38xf32>
      %120 = arith.mulf %24, %119 : vector<2x38xf32>
      %121 = arith.addf %115, %120 : vector<2x38xf32>
      %122 = vector.broadcast %21 : vector<1x38xf32> to vector<2x38xf32>
      %123 = arith.mulf %24, %122 : vector<2x38xf32>
      %124 = arith.addf %118, %123 : vector<2x38xf32>
      %125 = vector.broadcast %18 : vector<1x38xf32> to vector<2x38xf32>
      %126 = arith.mulf %67, %125 : vector<2x38xf32>
      %127 = arith.addf %121, %126 : vector<2x38xf32>
      %128 = vector.broadcast %22 : vector<1x38xf32> to vector<2x38xf32>
      %129 = arith.mulf %67, %128 : vector<2x38xf32>
      %130 = arith.addf %124, %129 : vector<2x38xf32>
      %131 = vector.broadcast %19 : vector<1x38xf32> to vector<2x38xf32>
      %132 = arith.mulf %111, %131 : vector<2x38xf32>
      %133 = arith.addf %127, %132 : vector<2x38xf32>
      %134 = vector.broadcast %23 : vector<1x38xf32> to vector<2x38xf32>
      %135 = arith.mulf %111, %134 : vector<2x38xf32>
      %136 = arith.addf %130, %135 : vector<2x38xf32>
      %cst_38 = arith.constant dense<0.000000e+00> : vector<2xf32>
      %137 = vector.multi_reduction <add>, %133, %cst_38 [1] : vector<2x38xf32> to vector<2xf32>
      %138 = vector.shape_cast %137 : vector<2xf32> to vector<2x1xf32>
      %139 = vector.broadcast %138 : vector<2x1xf32> to vector<2x38xf32>
      %140 = arith.subf %139, %133 : vector<2x38xf32>
      %141 = arith.addf %15, %140 : vector<2x38xf32>
      %142 = arith.addf %141, %136 : vector<2x38xf32>
      %143 = math.exp %142 : vector<2x38xf32>
      %144 = vector.shape_cast %143 : vector<2x38xf32> to vector<1x2x38xf32>
      %cst_39 = arith.constant dense<0.000000e+00> : vector<1xf32>
      %145 = vector.multi_reduction <add>, %144, %cst_39 [1, 2] : vector<1x2x38xf32> to vector<1xf32>
      %146 = vector.shape_cast %145 : vector<1xf32> to vector<1x1x1xf32>
      %147 = vector.extract %146[0, 0, 0] : f32 from vector<1x1x1xf32>
      %148 = vector.broadcast %147 : f32 to vector<1x1xf32>
      %cst_40 = arith.constant 7.600000e+01 : f32
      %149 = vector.broadcast %cst_40 : f32 to vector<1x1xf32>
      %150 = arith.divf %148, %149 : vector<1x1xf32>
      %151 = vector.broadcast %150 : vector<1x1xf32> to vector<2x38xf32>
      %152 = arith.cmpf ogt, %143, %151 : vector<2x38xf32>
      %cst_41 = arith.constant 1.000000e+00 : f32
      %cst_42 = arith.constant 0.000000e+00 : f32
      %153 = vector.broadcast %cst_41 : f32 to vector<2x38xf32>
      %154 = vector.broadcast %cst_42 : f32 to vector<2x38xf32>
      %155 = arith.select %152, %153, %154 : vector<2x38xi1>, vector<2x38xf32>
      %156 = arith.addf %112, %155 : vector<2x38xf32>
      %c3_i32 = arith.constant 3 : i32
      %157 = vector.broadcast %16 : vector<1x38xf32> to vector<2x38xf32>
      %158 = arith.mulf %24, %157 : vector<2x38xf32>
      %159 = arith.addf %24, %158 : vector<2x38xf32>
      %160 = vector.broadcast %20 : vector<1x38xf32> to vector<2x38xf32>
      %161 = arith.mulf %24, %160 : vector<2x38xf32>
      %162 = arith.addf %24, %161 : vector<2x38xf32>
      %163 = vector.broadcast %17 : vector<1x38xf32> to vector<2x38xf32>
      %164 = arith.mulf %67, %163 : vector<2x38xf32>
      %165 = arith.addf %159, %164 : vector<2x38xf32>
      %166 = vector.broadcast %21 : vector<1x38xf32> to vector<2x38xf32>
      %167 = arith.mulf %67, %166 : vector<2x38xf32>
      %168 = arith.addf %162, %167 : vector<2x38xf32>
      %169 = vector.broadcast %18 : vector<1x38xf32> to vector<2x38xf32>
      %170 = arith.mulf %111, %169 : vector<2x38xf32>
      %171 = arith.addf %165, %170 : vector<2x38xf32>
      %172 = vector.broadcast %22 : vector<1x38xf32> to vector<2x38xf32>
      %173 = arith.mulf %111, %172 : vector<2x38xf32>
      %174 = arith.addf %168, %173 : vector<2x38xf32>
      %175 = vector.broadcast %19 : vector<1x38xf32> to vector<2x38xf32>
      %176 = arith.mulf %155, %175 : vector<2x38xf32>
      %177 = arith.addf %171, %176 : vector<2x38xf32>
      %178 = vector.broadcast %23 : vector<1x38xf32> to vector<2x38xf32>
      %179 = arith.mulf %155, %178 : vector<2x38xf32>
      %180 = arith.addf %174, %179 : vector<2x38xf32>
      %cst_43 = arith.constant dense<0.000000e+00> : vector<2xf32>
      %181 = vector.multi_reduction <add>, %177, %cst_43 [1] : vector<2x38xf32> to vector<2xf32>
      %182 = vector.shape_cast %181 : vector<2xf32> to vector<2x1xf32>
      %183 = vector.broadcast %182 : vector<2x1xf32> to vector<2x38xf32>
      %184 = arith.subf %183, %177 : vector<2x38xf32>
      %185 = arith.addf %15, %184 : vector<2x38xf32>
      %186 = arith.addf %185, %180 : vector<2x38xf32>
      %187 = math.exp %186 : vector<2x38xf32>
      %188 = vector.shape_cast %187 : vector<2x38xf32> to vector<1x2x38xf32>
      %cst_44 = arith.constant dense<0.000000e+00> : vector<1xf32>
      %189 = vector.multi_reduction <add>, %188, %cst_44 [1, 2] : vector<1x2x38xf32> to vector<1xf32>
      %190 = vector.shape_cast %189 : vector<1xf32> to vector<1x1x1xf32>
      %191 = vector.extract %190[0, 0, 0] : f32 from vector<1x1x1xf32>
      %192 = vector.broadcast %191 : f32 to vector<1x1xf32>
      %cst_45 = arith.constant 7.600000e+01 : f32
      %193 = vector.broadcast %cst_45 : f32 to vector<1x1xf32>
      %194 = arith.divf %192, %193 : vector<1x1xf32>
      %195 = vector.broadcast %194 : vector<1x1xf32> to vector<2x38xf32>
      %196 = arith.cmpf ogt, %187, %195 : vector<2x38xf32>
      %cst_46 = arith.constant 1.000000e+00 : f32
      %cst_47 = arith.constant 0.000000e+00 : f32
      %197 = vector.broadcast %cst_46 : f32 to vector<2x38xf32>
      %198 = vector.broadcast %cst_47 : f32 to vector<2x38xf32>
      %199 = arith.select %196, %197, %198 : vector<2x38xi1>, vector<2x38xf32>
      %200 = arith.addf %156, %199 : vector<2x38xf32>
      %c4_i32 = arith.constant 4 : i32
      %201 = vector.broadcast %16 : vector<1x38xf32> to vector<2x38xf32>
      %202 = arith.mulf %67, %201 : vector<2x38xf32>
      %203 = arith.addf %24, %202 : vector<2x38xf32>
      %204 = vector.broadcast %20 : vector<1x38xf32> to vector<2x38xf32>
      %205 = arith.mulf %67, %204 : vector<2x38xf32>
      %206 = arith.addf %24, %205 : vector<2x38xf32>
      %207 = vector.broadcast %17 : vector<1x38xf32> to vector<2x38xf32>
      %208 = arith.mulf %111, %207 : vector<2x38xf32>
      %209 = arith.addf %203, %208 : vector<2x38xf32>
      %210 = vector.broadcast %21 : vector<1x38xf32> to vector<2x38xf32>
      %211 = arith.mulf %111, %210 : vector<2x38xf32>
      %212 = arith.addf %206, %211 : vector<2x38xf32>
      %213 = vector.broadcast %18 : vector<1x38xf32> to vector<2x38xf32>
      %214 = arith.mulf %155, %213 : vector<2x38xf32>
      %215 = arith.addf %209, %214 : vector<2x38xf32>
      %216 = vector.broadcast %22 : vector<1x38xf32> to vector<2x38xf32>
      %217 = arith.mulf %155, %216 : vector<2x38xf32>
      %218 = arith.addf %212, %217 : vector<2x38xf32>
      %219 = vector.broadcast %19 : vector<1x38xf32> to vector<2x38xf32>
      %220 = arith.mulf %199, %219 : vector<2x38xf32>
      %221 = arith.addf %215, %220 : vector<2x38xf32>
      %222 = vector.broadcast %23 : vector<1x38xf32> to vector<2x38xf32>
      %223 = arith.mulf %199, %222 : vector<2x38xf32>
      %224 = arith.addf %218, %223 : vector<2x38xf32>
      %cst_48 = arith.constant dense<0.000000e+00> : vector<2xf32>
      %225 = vector.multi_reduction <add>, %221, %cst_48 [1] : vector<2x38xf32> to vector<2xf32>
      %226 = vector.shape_cast %225 : vector<2xf32> to vector<2x1xf32>
      %227 = vector.broadcast %226 : vector<2x1xf32> to vector<2x38xf32>
      %228 = arith.subf %227, %221 : vector<2x38xf32>
      %229 = arith.addf %15, %228 : vector<2x38xf32>
      %230 = arith.addf %229, %224 : vector<2x38xf32>
      %231 = math.exp %230 : vector<2x38xf32>
      %232 = vector.shape_cast %231 : vector<2x38xf32> to vector<1x2x38xf32>
      %cst_49 = arith.constant dense<0.000000e+00> : vector<1xf32>
      %233 = vector.multi_reduction <add>, %232, %cst_49 [1, 2] : vector<1x2x38xf32> to vector<1xf32>
      %234 = vector.shape_cast %233 : vector<1xf32> to vector<1x1x1xf32>
      %235 = vector.extract %234[0, 0, 0] : f32 from vector<1x1x1xf32>
      %236 = vector.broadcast %235 : f32 to vector<1x1xf32>
      %cst_50 = arith.constant 7.600000e+01 : f32
      %237 = vector.broadcast %cst_50 : f32 to vector<1x1xf32>
      %238 = arith.divf %236, %237 : vector<1x1xf32>
      %239 = vector.broadcast %238 : vector<1x1xf32> to vector<2x38xf32>
      %240 = arith.cmpf ogt, %231, %239 : vector<2x38xf32>
      %cst_51 = arith.constant 1.000000e+00 : f32
      %cst_52 = arith.constant 0.000000e+00 : f32
      %241 = vector.broadcast %cst_51 : f32 to vector<2x38xf32>
      %242 = vector.broadcast %cst_52 : f32 to vector<2x38xf32>
      %243 = arith.select %240, %241, %242 : vector<2x38xi1>, vector<2x38xf32>
      %244 = arith.addf %200, %243 : vector<2x38xf32>
      %c5_i32 = arith.constant 5 : i32
      %245 = vector.broadcast %16 : vector<1x38xf32> to vector<2x38xf32>
      %246 = arith.mulf %111, %245 : vector<2x38xf32>
      %247 = arith.addf %24, %246 : vector<2x38xf32>
      %248 = vector.broadcast %20 : vector<1x38xf32> to vector<2x38xf32>
      %249 = arith.mulf %111, %248 : vector<2x38xf32>
      %250 = arith.addf %24, %249 : vector<2x38xf32>
      %251 = vector.broadcast %17 : vector<1x38xf32> to vector<2x38xf32>
      %252 = arith.mulf %155, %251 : vector<2x38xf32>
      %253 = arith.addf %247, %252 : vector<2x38xf32>
      %254 = vector.broadcast %21 : vector<1x38xf32> to vector<2x38xf32>
      %255 = arith.mulf %155, %254 : vector<2x38xf32>
      %256 = arith.addf %250, %255 : vector<2x38xf32>
      %257 = vector.broadcast %18 : vector<1x38xf32> to vector<2x38xf32>
      %258 = arith.mulf %199, %257 : vector<2x38xf32>
      %259 = arith.addf %253, %258 : vector<2x38xf32>
      %260 = vector.broadcast %22 : vector<1x38xf32> to vector<2x38xf32>
      %261 = arith.mulf %199, %260 : vector<2x38xf32>
      %262 = arith.addf %256, %261 : vector<2x38xf32>
      %263 = vector.broadcast %19 : vector<1x38xf32> to vector<2x38xf32>
      %264 = arith.mulf %243, %263 : vector<2x38xf32>
      %265 = arith.addf %259, %264 : vector<2x38xf32>
      %266 = vector.broadcast %23 : vector<1x38xf32> to vector<2x38xf32>
      %267 = arith.mulf %243, %266 : vector<2x38xf32>
      %268 = arith.addf %262, %267 : vector<2x38xf32>
      %cst_53 = arith.constant dense<0.000000e+00> : vector<2xf32>
      %269 = vector.multi_reduction <add>, %265, %cst_53 [1] : vector<2x38xf32> to vector<2xf32>
      %270 = vector.shape_cast %269 : vector<2xf32> to vector<2x1xf32>
      %271 = vector.broadcast %270 : vector<2x1xf32> to vector<2x38xf32>
      %272 = arith.subf %271, %265 : vector<2x38xf32>
      %273 = arith.addf %15, %272 : vector<2x38xf32>
      %274 = arith.addf %273, %268 : vector<2x38xf32>
      %275 = math.exp %274 : vector<2x38xf32>
      %276 = vector.shape_cast %275 : vector<2x38xf32> to vector<1x2x38xf32>
      %cst_54 = arith.constant dense<0.000000e+00> : vector<1xf32>
      %277 = vector.multi_reduction <add>, %276, %cst_54 [1, 2] : vector<1x2x38xf32> to vector<1xf32>
      %278 = vector.shape_cast %277 : vector<1xf32> to vector<1x1x1xf32>
      %279 = vector.extract %278[0, 0, 0] : f32 from vector<1x1x1xf32>
      %280 = vector.broadcast %279 : f32 to vector<1x1xf32>
      %cst_55 = arith.constant 7.600000e+01 : f32
      %281 = vector.broadcast %cst_55 : f32 to vector<1x1xf32>
      %282 = arith.divf %280, %281 : vector<1x1xf32>
      %283 = vector.broadcast %282 : vector<1x1xf32> to vector<2x38xf32>
      %284 = arith.cmpf ogt, %275, %283 : vector<2x38xf32>
      %cst_56 = arith.constant 1.000000e+00 : f32
      %cst_57 = arith.constant 0.000000e+00 : f32
      %285 = vector.broadcast %cst_56 : f32 to vector<2x38xf32>
      %286 = vector.broadcast %cst_57 : f32 to vector<2x38xf32>
      %287 = arith.select %284, %285, %286 : vector<2x38xi1>, vector<2x38xf32>
      %288 = arith.addf %244, %287 : vector<2x38xf32>
      %c6_i32 = arith.constant 6 : i32
      %289 = vector.broadcast %16 : vector<1x38xf32> to vector<2x38xf32>
      %290 = arith.mulf %155, %289 : vector<2x38xf32>
      %291 = arith.addf %24, %290 : vector<2x38xf32>
      %292 = vector.broadcast %20 : vector<1x38xf32> to vector<2x38xf32>
      %293 = arith.mulf %155, %292 : vector<2x38xf32>
      %294 = arith.addf %24, %293 : vector<2x38xf32>
      %295 = vector.broadcast %17 : vector<1x38xf32> to vector<2x38xf32>
      %296 = arith.mulf %199, %295 : vector<2x38xf32>
      %297 = arith.addf %291, %296 : vector<2x38xf32>
      %298 = vector.broadcast %21 : vector<1x38xf32> to vector<2x38xf32>
      %299 = arith.mulf %199, %298 : vector<2x38xf32>
      %300 = arith.addf %294, %299 : vector<2x38xf32>
      %301 = vector.broadcast %18 : vector<1x38xf32> to vector<2x38xf32>
      %302 = arith.mulf %243, %301 : vector<2x38xf32>
      %303 = arith.addf %297, %302 : vector<2x38xf32>
      %304 = vector.broadcast %22 : vector<1x38xf32> to vector<2x38xf32>
      %305 = arith.mulf %243, %304 : vector<2x38xf32>
      %306 = arith.addf %300, %305 : vector<2x38xf32>
      %307 = vector.broadcast %19 : vector<1x38xf32> to vector<2x38xf32>
      %308 = arith.mulf %287, %307 : vector<2x38xf32>
      %309 = arith.addf %303, %308 : vector<2x38xf32>
      %310 = vector.broadcast %23 : vector<1x38xf32> to vector<2x38xf32>
      %311 = arith.mulf %287, %310 : vector<2x38xf32>
      %312 = arith.addf %306, %311 : vector<2x38xf32>
      %cst_58 = arith.constant dense<0.000000e+00> : vector<2xf32>
      %313 = vector.multi_reduction <add>, %309, %cst_58 [1] : vector<2x38xf32> to vector<2xf32>
      %314 = vector.shape_cast %313 : vector<2xf32> to vector<2x1xf32>
      %315 = vector.broadcast %314 : vector<2x1xf32> to vector<2x38xf32>
      %316 = arith.subf %315, %309 : vector<2x38xf32>
      %317 = arith.addf %15, %316 : vector<2x38xf32>
      %318 = arith.addf %317, %312 : vector<2x38xf32>
      %319 = math.exp %318 : vector<2x38xf32>
      %320 = vector.shape_cast %319 : vector<2x38xf32> to vector<1x2x38xf32>
      %cst_59 = arith.constant dense<0.000000e+00> : vector<1xf32>
      %321 = vector.multi_reduction <add>, %320, %cst_59 [1, 2] : vector<1x2x38xf32> to vector<1xf32>
      %322 = vector.shape_cast %321 : vector<1xf32> to vector<1x1x1xf32>
      %323 = vector.extract %322[0, 0, 0] : f32 from vector<1x1x1xf32>
      %324 = vector.broadcast %323 : f32 to vector<1x1xf32>
      %cst_60 = arith.constant 7.600000e+01 : f32
      %325 = vector.broadcast %cst_60 : f32 to vector<1x1xf32>
      %326 = arith.divf %324, %325 : vector<1x1xf32>
      %327 = vector.broadcast %326 : vector<1x1xf32> to vector<2x38xf32>
      %328 = arith.cmpf ogt, %319, %327 : vector<2x38xf32>
      %cst_61 = arith.constant 1.000000e+00 : f32
      %cst_62 = arith.constant 0.000000e+00 : f32
      %329 = vector.broadcast %cst_61 : f32 to vector<2x38xf32>
      %330 = vector.broadcast %cst_62 : f32 to vector<2x38xf32>
      %331 = arith.select %328, %329, %330 : vector<2x38xi1>, vector<2x38xf32>
      %332 = arith.addf %288, %331 : vector<2x38xf32>
      %c7_i32_63 = arith.constant 7 : i32
      %333 = vector.broadcast %16 : vector<1x38xf32> to vector<2x38xf32>
      %334 = arith.mulf %199, %333 : vector<2x38xf32>
      %335 = arith.addf %24, %334 : vector<2x38xf32>
      %336 = vector.broadcast %20 : vector<1x38xf32> to vector<2x38xf32>
      %337 = arith.mulf %199, %336 : vector<2x38xf32>
      %338 = arith.addf %24, %337 : vector<2x38xf32>
      %339 = vector.broadcast %17 : vector<1x38xf32> to vector<2x38xf32>
      %340 = arith.mulf %243, %339 : vector<2x38xf32>
      %341 = arith.addf %335, %340 : vector<2x38xf32>
      %342 = vector.broadcast %21 : vector<1x38xf32> to vector<2x38xf32>
      %343 = arith.mulf %243, %342 : vector<2x38xf32>
      %344 = arith.addf %338, %343 : vector<2x38xf32>
      %345 = vector.broadcast %18 : vector<1x38xf32> to vector<2x38xf32>
      %346 = arith.mulf %287, %345 : vector<2x38xf32>
      %347 = arith.addf %341, %346 : vector<2x38xf32>
      %348 = vector.broadcast %22 : vector<1x38xf32> to vector<2x38xf32>
      %349 = arith.mulf %287, %348 : vector<2x38xf32>
      %350 = arith.addf %344, %349 : vector<2x38xf32>
      %351 = vector.broadcast %19 : vector<1x38xf32> to vector<2x38xf32>
      %352 = arith.mulf %331, %351 : vector<2x38xf32>
      %353 = arith.addf %347, %352 : vector<2x38xf32>
      %354 = vector.broadcast %23 : vector<1x38xf32> to vector<2x38xf32>
      %355 = arith.mulf %331, %354 : vector<2x38xf32>
      %356 = arith.addf %350, %355 : vector<2x38xf32>
      %cst_64 = arith.constant dense<0.000000e+00> : vector<2xf32>
      %357 = vector.multi_reduction <add>, %353, %cst_64 [1] : vector<2x38xf32> to vector<2xf32>
      %358 = vector.shape_cast %357 : vector<2xf32> to vector<2x1xf32>
      %359 = vector.broadcast %358 : vector<2x1xf32> to vector<2x38xf32>
      %360 = arith.subf %359, %353 : vector<2x38xf32>
      %361 = arith.addf %15, %360 : vector<2x38xf32>
      %362 = arith.addf %361, %356 : vector<2x38xf32>
      %363 = math.exp %362 : vector<2x38xf32>
      %364 = vector.shape_cast %363 : vector<2x38xf32> to vector<1x2x38xf32>
      %cst_65 = arith.constant dense<0.000000e+00> : vector<1xf32>
      %365 = vector.multi_reduction <add>, %364, %cst_65 [1, 2] : vector<1x2x38xf32> to vector<1xf32>
      %366 = vector.shape_cast %365 : vector<1xf32> to vector<1x1x1xf32>
      %367 = vector.extract %366[0, 0, 0] : f32 from vector<1x1x1xf32>
      %368 = vector.broadcast %367 : f32 to vector<1x1xf32>
      %cst_66 = arith.constant 7.600000e+01 : f32
      %369 = vector.broadcast %cst_66 : f32 to vector<1x1xf32>
      %370 = arith.divf %368, %369 : vector<1x1xf32>
      %371 = vector.broadcast %370 : vector<1x1xf32> to vector<2x38xf32>
      %372 = arith.cmpf ogt, %363, %371 : vector<2x38xf32>
      %cst_67 = arith.constant 1.000000e+00 : f32
      %cst_68 = arith.constant 0.000000e+00 : f32
      %373 = vector.broadcast %cst_67 : f32 to vector<2x38xf32>
      %374 = vector.broadcast %cst_68 : f32 to vector<2x38xf32>
      %375 = arith.select %372, %373, %374 : vector<2x38xi1>, vector<2x38xf32>
      %376 = arith.addf %332, %375 : vector<2x38xf32>
      %c8_i32 = arith.constant 8 : i32
      %377 = vector.broadcast %16 : vector<1x38xf32> to vector<2x38xf32>
      %378 = arith.mulf %243, %377 : vector<2x38xf32>
      %379 = arith.addf %24, %378 : vector<2x38xf32>
      %380 = vector.broadcast %20 : vector<1x38xf32> to vector<2x38xf32>
      %381 = arith.mulf %243, %380 : vector<2x38xf32>
      %382 = arith.addf %24, %381 : vector<2x38xf32>
      %383 = vector.broadcast %17 : vector<1x38xf32> to vector<2x38xf32>
      %384 = arith.mulf %287, %383 : vector<2x38xf32>
      %385 = arith.addf %379, %384 : vector<2x38xf32>
      %386 = vector.broadcast %21 : vector<1x38xf32> to vector<2x38xf32>
      %387 = arith.mulf %287, %386 : vector<2x38xf32>
      %388 = arith.addf %382, %387 : vector<2x38xf32>
      %389 = vector.broadcast %18 : vector<1x38xf32> to vector<2x38xf32>
      %390 = arith.mulf %331, %389 : vector<2x38xf32>
      %391 = arith.addf %385, %390 : vector<2x38xf32>
      %392 = vector.broadcast %22 : vector<1x38xf32> to vector<2x38xf32>
      %393 = arith.mulf %331, %392 : vector<2x38xf32>
      %394 = arith.addf %388, %393 : vector<2x38xf32>
      %395 = vector.broadcast %19 : vector<1x38xf32> to vector<2x38xf32>
      %396 = arith.mulf %375, %395 : vector<2x38xf32>
      %397 = arith.addf %391, %396 : vector<2x38xf32>
      %398 = vector.broadcast %23 : vector<1x38xf32> to vector<2x38xf32>
      %399 = arith.mulf %375, %398 : vector<2x38xf32>
      %400 = arith.addf %394, %399 : vector<2x38xf32>
      %cst_69 = arith.constant dense<0.000000e+00> : vector<2xf32>
      %401 = vector.multi_reduction <add>, %397, %cst_69 [1] : vector<2x38xf32> to vector<2xf32>
      %402 = vector.shape_cast %401 : vector<2xf32> to vector<2x1xf32>
      %403 = vector.broadcast %402 : vector<2x1xf32> to vector<2x38xf32>
      %404 = arith.subf %403, %397 : vector<2x38xf32>
      %405 = arith.addf %15, %404 : vector<2x38xf32>
      %406 = arith.addf %405, %400 : vector<2x38xf32>
      %407 = math.exp %406 : vector<2x38xf32>
      %408 = vector.shape_cast %407 : vector<2x38xf32> to vector<1x2x38xf32>
      %cst_70 = arith.constant dense<0.000000e+00> : vector<1xf32>
      %409 = vector.multi_reduction <add>, %408, %cst_70 [1, 2] : vector<1x2x38xf32> to vector<1xf32>
      %410 = vector.shape_cast %409 : vector<1xf32> to vector<1x1x1xf32>
      %411 = vector.extract %410[0, 0, 0] : f32 from vector<1x1x1xf32>
      %412 = vector.broadcast %411 : f32 to vector<1x1xf32>
      %cst_71 = arith.constant 7.600000e+01 : f32
      %413 = vector.broadcast %cst_71 : f32 to vector<1x1xf32>
      %414 = arith.divf %412, %413 : vector<1x1xf32>
      %415 = vector.broadcast %414 : vector<1x1xf32> to vector<2x38xf32>
      %416 = arith.cmpf ogt, %407, %415 : vector<2x38xf32>
      %cst_72 = arith.constant 1.000000e+00 : f32
      %cst_73 = arith.constant 0.000000e+00 : f32
      %417 = vector.broadcast %cst_72 : f32 to vector<2x38xf32>
      %418 = vector.broadcast %cst_73 : f32 to vector<2x38xf32>
      %419 = arith.select %416, %417, %418 : vector<2x38xi1>, vector<2x38xf32>
      %420 = arith.addf %376, %419 : vector<2x38xf32>
      %c9_i32 = arith.constant 9 : i32
      %421 = vector.broadcast %16 : vector<1x38xf32> to vector<2x38xf32>
      %422 = arith.mulf %287, %421 : vector<2x38xf32>
      %423 = arith.addf %24, %422 : vector<2x38xf32>
      %424 = vector.broadcast %20 : vector<1x38xf32> to vector<2x38xf32>
      %425 = arith.mulf %287, %424 : vector<2x38xf32>
      %426 = arith.addf %24, %425 : vector<2x38xf32>
      %427 = vector.broadcast %17 : vector<1x38xf32> to vector<2x38xf32>
      %428 = arith.mulf %331, %427 : vector<2x38xf32>
      %429 = arith.addf %423, %428 : vector<2x38xf32>
      %430 = vector.broadcast %21 : vector<1x38xf32> to vector<2x38xf32>
      %431 = arith.mulf %331, %430 : vector<2x38xf32>
      %432 = arith.addf %426, %431 : vector<2x38xf32>
      %433 = vector.broadcast %18 : vector<1x38xf32> to vector<2x38xf32>
      %434 = arith.mulf %375, %433 : vector<2x38xf32>
      %435 = arith.addf %429, %434 : vector<2x38xf32>
      %436 = vector.broadcast %22 : vector<1x38xf32> to vector<2x38xf32>
      %437 = arith.mulf %375, %436 : vector<2x38xf32>
      %438 = arith.addf %432, %437 : vector<2x38xf32>
      %439 = vector.broadcast %19 : vector<1x38xf32> to vector<2x38xf32>
      %440 = arith.mulf %419, %439 : vector<2x38xf32>
      %441 = arith.addf %435, %440 : vector<2x38xf32>
      %442 = vector.broadcast %23 : vector<1x38xf32> to vector<2x38xf32>
      %443 = arith.mulf %419, %442 : vector<2x38xf32>
      %444 = arith.addf %438, %443 : vector<2x38xf32>
      %cst_74 = arith.constant dense<0.000000e+00> : vector<2xf32>
      %445 = vector.multi_reduction <add>, %441, %cst_74 [1] : vector<2x38xf32> to vector<2xf32>
      %446 = vector.shape_cast %445 : vector<2xf32> to vector<2x1xf32>
      %447 = vector.broadcast %446 : vector<2x1xf32> to vector<2x38xf32>
      %448 = arith.subf %447, %441 : vector<2x38xf32>
      %449 = arith.addf %15, %448 : vector<2x38xf32>
      %450 = arith.addf %449, %444 : vector<2x38xf32>
      %451 = math.exp %450 : vector<2x38xf32>
      %452 = vector.shape_cast %451 : vector<2x38xf32> to vector<1x2x38xf32>
      %cst_75 = arith.constant dense<0.000000e+00> : vector<1xf32>
      %453 = vector.multi_reduction <add>, %452, %cst_75 [1, 2] : vector<1x2x38xf32> to vector<1xf32>
      %454 = vector.shape_cast %453 : vector<1xf32> to vector<1x1x1xf32>
      %455 = vector.extract %454[0, 0, 0] : f32 from vector<1x1x1xf32>
      %456 = vector.broadcast %455 : f32 to vector<1x1xf32>
      %cst_76 = arith.constant 7.600000e+01 : f32
      %457 = vector.broadcast %cst_76 : f32 to vector<1x1xf32>
      %458 = arith.divf %456, %457 : vector<1x1xf32>
      %459 = vector.broadcast %458 : vector<1x1xf32> to vector<2x38xf32>
      %460 = arith.cmpf ogt, %451, %459 : vector<2x38xf32>
      %cst_77 = arith.constant 1.000000e+00 : f32
      %cst_78 = arith.constant 0.000000e+00 : f32
      %461 = vector.broadcast %cst_77 : f32 to vector<2x38xf32>
      %462 = vector.broadcast %cst_78 : f32 to vector<2x38xf32>
      %463 = arith.select %460, %461, %462 : vector<2x38xi1>, vector<2x38xf32>
      %464 = arith.addf %420, %463 : vector<2x38xf32>
      %c10_i32 = arith.constant 10 : i32
      %465 = vector.broadcast %16 : vector<1x38xf32> to vector<2x38xf32>
      %466 = arith.mulf %331, %465 : vector<2x38xf32>
      %467 = arith.addf %24, %466 : vector<2x38xf32>
      %468 = vector.broadcast %20 : vector<1x38xf32> to vector<2x38xf32>
      %469 = arith.mulf %331, %468 : vector<2x38xf32>
      %470 = arith.addf %24, %469 : vector<2x38xf32>
      %471 = vector.broadcast %17 : vector<1x38xf32> to vector<2x38xf32>
      %472 = arith.mulf %375, %471 : vector<2x38xf32>
      %473 = arith.addf %467, %472 : vector<2x38xf32>
      %474 = vector.broadcast %21 : vector<1x38xf32> to vector<2x38xf32>
      %475 = arith.mulf %375, %474 : vector<2x38xf32>
      %476 = arith.addf %470, %475 : vector<2x38xf32>
      %477 = vector.broadcast %18 : vector<1x38xf32> to vector<2x38xf32>
      %478 = arith.mulf %419, %477 : vector<2x38xf32>
      %479 = arith.addf %473, %478 : vector<2x38xf32>
      %480 = vector.broadcast %22 : vector<1x38xf32> to vector<2x38xf32>
      %481 = arith.mulf %419, %480 : vector<2x38xf32>
      %482 = arith.addf %476, %481 : vector<2x38xf32>
      %483 = vector.broadcast %19 : vector<1x38xf32> to vector<2x38xf32>
      %484 = arith.mulf %463, %483 : vector<2x38xf32>
      %485 = arith.addf %479, %484 : vector<2x38xf32>
      %486 = vector.broadcast %23 : vector<1x38xf32> to vector<2x38xf32>
      %487 = arith.mulf %463, %486 : vector<2x38xf32>
      %488 = arith.addf %482, %487 : vector<2x38xf32>
      %cst_79 = arith.constant dense<0.000000e+00> : vector<2xf32>
      %489 = vector.multi_reduction <add>, %485, %cst_79 [1] : vector<2x38xf32> to vector<2xf32>
      %490 = vector.shape_cast %489 : vector<2xf32> to vector<2x1xf32>
      %491 = vector.broadcast %490 : vector<2x1xf32> to vector<2x38xf32>
      %492 = arith.subf %491, %485 : vector<2x38xf32>
      %493 = arith.addf %15, %492 : vector<2x38xf32>
      %494 = arith.addf %493, %488 : vector<2x38xf32>
      %495 = math.exp %494 : vector<2x38xf32>
      %496 = vector.shape_cast %495 : vector<2x38xf32> to vector<1x2x38xf32>
      %cst_80 = arith.constant dense<0.000000e+00> : vector<1xf32>
      %497 = vector.multi_reduction <add>, %496, %cst_80 [1, 2] : vector<1x2x38xf32> to vector<1xf32>
      %498 = vector.shape_cast %497 : vector<1xf32> to vector<1x1x1xf32>
      %499 = vector.extract %498[0, 0, 0] : f32 from vector<1x1x1xf32>
      %500 = vector.broadcast %499 : f32 to vector<1x1xf32>
      %cst_81 = arith.constant 7.600000e+01 : f32
      %501 = vector.broadcast %cst_81 : f32 to vector<1x1xf32>
      %502 = arith.divf %500, %501 : vector<1x1xf32>
      %503 = vector.broadcast %502 : vector<1x1xf32> to vector<2x38xf32>
      %504 = arith.cmpf ogt, %495, %503 : vector<2x38xf32>
      %cst_82 = arith.constant 1.000000e+00 : f32
      %cst_83 = arith.constant 0.000000e+00 : f32
      %505 = vector.broadcast %cst_82 : f32 to vector<2x38xf32>
      %506 = vector.broadcast %cst_83 : f32 to vector<2x38xf32>
      %507 = arith.select %504, %505, %506 : vector<2x38xi1>, vector<2x38xf32>
      %508 = arith.addf %464, %507 : vector<2x38xf32>
      %c11_i32 = arith.constant 11 : i32
      %509 = vector.broadcast %16 : vector<1x38xf32> to vector<2x38xf32>
      %510 = arith.mulf %375, %509 : vector<2x38xf32>
      %511 = arith.addf %24, %510 : vector<2x38xf32>
      %512 = vector.broadcast %20 : vector<1x38xf32> to vector<2x38xf32>
      %513 = arith.mulf %375, %512 : vector<2x38xf32>
      %514 = arith.addf %24, %513 : vector<2x38xf32>
      %515 = vector.broadcast %17 : vector<1x38xf32> to vector<2x38xf32>
      %516 = arith.mulf %419, %515 : vector<2x38xf32>
      %517 = arith.addf %511, %516 : vector<2x38xf32>
      %518 = vector.broadcast %21 : vector<1x38xf32> to vector<2x38xf32>
      %519 = arith.mulf %419, %518 : vector<2x38xf32>
      %520 = arith.addf %514, %519 : vector<2x38xf32>
      %521 = vector.broadcast %18 : vector<1x38xf32> to vector<2x38xf32>
      %522 = arith.mulf %463, %521 : vector<2x38xf32>
      %523 = arith.addf %517, %522 : vector<2x38xf32>
      %524 = vector.broadcast %22 : vector<1x38xf32> to vector<2x38xf32>
      %525 = arith.mulf %463, %524 : vector<2x38xf32>
      %526 = arith.addf %520, %525 : vector<2x38xf32>
      %527 = vector.broadcast %19 : vector<1x38xf32> to vector<2x38xf32>
      %528 = arith.mulf %507, %527 : vector<2x38xf32>
      %529 = arith.addf %523, %528 : vector<2x38xf32>
      %530 = vector.broadcast %23 : vector<1x38xf32> to vector<2x38xf32>
      %531 = arith.mulf %507, %530 : vector<2x38xf32>
      %532 = arith.addf %526, %531 : vector<2x38xf32>
      %cst_84 = arith.constant dense<0.000000e+00> : vector<2xf32>
      %533 = vector.multi_reduction <add>, %529, %cst_84 [1] : vector<2x38xf32> to vector<2xf32>
      %534 = vector.shape_cast %533 : vector<2xf32> to vector<2x1xf32>
      %535 = vector.broadcast %534 : vector<2x1xf32> to vector<2x38xf32>
      %536 = arith.subf %535, %529 : vector<2x38xf32>
      %537 = arith.addf %15, %536 : vector<2x38xf32>
      %538 = arith.addf %537, %532 : vector<2x38xf32>
      %539 = math.exp %538 : vector<2x38xf32>
      %540 = vector.shape_cast %539 : vector<2x38xf32> to vector<1x2x38xf32>
      %cst_85 = arith.constant dense<0.000000e+00> : vector<1xf32>
      %541 = vector.multi_reduction <add>, %540, %cst_85 [1, 2] : vector<1x2x38xf32> to vector<1xf32>
      %542 = vector.shape_cast %541 : vector<1xf32> to vector<1x1x1xf32>
      %543 = vector.extract %542[0, 0, 0] : f32 from vector<1x1x1xf32>
      %544 = vector.broadcast %543 : f32 to vector<1x1xf32>
      %cst_86 = arith.constant 7.600000e+01 : f32
      %545 = vector.broadcast %cst_86 : f32 to vector<1x1xf32>
      %546 = arith.divf %544, %545 : vector<1x1xf32>
      %547 = vector.broadcast %546 : vector<1x1xf32> to vector<2x38xf32>
      %548 = arith.cmpf ogt, %539, %547 : vector<2x38xf32>
      %cst_87 = arith.constant 1.000000e+00 : f32
      %cst_88 = arith.constant 0.000000e+00 : f32
      %549 = vector.broadcast %cst_87 : f32 to vector<2x38xf32>
      %550 = vector.broadcast %cst_88 : f32 to vector<2x38xf32>
      %551 = arith.select %548, %549, %550 : vector<2x38xi1>, vector<2x38xf32>
      %552 = arith.addf %508, %551 : vector<2x38xf32>
      %c12_i32 = arith.constant 12 : i32
      %553 = vector.broadcast %16 : vector<1x38xf32> to vector<2x38xf32>
      %554 = arith.mulf %419, %553 : vector<2x38xf32>
      %555 = arith.addf %24, %554 : vector<2x38xf32>
      %556 = vector.broadcast %20 : vector<1x38xf32> to vector<2x38xf32>
      %557 = arith.mulf %419, %556 : vector<2x38xf32>
      %558 = arith.addf %24, %557 : vector<2x38xf32>
      %559 = vector.broadcast %17 : vector<1x38xf32> to vector<2x38xf32>
      %560 = arith.mulf %463, %559 : vector<2x38xf32>
      %561 = arith.addf %555, %560 : vector<2x38xf32>
      %562 = vector.broadcast %21 : vector<1x38xf32> to vector<2x38xf32>
      %563 = arith.mulf %463, %562 : vector<2x38xf32>
      %564 = arith.addf %558, %563 : vector<2x38xf32>
      %565 = vector.broadcast %18 : vector<1x38xf32> to vector<2x38xf32>
      %566 = arith.mulf %507, %565 : vector<2x38xf32>
      %567 = arith.addf %561, %566 : vector<2x38xf32>
      %568 = vector.broadcast %22 : vector<1x38xf32> to vector<2x38xf32>
      %569 = arith.mulf %507, %568 : vector<2x38xf32>
      %570 = arith.addf %564, %569 : vector<2x38xf32>
      %571 = vector.broadcast %19 : vector<1x38xf32> to vector<2x38xf32>
      %572 = arith.mulf %551, %571 : vector<2x38xf32>
      %573 = arith.addf %567, %572 : vector<2x38xf32>
      %574 = vector.broadcast %23 : vector<1x38xf32> to vector<2x38xf32>
      %575 = arith.mulf %551, %574 : vector<2x38xf32>
      %576 = arith.addf %570, %575 : vector<2x38xf32>
      %cst_89 = arith.constant dense<0.000000e+00> : vector<2xf32>
      %577 = vector.multi_reduction <add>, %573, %cst_89 [1] : vector<2x38xf32> to vector<2xf32>
      %578 = vector.shape_cast %577 : vector<2xf32> to vector<2x1xf32>
      %579 = vector.broadcast %578 : vector<2x1xf32> to vector<2x38xf32>
      %580 = arith.subf %579, %573 : vector<2x38xf32>
      %581 = arith.addf %15, %580 : vector<2x38xf32>
      %582 = arith.addf %581, %576 : vector<2x38xf32>
      %583 = math.exp %582 : vector<2x38xf32>
      %584 = vector.shape_cast %583 : vector<2x38xf32> to vector<1x2x38xf32>
      %cst_90 = arith.constant dense<0.000000e+00> : vector<1xf32>
      %585 = vector.multi_reduction <add>, %584, %cst_90 [1, 2] : vector<1x2x38xf32> to vector<1xf32>
      %586 = vector.shape_cast %585 : vector<1xf32> to vector<1x1x1xf32>
      %587 = vector.extract %586[0, 0, 0] : f32 from vector<1x1x1xf32>
      %588 = vector.broadcast %587 : f32 to vector<1x1xf32>
      %cst_91 = arith.constant 7.600000e+01 : f32
      %589 = vector.broadcast %cst_91 : f32 to vector<1x1xf32>
      %590 = arith.divf %588, %589 : vector<1x1xf32>
      %591 = vector.broadcast %590 : vector<1x1xf32> to vector<2x38xf32>
      %592 = arith.cmpf ogt, %583, %591 : vector<2x38xf32>
      %cst_92 = arith.constant 1.000000e+00 : f32
      %cst_93 = arith.constant 0.000000e+00 : f32
      %593 = vector.broadcast %cst_92 : f32 to vector<2x38xf32>
      %594 = vector.broadcast %cst_93 : f32 to vector<2x38xf32>
      %595 = arith.select %592, %593, %594 : vector<2x38xi1>, vector<2x38xf32>
      %596 = arith.addf %552, %595 : vector<2x38xf32>
      %c13_i32 = arith.constant 13 : i32
      %597 = vector.broadcast %16 : vector<1x38xf32> to vector<2x38xf32>
      %598 = arith.mulf %463, %597 : vector<2x38xf32>
      %599 = arith.addf %24, %598 : vector<2x38xf32>
      %600 = vector.broadcast %20 : vector<1x38xf32> to vector<2x38xf32>
      %601 = arith.mulf %463, %600 : vector<2x38xf32>
      %602 = arith.addf %24, %601 : vector<2x38xf32>
      %603 = vector.broadcast %17 : vector<1x38xf32> to vector<2x38xf32>
      %604 = arith.mulf %507, %603 : vector<2x38xf32>
      %605 = arith.addf %599, %604 : vector<2x38xf32>
      %606 = vector.broadcast %21 : vector<1x38xf32> to vector<2x38xf32>
      %607 = arith.mulf %507, %606 : vector<2x38xf32>
      %608 = arith.addf %602, %607 : vector<2x38xf32>
      %609 = vector.broadcast %18 : vector<1x38xf32> to vector<2x38xf32>
      %610 = arith.mulf %551, %609 : vector<2x38xf32>
      %611 = arith.addf %605, %610 : vector<2x38xf32>
      %612 = vector.broadcast %22 : vector<1x38xf32> to vector<2x38xf32>
      %613 = arith.mulf %551, %612 : vector<2x38xf32>
      %614 = arith.addf %608, %613 : vector<2x38xf32>
      %615 = vector.broadcast %19 : vector<1x38xf32> to vector<2x38xf32>
      %616 = arith.mulf %595, %615 : vector<2x38xf32>
      %617 = arith.addf %611, %616 : vector<2x38xf32>
      %618 = vector.broadcast %23 : vector<1x38xf32> to vector<2x38xf32>
      %619 = arith.mulf %595, %618 : vector<2x38xf32>
      %620 = arith.addf %614, %619 : vector<2x38xf32>
      %cst_94 = arith.constant dense<0.000000e+00> : vector<2xf32>
      %621 = vector.multi_reduction <add>, %617, %cst_94 [1] : vector<2x38xf32> to vector<2xf32>
      %622 = vector.shape_cast %621 : vector<2xf32> to vector<2x1xf32>
      %623 = vector.broadcast %622 : vector<2x1xf32> to vector<2x38xf32>
      %624 = arith.subf %623, %617 : vector<2x38xf32>
      %625 = arith.addf %15, %624 : vector<2x38xf32>
      %626 = arith.addf %625, %620 : vector<2x38xf32>
      %627 = math.exp %626 : vector<2x38xf32>
      %628 = vector.shape_cast %627 : vector<2x38xf32> to vector<1x2x38xf32>
      %cst_95 = arith.constant dense<0.000000e+00> : vector<1xf32>
      %629 = vector.multi_reduction <add>, %628, %cst_95 [1, 2] : vector<1x2x38xf32> to vector<1xf32>
      %630 = vector.shape_cast %629 : vector<1xf32> to vector<1x1x1xf32>
      %631 = vector.extract %630[0, 0, 0] : f32 from vector<1x1x1xf32>
      %632 = vector.broadcast %631 : f32 to vector<1x1xf32>
      %cst_96 = arith.constant 7.600000e+01 : f32
      %633 = vector.broadcast %cst_96 : f32 to vector<1x1xf32>
      %634 = arith.divf %632, %633 : vector<1x1xf32>
      %635 = vector.broadcast %634 : vector<1x1xf32> to vector<2x38xf32>
      %636 = arith.cmpf ogt, %627, %635 : vector<2x38xf32>
      %cst_97 = arith.constant 1.000000e+00 : f32
      %cst_98 = arith.constant 0.000000e+00 : f32
      %637 = vector.broadcast %cst_97 : f32 to vector<2x38xf32>
      %638 = vector.broadcast %cst_98 : f32 to vector<2x38xf32>
      %639 = arith.select %636, %637, %638 : vector<2x38xi1>, vector<2x38xf32>
      %640 = arith.addf %596, %639 : vector<2x38xf32>
      %c14_i32 = arith.constant 14 : i32
      %641 = vector.broadcast %16 : vector<1x38xf32> to vector<2x38xf32>
      %642 = arith.mulf %507, %641 : vector<2x38xf32>
      %643 = arith.addf %24, %642 : vector<2x38xf32>
      %644 = vector.broadcast %20 : vector<1x38xf32> to vector<2x38xf32>
      %645 = arith.mulf %507, %644 : vector<2x38xf32>
      %646 = arith.addf %24, %645 : vector<2x38xf32>
      %647 = vector.broadcast %17 : vector<1x38xf32> to vector<2x38xf32>
      %648 = arith.mulf %551, %647 : vector<2x38xf32>
      %649 = arith.addf %643, %648 : vector<2x38xf32>
      %650 = vector.broadcast %21 : vector<1x38xf32> to vector<2x38xf32>
      %651 = arith.mulf %551, %650 : vector<2x38xf32>
      %652 = arith.addf %646, %651 : vector<2x38xf32>
      %653 = vector.broadcast %18 : vector<1x38xf32> to vector<2x38xf32>
      %654 = arith.mulf %595, %653 : vector<2x38xf32>
      %655 = arith.addf %649, %654 : vector<2x38xf32>
      %656 = vector.broadcast %22 : vector<1x38xf32> to vector<2x38xf32>
      %657 = arith.mulf %595, %656 : vector<2x38xf32>
      %658 = arith.addf %652, %657 : vector<2x38xf32>
      %659 = vector.broadcast %19 : vector<1x38xf32> to vector<2x38xf32>
      %660 = arith.mulf %639, %659 : vector<2x38xf32>
      %661 = arith.addf %655, %660 : vector<2x38xf32>
      %662 = vector.broadcast %23 : vector<1x38xf32> to vector<2x38xf32>
      %663 = arith.mulf %639, %662 : vector<2x38xf32>
      %664 = arith.addf %658, %663 : vector<2x38xf32>
      %cst_99 = arith.constant dense<0.000000e+00> : vector<2xf32>
      %665 = vector.multi_reduction <add>, %661, %cst_99 [1] : vector<2x38xf32> to vector<2xf32>
      %666 = vector.shape_cast %665 : vector<2xf32> to vector<2x1xf32>
      %667 = vector.broadcast %666 : vector<2x1xf32> to vector<2x38xf32>
      %668 = arith.subf %667, %661 : vector<2x38xf32>
      %669 = arith.addf %15, %668 : vector<2x38xf32>
      %670 = arith.addf %669, %664 : vector<2x38xf32>
      %671 = math.exp %670 : vector<2x38xf32>
      %672 = vector.shape_cast %671 : vector<2x38xf32> to vector<1x2x38xf32>
      %cst_100 = arith.constant dense<0.000000e+00> : vector<1xf32>
      %673 = vector.multi_reduction <add>, %672, %cst_100 [1, 2] : vector<1x2x38xf32> to vector<1xf32>
      %674 = vector.shape_cast %673 : vector<1xf32> to vector<1x1x1xf32>
      %675 = vector.extract %674[0, 0, 0] : f32 from vector<1x1x1xf32>
      %676 = vector.broadcast %675 : f32 to vector<1x1xf32>
      %cst_101 = arith.constant 7.600000e+01 : f32
      %677 = vector.broadcast %cst_101 : f32 to vector<1x1xf32>
      %678 = arith.divf %676, %677 : vector<1x1xf32>
      %679 = vector.broadcast %678 : vector<1x1xf32> to vector<2x38xf32>
      %680 = arith.cmpf ogt, %671, %679 : vector<2x38xf32>
      %cst_102 = arith.constant 1.000000e+00 : f32
      %cst_103 = arith.constant 0.000000e+00 : f32
      %681 = vector.broadcast %cst_102 : f32 to vector<2x38xf32>
      %682 = vector.broadcast %cst_103 : f32 to vector<2x38xf32>
      %683 = arith.select %680, %681, %682 : vector<2x38xi1>, vector<2x38xf32>
      %684 = arith.addf %640, %683 : vector<2x38xf32>
      %c15_i32 = arith.constant 15 : i32
      %685 = vector.broadcast %16 : vector<1x38xf32> to vector<2x38xf32>
      %686 = arith.mulf %551, %685 : vector<2x38xf32>
      %687 = arith.addf %24, %686 : vector<2x38xf32>
      %688 = vector.broadcast %20 : vector<1x38xf32> to vector<2x38xf32>
      %689 = arith.mulf %551, %688 : vector<2x38xf32>
      %690 = arith.addf %24, %689 : vector<2x38xf32>
      %691 = vector.broadcast %17 : vector<1x38xf32> to vector<2x38xf32>
      %692 = arith.mulf %595, %691 : vector<2x38xf32>
      %693 = arith.addf %687, %692 : vector<2x38xf32>
      %694 = vector.broadcast %21 : vector<1x38xf32> to vector<2x38xf32>
      %695 = arith.mulf %595, %694 : vector<2x38xf32>
      %696 = arith.addf %690, %695 : vector<2x38xf32>
      %697 = vector.broadcast %18 : vector<1x38xf32> to vector<2x38xf32>
      %698 = arith.mulf %639, %697 : vector<2x38xf32>
      %699 = arith.addf %693, %698 : vector<2x38xf32>
      %700 = vector.broadcast %22 : vector<1x38xf32> to vector<2x38xf32>
      %701 = arith.mulf %639, %700 : vector<2x38xf32>
      %702 = arith.addf %696, %701 : vector<2x38xf32>
      %703 = vector.broadcast %19 : vector<1x38xf32> to vector<2x38xf32>
      %704 = arith.mulf %683, %703 : vector<2x38xf32>
      %705 = arith.addf %699, %704 : vector<2x38xf32>
      %706 = vector.broadcast %23 : vector<1x38xf32> to vector<2x38xf32>
      %707 = arith.mulf %683, %706 : vector<2x38xf32>
      %708 = arith.addf %702, %707 : vector<2x38xf32>
      %cst_104 = arith.constant dense<0.000000e+00> : vector<2xf32>
      %709 = vector.multi_reduction <add>, %705, %cst_104 [1] : vector<2x38xf32> to vector<2xf32>
      %710 = vector.shape_cast %709 : vector<2xf32> to vector<2x1xf32>
      %711 = vector.broadcast %710 : vector<2x1xf32> to vector<2x38xf32>
      %712 = arith.subf %711, %705 : vector<2x38xf32>
      %713 = arith.addf %15, %712 : vector<2x38xf32>
      %714 = arith.addf %713, %708 : vector<2x38xf32>
      %715 = math.exp %714 : vector<2x38xf32>
      %716 = vector.shape_cast %715 : vector<2x38xf32> to vector<1x2x38xf32>
      %cst_105 = arith.constant dense<0.000000e+00> : vector<1xf32>
      %717 = vector.multi_reduction <add>, %716, %cst_105 [1, 2] : vector<1x2x38xf32> to vector<1xf32>
      %718 = vector.shape_cast %717 : vector<1xf32> to vector<1x1x1xf32>
      %719 = vector.extract %718[0, 0, 0] : f32 from vector<1x1x1xf32>
      %720 = vector.broadcast %719 : f32 to vector<1x1xf32>
      %cst_106 = arith.constant 7.600000e+01 : f32
      %721 = vector.broadcast %cst_106 : f32 to vector<1x1xf32>
      %722 = arith.divf %720, %721 : vector<1x1xf32>
      %723 = vector.broadcast %722 : vector<1x1xf32> to vector<2x38xf32>
      %724 = arith.cmpf ogt, %715, %723 : vector<2x38xf32>
      %cst_107 = arith.constant 1.000000e+00 : f32
      %cst_108 = arith.constant 0.000000e+00 : f32
      %725 = vector.broadcast %cst_107 : f32 to vector<2x38xf32>
      %726 = vector.broadcast %cst_108 : f32 to vector<2x38xf32>
      %727 = arith.select %724, %725, %726 : vector<2x38xi1>, vector<2x38xf32>
      %728 = arith.addf %684, %727 : vector<2x38xf32>
      %c16_i32 = arith.constant 16 : i32
      %729 = vector.broadcast %16 : vector<1x38xf32> to vector<2x38xf32>
      %730 = arith.mulf %595, %729 : vector<2x38xf32>
      %731 = arith.addf %24, %730 : vector<2x38xf32>
      %732 = vector.broadcast %20 : vector<1x38xf32> to vector<2x38xf32>
      %733 = arith.mulf %595, %732 : vector<2x38xf32>
      %734 = arith.addf %24, %733 : vector<2x38xf32>
      %735 = vector.broadcast %17 : vector<1x38xf32> to vector<2x38xf32>
      %736 = arith.mulf %639, %735 : vector<2x38xf32>
      %737 = arith.addf %731, %736 : vector<2x38xf32>
      %738 = vector.broadcast %21 : vector<1x38xf32> to vector<2x38xf32>
      %739 = arith.mulf %639, %738 : vector<2x38xf32>
      %740 = arith.addf %734, %739 : vector<2x38xf32>
      %741 = vector.broadcast %18 : vector<1x38xf32> to vector<2x38xf32>
      %742 = arith.mulf %683, %741 : vector<2x38xf32>
      %743 = arith.addf %737, %742 : vector<2x38xf32>
      %744 = vector.broadcast %22 : vector<1x38xf32> to vector<2x38xf32>
      %745 = arith.mulf %683, %744 : vector<2x38xf32>
      %746 = arith.addf %740, %745 : vector<2x38xf32>
      %747 = vector.broadcast %19 : vector<1x38xf32> to vector<2x38xf32>
      %748 = arith.mulf %727, %747 : vector<2x38xf32>
      %749 = arith.addf %743, %748 : vector<2x38xf32>
      %750 = vector.broadcast %23 : vector<1x38xf32> to vector<2x38xf32>
      %751 = arith.mulf %727, %750 : vector<2x38xf32>
      %752 = arith.addf %746, %751 : vector<2x38xf32>
      %cst_109 = arith.constant dense<0.000000e+00> : vector<2xf32>
      %753 = vector.multi_reduction <add>, %749, %cst_109 [1] : vector<2x38xf32> to vector<2xf32>
      %754 = vector.shape_cast %753 : vector<2xf32> to vector<2x1xf32>
      %755 = vector.broadcast %754 : vector<2x1xf32> to vector<2x38xf32>
      %756 = arith.subf %755, %749 : vector<2x38xf32>
      %757 = arith.addf %15, %756 : vector<2x38xf32>
      %758 = arith.addf %757, %752 : vector<2x38xf32>
      %759 = math.exp %758 : vector<2x38xf32>
      %760 = vector.shape_cast %759 : vector<2x38xf32> to vector<1x2x38xf32>
      %cst_110 = arith.constant dense<0.000000e+00> : vector<1xf32>
      %761 = vector.multi_reduction <add>, %760, %cst_110 [1, 2] : vector<1x2x38xf32> to vector<1xf32>
      %762 = vector.shape_cast %761 : vector<1xf32> to vector<1x1x1xf32>
      %763 = vector.extract %762[0, 0, 0] : f32 from vector<1x1x1xf32>
      %764 = vector.broadcast %763 : f32 to vector<1x1xf32>
      %cst_111 = arith.constant 7.600000e+01 : f32
      %765 = vector.broadcast %cst_111 : f32 to vector<1x1xf32>
      %766 = arith.divf %764, %765 : vector<1x1xf32>
      %767 = vector.broadcast %766 : vector<1x1xf32> to vector<2x38xf32>
      %768 = arith.cmpf ogt, %759, %767 : vector<2x38xf32>
      %cst_112 = arith.constant 1.000000e+00 : f32
      %cst_113 = arith.constant 0.000000e+00 : f32
      %769 = vector.broadcast %cst_112 : f32 to vector<2x38xf32>
      %770 = vector.broadcast %cst_113 : f32 to vector<2x38xf32>
      %771 = arith.select %768, %769, %770 : vector<2x38xi1>, vector<2x38xf32>
      %772 = arith.addf %728, %771 : vector<2x38xf32>
      %c17_i32 = arith.constant 17 : i32
      %773 = vector.broadcast %16 : vector<1x38xf32> to vector<2x38xf32>
      %774 = arith.mulf %639, %773 : vector<2x38xf32>
      %775 = arith.addf %24, %774 : vector<2x38xf32>
      %776 = vector.broadcast %20 : vector<1x38xf32> to vector<2x38xf32>
      %777 = arith.mulf %639, %776 : vector<2x38xf32>
      %778 = arith.addf %24, %777 : vector<2x38xf32>
      %779 = vector.broadcast %17 : vector<1x38xf32> to vector<2x38xf32>
      %780 = arith.mulf %683, %779 : vector<2x38xf32>
      %781 = arith.addf %775, %780 : vector<2x38xf32>
      %782 = vector.broadcast %21 : vector<1x38xf32> to vector<2x38xf32>
      %783 = arith.mulf %683, %782 : vector<2x38xf32>
      %784 = arith.addf %778, %783 : vector<2x38xf32>
      %785 = vector.broadcast %18 : vector<1x38xf32> to vector<2x38xf32>
      %786 = arith.mulf %727, %785 : vector<2x38xf32>
      %787 = arith.addf %781, %786 : vector<2x38xf32>
      %788 = vector.broadcast %22 : vector<1x38xf32> to vector<2x38xf32>
      %789 = arith.mulf %727, %788 : vector<2x38xf32>
      %790 = arith.addf %784, %789 : vector<2x38xf32>
      %791 = vector.broadcast %19 : vector<1x38xf32> to vector<2x38xf32>
      %792 = arith.mulf %771, %791 : vector<2x38xf32>
      %793 = arith.addf %787, %792 : vector<2x38xf32>
      %794 = vector.broadcast %23 : vector<1x38xf32> to vector<2x38xf32>
      %795 = arith.mulf %771, %794 : vector<2x38xf32>
      %796 = arith.addf %790, %795 : vector<2x38xf32>
      %cst_114 = arith.constant dense<0.000000e+00> : vector<2xf32>
      %797 = vector.multi_reduction <add>, %793, %cst_114 [1] : vector<2x38xf32> to vector<2xf32>
      %798 = vector.shape_cast %797 : vector<2xf32> to vector<2x1xf32>
      %799 = vector.broadcast %798 : vector<2x1xf32> to vector<2x38xf32>
      %800 = arith.subf %799, %793 : vector<2x38xf32>
      %801 = arith.addf %15, %800 : vector<2x38xf32>
      %802 = arith.addf %801, %796 : vector<2x38xf32>
      %803 = math.exp %802 : vector<2x38xf32>
      %804 = vector.shape_cast %803 : vector<2x38xf32> to vector<1x2x38xf32>
      %cst_115 = arith.constant dense<0.000000e+00> : vector<1xf32>
      %805 = vector.multi_reduction <add>, %804, %cst_115 [1, 2] : vector<1x2x38xf32> to vector<1xf32>
      %806 = vector.shape_cast %805 : vector<1xf32> to vector<1x1x1xf32>
      %807 = vector.extract %806[0, 0, 0] : f32 from vector<1x1x1xf32>
      %808 = vector.broadcast %807 : f32 to vector<1x1xf32>
      %cst_116 = arith.constant 7.600000e+01 : f32
      %809 = vector.broadcast %cst_116 : f32 to vector<1x1xf32>
      %810 = arith.divf %808, %809 : vector<1x1xf32>
      %811 = vector.broadcast %810 : vector<1x1xf32> to vector<2x38xf32>
      %812 = arith.cmpf ogt, %803, %811 : vector<2x38xf32>
      %cst_117 = arith.constant 1.000000e+00 : f32
      %cst_118 = arith.constant 0.000000e+00 : f32
      %813 = vector.broadcast %cst_117 : f32 to vector<2x38xf32>
      %814 = vector.broadcast %cst_118 : f32 to vector<2x38xf32>
      %815 = arith.select %812, %813, %814 : vector<2x38xi1>, vector<2x38xf32>
      %816 = arith.addf %772, %815 : vector<2x38xf32>
      %c18_i32 = arith.constant 18 : i32
      %817 = vector.broadcast %16 : vector<1x38xf32> to vector<2x38xf32>
      %818 = arith.mulf %683, %817 : vector<2x38xf32>
      %819 = arith.addf %24, %818 : vector<2x38xf32>
      %820 = vector.broadcast %20 : vector<1x38xf32> to vector<2x38xf32>
      %821 = arith.mulf %683, %820 : vector<2x38xf32>
      %822 = arith.addf %24, %821 : vector<2x38xf32>
      %823 = vector.broadcast %17 : vector<1x38xf32> to vector<2x38xf32>
      %824 = arith.mulf %727, %823 : vector<2x38xf32>
      %825 = arith.addf %819, %824 : vector<2x38xf32>
      %826 = vector.broadcast %21 : vector<1x38xf32> to vector<2x38xf32>
      %827 = arith.mulf %727, %826 : vector<2x38xf32>
      %828 = arith.addf %822, %827 : vector<2x38xf32>
      %829 = vector.broadcast %18 : vector<1x38xf32> to vector<2x38xf32>
      %830 = arith.mulf %771, %829 : vector<2x38xf32>
      %831 = arith.addf %825, %830 : vector<2x38xf32>
      %832 = vector.broadcast %22 : vector<1x38xf32> to vector<2x38xf32>
      %833 = arith.mulf %771, %832 : vector<2x38xf32>
      %834 = arith.addf %828, %833 : vector<2x38xf32>
      %835 = vector.broadcast %19 : vector<1x38xf32> to vector<2x38xf32>
      %836 = arith.mulf %815, %835 : vector<2x38xf32>
      %837 = arith.addf %831, %836 : vector<2x38xf32>
      %838 = vector.broadcast %23 : vector<1x38xf32> to vector<2x38xf32>
      %839 = arith.mulf %815, %838 : vector<2x38xf32>
      %840 = arith.addf %834, %839 : vector<2x38xf32>
      %cst_119 = arith.constant dense<0.000000e+00> : vector<2xf32>
      %841 = vector.multi_reduction <add>, %837, %cst_119 [1] : vector<2x38xf32> to vector<2xf32>
      %842 = vector.shape_cast %841 : vector<2xf32> to vector<2x1xf32>
      %843 = vector.broadcast %842 : vector<2x1xf32> to vector<2x38xf32>
      %844 = arith.subf %843, %837 : vector<2x38xf32>
      %845 = arith.addf %15, %844 : vector<2x38xf32>
      %846 = arith.addf %845, %840 : vector<2x38xf32>
      %847 = math.exp %846 : vector<2x38xf32>
      %848 = vector.shape_cast %847 : vector<2x38xf32> to vector<1x2x38xf32>
      %cst_120 = arith.constant dense<0.000000e+00> : vector<1xf32>
      %849 = vector.multi_reduction <add>, %848, %cst_120 [1, 2] : vector<1x2x38xf32> to vector<1xf32>
      %850 = vector.shape_cast %849 : vector<1xf32> to vector<1x1x1xf32>
      %851 = vector.extract %850[0, 0, 0] : f32 from vector<1x1x1xf32>
      %852 = vector.broadcast %851 : f32 to vector<1x1xf32>
      %cst_121 = arith.constant 7.600000e+01 : f32
      %853 = vector.broadcast %cst_121 : f32 to vector<1x1xf32>
      %854 = arith.divf %852, %853 : vector<1x1xf32>
      %855 = vector.broadcast %854 : vector<1x1xf32> to vector<2x38xf32>
      %856 = arith.cmpf ogt, %847, %855 : vector<2x38xf32>
      %cst_122 = arith.constant 1.000000e+00 : f32
      %cst_123 = arith.constant 0.000000e+00 : f32
      %857 = vector.broadcast %cst_122 : f32 to vector<2x38xf32>
      %858 = vector.broadcast %cst_123 : f32 to vector<2x38xf32>
      %859 = arith.select %856, %857, %858 : vector<2x38xi1>, vector<2x38xf32>
      %860 = arith.addf %816, %859 : vector<2x38xf32>
      %c19_i32 = arith.constant 19 : i32
      %861 = vector.broadcast %16 : vector<1x38xf32> to vector<2x38xf32>
      %862 = arith.mulf %727, %861 : vector<2x38xf32>
      %863 = arith.addf %24, %862 : vector<2x38xf32>
      %864 = vector.broadcast %20 : vector<1x38xf32> to vector<2x38xf32>
      %865 = arith.mulf %727, %864 : vector<2x38xf32>
      %866 = arith.addf %24, %865 : vector<2x38xf32>
      %867 = vector.broadcast %17 : vector<1x38xf32> to vector<2x38xf32>
      %868 = arith.mulf %771, %867 : vector<2x38xf32>
      %869 = arith.addf %863, %868 : vector<2x38xf32>
      %870 = vector.broadcast %21 : vector<1x38xf32> to vector<2x38xf32>
      %871 = arith.mulf %771, %870 : vector<2x38xf32>
      %872 = arith.addf %866, %871 : vector<2x38xf32>
      %873 = vector.broadcast %18 : vector<1x38xf32> to vector<2x38xf32>
      %874 = arith.mulf %815, %873 : vector<2x38xf32>
      %875 = arith.addf %869, %874 : vector<2x38xf32>
      %876 = vector.broadcast %22 : vector<1x38xf32> to vector<2x38xf32>
      %877 = arith.mulf %815, %876 : vector<2x38xf32>
      %878 = arith.addf %872, %877 : vector<2x38xf32>
      %879 = vector.broadcast %19 : vector<1x38xf32> to vector<2x38xf32>
      %880 = arith.mulf %859, %879 : vector<2x38xf32>
      %881 = arith.addf %875, %880 : vector<2x38xf32>
      %882 = vector.broadcast %23 : vector<1x38xf32> to vector<2x38xf32>
      %883 = arith.mulf %859, %882 : vector<2x38xf32>
      %884 = arith.addf %878, %883 : vector<2x38xf32>
      %cst_124 = arith.constant dense<0.000000e+00> : vector<2xf32>
      %885 = vector.multi_reduction <add>, %881, %cst_124 [1] : vector<2x38xf32> to vector<2xf32>
      %886 = vector.shape_cast %885 : vector<2xf32> to vector<2x1xf32>
      %887 = vector.broadcast %886 : vector<2x1xf32> to vector<2x38xf32>
      %888 = arith.subf %887, %881 : vector<2x38xf32>
      %889 = arith.addf %15, %888 : vector<2x38xf32>
      %890 = arith.addf %889, %884 : vector<2x38xf32>
      %891 = math.exp %890 : vector<2x38xf32>
      %892 = vector.shape_cast %891 : vector<2x38xf32> to vector<1x2x38xf32>
      %cst_125 = arith.constant dense<0.000000e+00> : vector<1xf32>
      %893 = vector.multi_reduction <add>, %892, %cst_125 [1, 2] : vector<1x2x38xf32> to vector<1xf32>
      %894 = vector.shape_cast %893 : vector<1xf32> to vector<1x1x1xf32>
      %895 = vector.extract %894[0, 0, 0] : f32 from vector<1x1x1xf32>
      %896 = vector.broadcast %895 : f32 to vector<1x1xf32>
      %cst_126 = arith.constant 7.600000e+01 : f32
      %897 = vector.broadcast %cst_126 : f32 to vector<1x1xf32>
      %898 = arith.divf %896, %897 : vector<1x1xf32>
      %899 = vector.broadcast %898 : vector<1x1xf32> to vector<2x38xf32>
      %900 = arith.cmpf ogt, %891, %899 : vector<2x38xf32>
      %cst_127 = arith.constant 1.000000e+00 : f32
      %cst_128 = arith.constant 0.000000e+00 : f32
      %901 = vector.broadcast %cst_127 : f32 to vector<2x38xf32>
      %902 = vector.broadcast %cst_128 : f32 to vector<2x38xf32>
      %903 = arith.select %900, %901, %902 : vector<2x38xi1>, vector<2x38xf32>
      %904 = arith.addf %860, %903 : vector<2x38xf32>
      %c20_i32 = arith.constant 20 : i32
      %905 = vector.broadcast %16 : vector<1x38xf32> to vector<2x38xf32>
      %906 = arith.mulf %771, %905 : vector<2x38xf32>
      %907 = arith.addf %24, %906 : vector<2x38xf32>
      %908 = vector.broadcast %20 : vector<1x38xf32> to vector<2x38xf32>
      %909 = arith.mulf %771, %908 : vector<2x38xf32>
      %910 = arith.addf %24, %909 : vector<2x38xf32>
      %911 = vector.broadcast %17 : vector<1x38xf32> to vector<2x38xf32>
      %912 = arith.mulf %815, %911 : vector<2x38xf32>
      %913 = arith.addf %907, %912 : vector<2x38xf32>
      %914 = vector.broadcast %21 : vector<1x38xf32> to vector<2x38xf32>
      %915 = arith.mulf %815, %914 : vector<2x38xf32>
      %916 = arith.addf %910, %915 : vector<2x38xf32>
      %917 = vector.broadcast %18 : vector<1x38xf32> to vector<2x38xf32>
      %918 = arith.mulf %859, %917 : vector<2x38xf32>
      %919 = arith.addf %913, %918 : vector<2x38xf32>
      %920 = vector.broadcast %22 : vector<1x38xf32> to vector<2x38xf32>
      %921 = arith.mulf %859, %920 : vector<2x38xf32>
      %922 = arith.addf %916, %921 : vector<2x38xf32>
      %923 = vector.broadcast %19 : vector<1x38xf32> to vector<2x38xf32>
      %924 = arith.mulf %903, %923 : vector<2x38xf32>
      %925 = arith.addf %919, %924 : vector<2x38xf32>
      %926 = vector.broadcast %23 : vector<1x38xf32> to vector<2x38xf32>
      %927 = arith.mulf %903, %926 : vector<2x38xf32>
      %928 = arith.addf %922, %927 : vector<2x38xf32>
      %cst_129 = arith.constant dense<0.000000e+00> : vector<2xf32>
      %929 = vector.multi_reduction <add>, %925, %cst_129 [1] : vector<2x38xf32> to vector<2xf32>
      %930 = vector.shape_cast %929 : vector<2xf32> to vector<2x1xf32>
      %931 = vector.broadcast %930 : vector<2x1xf32> to vector<2x38xf32>
      %932 = arith.subf %931, %925 : vector<2x38xf32>
      %933 = arith.addf %15, %932 : vector<2x38xf32>
      %934 = arith.addf %933, %928 : vector<2x38xf32>
      %935 = math.exp %934 : vector<2x38xf32>
      %936 = vector.shape_cast %935 : vector<2x38xf32> to vector<1x2x38xf32>
      %cst_130 = arith.constant dense<0.000000e+00> : vector<1xf32>
      %937 = vector.multi_reduction <add>, %936, %cst_130 [1, 2] : vector<1x2x38xf32> to vector<1xf32>
      %938 = vector.shape_cast %937 : vector<1xf32> to vector<1x1x1xf32>
      %939 = vector.extract %938[0, 0, 0] : f32 from vector<1x1x1xf32>
      %940 = vector.broadcast %939 : f32 to vector<1x1xf32>
      %cst_131 = arith.constant 7.600000e+01 : f32
      %941 = vector.broadcast %cst_131 : f32 to vector<1x1xf32>
      %942 = arith.divf %940, %941 : vector<1x1xf32>
      %943 = vector.broadcast %942 : vector<1x1xf32> to vector<2x38xf32>
      %944 = arith.cmpf ogt, %935, %943 : vector<2x38xf32>
      %cst_132 = arith.constant 1.000000e+00 : f32
      %cst_133 = arith.constant 0.000000e+00 : f32
      %945 = vector.broadcast %cst_132 : f32 to vector<2x38xf32>
      %946 = vector.broadcast %cst_133 : f32 to vector<2x38xf32>
      %947 = arith.select %944, %945, %946 : vector<2x38xi1>, vector<2x38xf32>
      %948 = arith.addf %904, %947 : vector<2x38xf32>
      %c21_i32 = arith.constant 21 : i32
      %949 = vector.broadcast %16 : vector<1x38xf32> to vector<2x38xf32>
      %950 = arith.mulf %815, %949 : vector<2x38xf32>
      %951 = arith.addf %24, %950 : vector<2x38xf32>
      %952 = vector.broadcast %20 : vector<1x38xf32> to vector<2x38xf32>
      %953 = arith.mulf %815, %952 : vector<2x38xf32>
      %954 = arith.addf %24, %953 : vector<2x38xf32>
      %955 = vector.broadcast %17 : vector<1x38xf32> to vector<2x38xf32>
      %956 = arith.mulf %859, %955 : vector<2x38xf32>
      %957 = arith.addf %951, %956 : vector<2x38xf32>
      %958 = vector.broadcast %21 : vector<1x38xf32> to vector<2x38xf32>
      %959 = arith.mulf %859, %958 : vector<2x38xf32>
      %960 = arith.addf %954, %959 : vector<2x38xf32>
      %961 = vector.broadcast %18 : vector<1x38xf32> to vector<2x38xf32>
      %962 = arith.mulf %903, %961 : vector<2x38xf32>
      %963 = arith.addf %957, %962 : vector<2x38xf32>
      %964 = vector.broadcast %22 : vector<1x38xf32> to vector<2x38xf32>
      %965 = arith.mulf %903, %964 : vector<2x38xf32>
      %966 = arith.addf %960, %965 : vector<2x38xf32>
      %967 = vector.broadcast %19 : vector<1x38xf32> to vector<2x38xf32>
      %968 = arith.mulf %947, %967 : vector<2x38xf32>
      %969 = arith.addf %963, %968 : vector<2x38xf32>
      %970 = vector.broadcast %23 : vector<1x38xf32> to vector<2x38xf32>
      %971 = arith.mulf %947, %970 : vector<2x38xf32>
      %972 = arith.addf %966, %971 : vector<2x38xf32>
      %cst_134 = arith.constant dense<0.000000e+00> : vector<2xf32>
      %973 = vector.multi_reduction <add>, %969, %cst_134 [1] : vector<2x38xf32> to vector<2xf32>
      %974 = vector.shape_cast %973 : vector<2xf32> to vector<2x1xf32>
      %975 = vector.broadcast %974 : vector<2x1xf32> to vector<2x38xf32>
      %976 = arith.subf %975, %969 : vector<2x38xf32>
      %977 = arith.addf %15, %976 : vector<2x38xf32>
      %978 = arith.addf %977, %972 : vector<2x38xf32>
      %979 = math.exp %978 : vector<2x38xf32>
      %980 = vector.shape_cast %979 : vector<2x38xf32> to vector<1x2x38xf32>
      %cst_135 = arith.constant dense<0.000000e+00> : vector<1xf32>
      %981 = vector.multi_reduction <add>, %980, %cst_135 [1, 2] : vector<1x2x38xf32> to vector<1xf32>
      %982 = vector.shape_cast %981 : vector<1xf32> to vector<1x1x1xf32>
      %983 = vector.extract %982[0, 0, 0] : f32 from vector<1x1x1xf32>
      %984 = vector.broadcast %983 : f32 to vector<1x1xf32>
      %cst_136 = arith.constant 7.600000e+01 : f32
      %985 = vector.broadcast %cst_136 : f32 to vector<1x1xf32>
      %986 = arith.divf %984, %985 : vector<1x1xf32>
      %987 = vector.broadcast %986 : vector<1x1xf32> to vector<2x38xf32>
      %988 = arith.cmpf ogt, %979, %987 : vector<2x38xf32>
      %cst_137 = arith.constant 1.000000e+00 : f32
      %cst_138 = arith.constant 0.000000e+00 : f32
      %989 = vector.broadcast %cst_137 : f32 to vector<2x38xf32>
      %990 = vector.broadcast %cst_138 : f32 to vector<2x38xf32>
      %991 = arith.select %988, %989, %990 : vector<2x38xi1>, vector<2x38xf32>
      %992 = arith.addf %948, %991 : vector<2x38xf32>
      %c22_i32 = arith.constant 22 : i32
      %993 = vector.broadcast %16 : vector<1x38xf32> to vector<2x38xf32>
      %994 = arith.mulf %859, %993 : vector<2x38xf32>
      %995 = arith.addf %24, %994 : vector<2x38xf32>
      %996 = vector.broadcast %20 : vector<1x38xf32> to vector<2x38xf32>
      %997 = arith.mulf %859, %996 : vector<2x38xf32>
      %998 = arith.addf %24, %997 : vector<2x38xf32>
      %999 = vector.broadcast %17 : vector<1x38xf32> to vector<2x38xf32>
      %1000 = arith.mulf %903, %999 : vector<2x38xf32>
      %1001 = arith.addf %995, %1000 : vector<2x38xf32>
      %1002 = vector.broadcast %21 : vector<1x38xf32> to vector<2x38xf32>
      %1003 = arith.mulf %903, %1002 : vector<2x38xf32>
      %1004 = arith.addf %998, %1003 : vector<2x38xf32>
      %1005 = vector.broadcast %18 : vector<1x38xf32> to vector<2x38xf32>
      %1006 = arith.mulf %947, %1005 : vector<2x38xf32>
      %1007 = arith.addf %1001, %1006 : vector<2x38xf32>
      %1008 = vector.broadcast %22 : vector<1x38xf32> to vector<2x38xf32>
      %1009 = arith.mulf %947, %1008 : vector<2x38xf32>
      %1010 = arith.addf %1004, %1009 : vector<2x38xf32>
      %1011 = vector.broadcast %19 : vector<1x38xf32> to vector<2x38xf32>
      %1012 = arith.mulf %991, %1011 : vector<2x38xf32>
      %1013 = arith.addf %1007, %1012 : vector<2x38xf32>
      %1014 = vector.broadcast %23 : vector<1x38xf32> to vector<2x38xf32>
      %1015 = arith.mulf %991, %1014 : vector<2x38xf32>
      %1016 = arith.addf %1010, %1015 : vector<2x38xf32>
      %cst_139 = arith.constant dense<0.000000e+00> : vector<2xf32>
      %1017 = vector.multi_reduction <add>, %1013, %cst_139 [1] : vector<2x38xf32> to vector<2xf32>
      %1018 = vector.shape_cast %1017 : vector<2xf32> to vector<2x1xf32>
      %1019 = vector.broadcast %1018 : vector<2x1xf32> to vector<2x38xf32>
      %1020 = arith.subf %1019, %1013 : vector<2x38xf32>
      %1021 = arith.addf %15, %1020 : vector<2x38xf32>
      %1022 = arith.addf %1021, %1016 : vector<2x38xf32>
      %1023 = math.exp %1022 : vector<2x38xf32>
      %1024 = vector.shape_cast %1023 : vector<2x38xf32> to vector<1x2x38xf32>
      %cst_140 = arith.constant dense<0.000000e+00> : vector<1xf32>
      %1025 = vector.multi_reduction <add>, %1024, %cst_140 [1, 2] : vector<1x2x38xf32> to vector<1xf32>
      %1026 = vector.shape_cast %1025 : vector<1xf32> to vector<1x1x1xf32>
      %1027 = vector.extract %1026[0, 0, 0] : f32 from vector<1x1x1xf32>
      %1028 = vector.broadcast %1027 : f32 to vector<1x1xf32>
      %cst_141 = arith.constant 7.600000e+01 : f32
      %1029 = vector.broadcast %cst_141 : f32 to vector<1x1xf32>
      %1030 = arith.divf %1028, %1029 : vector<1x1xf32>
      %1031 = vector.broadcast %1030 : vector<1x1xf32> to vector<2x38xf32>
      %1032 = arith.cmpf ogt, %1023, %1031 : vector<2x38xf32>
      %cst_142 = arith.constant 1.000000e+00 : f32
      %cst_143 = arith.constant 0.000000e+00 : f32
      %1033 = vector.broadcast %cst_142 : f32 to vector<2x38xf32>
      %1034 = vector.broadcast %cst_143 : f32 to vector<2x38xf32>
      %1035 = arith.select %1032, %1033, %1034 : vector<2x38xi1>, vector<2x38xf32>
      %1036 = arith.addf %992, %1035 : vector<2x38xf32>
      %c23_i32 = arith.constant 23 : i32
      %1037 = vector.broadcast %16 : vector<1x38xf32> to vector<2x38xf32>
      %1038 = arith.mulf %903, %1037 : vector<2x38xf32>
      %1039 = arith.addf %24, %1038 : vector<2x38xf32>
      %1040 = vector.broadcast %20 : vector<1x38xf32> to vector<2x38xf32>
      %1041 = arith.mulf %903, %1040 : vector<2x38xf32>
      %1042 = arith.addf %24, %1041 : vector<2x38xf32>
      %1043 = vector.broadcast %17 : vector<1x38xf32> to vector<2x38xf32>
      %1044 = arith.mulf %947, %1043 : vector<2x38xf32>
      %1045 = arith.addf %1039, %1044 : vector<2x38xf32>
      %1046 = vector.broadcast %21 : vector<1x38xf32> to vector<2x38xf32>
      %1047 = arith.mulf %947, %1046 : vector<2x38xf32>
      %1048 = arith.addf %1042, %1047 : vector<2x38xf32>
      %1049 = vector.broadcast %18 : vector<1x38xf32> to vector<2x38xf32>
      %1050 = arith.mulf %991, %1049 : vector<2x38xf32>
      %1051 = arith.addf %1045, %1050 : vector<2x38xf32>
      %1052 = vector.broadcast %22 : vector<1x38xf32> to vector<2x38xf32>
      %1053 = arith.mulf %991, %1052 : vector<2x38xf32>
      %1054 = arith.addf %1048, %1053 : vector<2x38xf32>
      %1055 = vector.broadcast %19 : vector<1x38xf32> to vector<2x38xf32>
      %1056 = arith.mulf %1035, %1055 : vector<2x38xf32>
      %1057 = arith.addf %1051, %1056 : vector<2x38xf32>
      %1058 = vector.broadcast %23 : vector<1x38xf32> to vector<2x38xf32>
      %1059 = arith.mulf %1035, %1058 : vector<2x38xf32>
      %1060 = arith.addf %1054, %1059 : vector<2x38xf32>
      %cst_144 = arith.constant dense<0.000000e+00> : vector<2xf32>
      %1061 = vector.multi_reduction <add>, %1057, %cst_144 [1] : vector<2x38xf32> to vector<2xf32>
      %1062 = vector.shape_cast %1061 : vector<2xf32> to vector<2x1xf32>
      %1063 = vector.broadcast %1062 : vector<2x1xf32> to vector<2x38xf32>
      %1064 = arith.subf %1063, %1057 : vector<2x38xf32>
      %1065 = arith.addf %15, %1064 : vector<2x38xf32>
      %1066 = arith.addf %1065, %1060 : vector<2x38xf32>
      %1067 = math.exp %1066 : vector<2x38xf32>
      %1068 = vector.shape_cast %1067 : vector<2x38xf32> to vector<1x2x38xf32>
      %cst_145 = arith.constant dense<0.000000e+00> : vector<1xf32>
      %1069 = vector.multi_reduction <add>, %1068, %cst_145 [1, 2] : vector<1x2x38xf32> to vector<1xf32>
      %1070 = vector.shape_cast %1069 : vector<1xf32> to vector<1x1x1xf32>
      %1071 = vector.extract %1070[0, 0, 0] : f32 from vector<1x1x1xf32>
      %1072 = vector.broadcast %1071 : f32 to vector<1x1xf32>
      %cst_146 = arith.constant 7.600000e+01 : f32
      %1073 = vector.broadcast %cst_146 : f32 to vector<1x1xf32>
      %1074 = arith.divf %1072, %1073 : vector<1x1xf32>
      %1075 = vector.broadcast %1074 : vector<1x1xf32> to vector<2x38xf32>
      %1076 = arith.cmpf ogt, %1067, %1075 : vector<2x38xf32>
      %cst_147 = arith.constant 1.000000e+00 : f32
      %cst_148 = arith.constant 0.000000e+00 : f32
      %1077 = vector.broadcast %cst_147 : f32 to vector<2x38xf32>
      %1078 = vector.broadcast %cst_148 : f32 to vector<2x38xf32>
      %1079 = arith.select %1076, %1077, %1078 : vector<2x38xi1>, vector<2x38xf32>
      %1080 = arith.addf %1036, %1079 : vector<2x38xf32>
      %c24_i32 = arith.constant 24 : i32
      %1081 = vector.broadcast %16 : vector<1x38xf32> to vector<2x38xf32>
      %1082 = arith.mulf %947, %1081 : vector<2x38xf32>
      %1083 = arith.addf %24, %1082 : vector<2x38xf32>
      %1084 = vector.broadcast %20 : vector<1x38xf32> to vector<2x38xf32>
      %1085 = arith.mulf %947, %1084 : vector<2x38xf32>
      %1086 = arith.addf %24, %1085 : vector<2x38xf32>
      %1087 = vector.broadcast %17 : vector<1x38xf32> to vector<2x38xf32>
      %1088 = arith.mulf %991, %1087 : vector<2x38xf32>
      %1089 = arith.addf %1083, %1088 : vector<2x38xf32>
      %1090 = vector.broadcast %21 : vector<1x38xf32> to vector<2x38xf32>
      %1091 = arith.mulf %991, %1090 : vector<2x38xf32>
      %1092 = arith.addf %1086, %1091 : vector<2x38xf32>
      %1093 = vector.broadcast %18 : vector<1x38xf32> to vector<2x38xf32>
      %1094 = arith.mulf %1035, %1093 : vector<2x38xf32>
      %1095 = arith.addf %1089, %1094 : vector<2x38xf32>
      %1096 = vector.broadcast %22 : vector<1x38xf32> to vector<2x38xf32>
      %1097 = arith.mulf %1035, %1096 : vector<2x38xf32>
      %1098 = arith.addf %1092, %1097 : vector<2x38xf32>
      %1099 = vector.broadcast %19 : vector<1x38xf32> to vector<2x38xf32>
      %1100 = arith.mulf %1079, %1099 : vector<2x38xf32>
      %1101 = arith.addf %1095, %1100 : vector<2x38xf32>
      %1102 = vector.broadcast %23 : vector<1x38xf32> to vector<2x38xf32>
      %1103 = arith.mulf %1079, %1102 : vector<2x38xf32>
      %1104 = arith.addf %1098, %1103 : vector<2x38xf32>
      %cst_149 = arith.constant dense<0.000000e+00> : vector<2xf32>
      %1105 = vector.multi_reduction <add>, %1101, %cst_149 [1] : vector<2x38xf32> to vector<2xf32>
      %1106 = vector.shape_cast %1105 : vector<2xf32> to vector<2x1xf32>
      %1107 = vector.broadcast %1106 : vector<2x1xf32> to vector<2x38xf32>
      %1108 = arith.subf %1107, %1101 : vector<2x38xf32>
      %1109 = arith.addf %15, %1108 : vector<2x38xf32>
      %1110 = arith.addf %1109, %1104 : vector<2x38xf32>
      %1111 = math.exp %1110 : vector<2x38xf32>
      %1112 = vector.shape_cast %1111 : vector<2x38xf32> to vector<1x2x38xf32>
      %cst_150 = arith.constant dense<0.000000e+00> : vector<1xf32>
      %1113 = vector.multi_reduction <add>, %1112, %cst_150 [1, 2] : vector<1x2x38xf32> to vector<1xf32>
      %1114 = vector.shape_cast %1113 : vector<1xf32> to vector<1x1x1xf32>
      %1115 = vector.extract %1114[0, 0, 0] : f32 from vector<1x1x1xf32>
      %1116 = vector.broadcast %1115 : f32 to vector<1x1xf32>
      %cst_151 = arith.constant 7.600000e+01 : f32
      %1117 = vector.broadcast %cst_151 : f32 to vector<1x1xf32>
      %1118 = arith.divf %1116, %1117 : vector<1x1xf32>
      %1119 = vector.broadcast %1118 : vector<1x1xf32> to vector<2x38xf32>
      %1120 = arith.cmpf ogt, %1111, %1119 : vector<2x38xf32>
      %cst_152 = arith.constant 1.000000e+00 : f32
      %cst_153 = arith.constant 0.000000e+00 : f32
      %1121 = vector.broadcast %cst_152 : f32 to vector<2x38xf32>
      %1122 = vector.broadcast %cst_153 : f32 to vector<2x38xf32>
      %1123 = arith.select %1120, %1121, %1122 : vector<2x38xi1>, vector<2x38xf32>
      %1124 = arith.addf %1080, %1123 : vector<2x38xf32>
      %c25_i32 = arith.constant 25 : i32
      %1125 = vector.broadcast %16 : vector<1x38xf32> to vector<2x38xf32>
      %1126 = arith.mulf %991, %1125 : vector<2x38xf32>
      %1127 = arith.addf %24, %1126 : vector<2x38xf32>
      %1128 = vector.broadcast %20 : vector<1x38xf32> to vector<2x38xf32>
      %1129 = arith.mulf %991, %1128 : vector<2x38xf32>
      %1130 = arith.addf %24, %1129 : vector<2x38xf32>
      %1131 = vector.broadcast %17 : vector<1x38xf32> to vector<2x38xf32>
      %1132 = arith.mulf %1035, %1131 : vector<2x38xf32>
      %1133 = arith.addf %1127, %1132 : vector<2x38xf32>
      %1134 = vector.broadcast %21 : vector<1x38xf32> to vector<2x38xf32>
      %1135 = arith.mulf %1035, %1134 : vector<2x38xf32>
      %1136 = arith.addf %1130, %1135 : vector<2x38xf32>
      %1137 = vector.broadcast %18 : vector<1x38xf32> to vector<2x38xf32>
      %1138 = arith.mulf %1079, %1137 : vector<2x38xf32>
      %1139 = arith.addf %1133, %1138 : vector<2x38xf32>
      %1140 = vector.broadcast %22 : vector<1x38xf32> to vector<2x38xf32>
      %1141 = arith.mulf %1079, %1140 : vector<2x38xf32>
      %1142 = arith.addf %1136, %1141 : vector<2x38xf32>
      %1143 = vector.broadcast %19 : vector<1x38xf32> to vector<2x38xf32>
      %1144 = arith.mulf %1123, %1143 : vector<2x38xf32>
      %1145 = arith.addf %1139, %1144 : vector<2x38xf32>
      %1146 = vector.broadcast %23 : vector<1x38xf32> to vector<2x38xf32>
      %1147 = arith.mulf %1123, %1146 : vector<2x38xf32>
      %1148 = arith.addf %1142, %1147 : vector<2x38xf32>
      %cst_154 = arith.constant dense<0.000000e+00> : vector<2xf32>
      %1149 = vector.multi_reduction <add>, %1145, %cst_154 [1] : vector<2x38xf32> to vector<2xf32>
      %1150 = vector.shape_cast %1149 : vector<2xf32> to vector<2x1xf32>
      %1151 = vector.broadcast %1150 : vector<2x1xf32> to vector<2x38xf32>
      %1152 = arith.subf %1151, %1145 : vector<2x38xf32>
      %1153 = arith.addf %15, %1152 : vector<2x38xf32>
      %1154 = arith.addf %1153, %1148 : vector<2x38xf32>
      %1155 = math.exp %1154 : vector<2x38xf32>
      %1156 = vector.shape_cast %1155 : vector<2x38xf32> to vector<1x2x38xf32>
      %cst_155 = arith.constant dense<0.000000e+00> : vector<1xf32>
      %1157 = vector.multi_reduction <add>, %1156, %cst_155 [1, 2] : vector<1x2x38xf32> to vector<1xf32>
      %1158 = vector.shape_cast %1157 : vector<1xf32> to vector<1x1x1xf32>
      %1159 = vector.extract %1158[0, 0, 0] : f32 from vector<1x1x1xf32>
      %1160 = vector.broadcast %1159 : f32 to vector<1x1xf32>
      %cst_156 = arith.constant 7.600000e+01 : f32
      %1161 = vector.broadcast %cst_156 : f32 to vector<1x1xf32>
      %1162 = arith.divf %1160, %1161 : vector<1x1xf32>
      %1163 = vector.broadcast %1162 : vector<1x1xf32> to vector<2x38xf32>
      %1164 = arith.cmpf ogt, %1155, %1163 : vector<2x38xf32>
      %cst_157 = arith.constant 1.000000e+00 : f32
      %cst_158 = arith.constant 0.000000e+00 : f32
      %1165 = vector.broadcast %cst_157 : f32 to vector<2x38xf32>
      %1166 = vector.broadcast %cst_158 : f32 to vector<2x38xf32>
      %1167 = arith.select %1164, %1165, %1166 : vector<2x38xi1>, vector<2x38xf32>
      %1168 = arith.addf %1124, %1167 : vector<2x38xf32>
      %c26_i32 = arith.constant 26 : i32
      %1169 = vector.broadcast %16 : vector<1x38xf32> to vector<2x38xf32>
      %1170 = arith.mulf %1035, %1169 : vector<2x38xf32>
      %1171 = arith.addf %24, %1170 : vector<2x38xf32>
      %1172 = vector.broadcast %20 : vector<1x38xf32> to vector<2x38xf32>
      %1173 = arith.mulf %1035, %1172 : vector<2x38xf32>
      %1174 = arith.addf %24, %1173 : vector<2x38xf32>
      %1175 = vector.broadcast %17 : vector<1x38xf32> to vector<2x38xf32>
      %1176 = arith.mulf %1079, %1175 : vector<2x38xf32>
      %1177 = arith.addf %1171, %1176 : vector<2x38xf32>
      %1178 = vector.broadcast %21 : vector<1x38xf32> to vector<2x38xf32>
      %1179 = arith.mulf %1079, %1178 : vector<2x38xf32>
      %1180 = arith.addf %1174, %1179 : vector<2x38xf32>
      %1181 = vector.broadcast %18 : vector<1x38xf32> to vector<2x38xf32>
      %1182 = arith.mulf %1123, %1181 : vector<2x38xf32>
      %1183 = arith.addf %1177, %1182 : vector<2x38xf32>
      %1184 = vector.broadcast %22 : vector<1x38xf32> to vector<2x38xf32>
      %1185 = arith.mulf %1123, %1184 : vector<2x38xf32>
      %1186 = arith.addf %1180, %1185 : vector<2x38xf32>
      %1187 = vector.broadcast %19 : vector<1x38xf32> to vector<2x38xf32>
      %1188 = arith.mulf %1167, %1187 : vector<2x38xf32>
      %1189 = arith.addf %1183, %1188 : vector<2x38xf32>
      %1190 = vector.broadcast %23 : vector<1x38xf32> to vector<2x38xf32>
      %1191 = arith.mulf %1167, %1190 : vector<2x38xf32>
      %1192 = arith.addf %1186, %1191 : vector<2x38xf32>
      %cst_159 = arith.constant dense<0.000000e+00> : vector<2xf32>
      %1193 = vector.multi_reduction <add>, %1189, %cst_159 [1] : vector<2x38xf32> to vector<2xf32>
      %1194 = vector.shape_cast %1193 : vector<2xf32> to vector<2x1xf32>
      %1195 = vector.broadcast %1194 : vector<2x1xf32> to vector<2x38xf32>
      %1196 = arith.subf %1195, %1189 : vector<2x38xf32>
      %1197 = arith.addf %15, %1196 : vector<2x38xf32>
      %1198 = arith.addf %1197, %1192 : vector<2x38xf32>
      %1199 = math.exp %1198 : vector<2x38xf32>
      %1200 = vector.shape_cast %1199 : vector<2x38xf32> to vector<1x2x38xf32>
      %cst_160 = arith.constant dense<0.000000e+00> : vector<1xf32>
      %1201 = vector.multi_reduction <add>, %1200, %cst_160 [1, 2] : vector<1x2x38xf32> to vector<1xf32>
      %1202 = vector.shape_cast %1201 : vector<1xf32> to vector<1x1x1xf32>
      %1203 = vector.extract %1202[0, 0, 0] : f32 from vector<1x1x1xf32>
      %1204 = vector.broadcast %1203 : f32 to vector<1x1xf32>
      %cst_161 = arith.constant 7.600000e+01 : f32
      %1205 = vector.broadcast %cst_161 : f32 to vector<1x1xf32>
      %1206 = arith.divf %1204, %1205 : vector<1x1xf32>
      %1207 = vector.broadcast %1206 : vector<1x1xf32> to vector<2x38xf32>
      %1208 = arith.cmpf ogt, %1199, %1207 : vector<2x38xf32>
      %cst_162 = arith.constant 1.000000e+00 : f32
      %cst_163 = arith.constant 0.000000e+00 : f32
      %1209 = vector.broadcast %cst_162 : f32 to vector<2x38xf32>
      %1210 = vector.broadcast %cst_163 : f32 to vector<2x38xf32>
      %1211 = arith.select %1208, %1209, %1210 : vector<2x38xi1>, vector<2x38xf32>
      %1212 = arith.addf %1168, %1211 : vector<2x38xf32>
      %c27_i32 = arith.constant 27 : i32
      %1213 = vector.broadcast %16 : vector<1x38xf32> to vector<2x38xf32>
      %1214 = arith.mulf %1079, %1213 : vector<2x38xf32>
      %1215 = arith.addf %24, %1214 : vector<2x38xf32>
      %1216 = vector.broadcast %20 : vector<1x38xf32> to vector<2x38xf32>
      %1217 = arith.mulf %1079, %1216 : vector<2x38xf32>
      %1218 = arith.addf %24, %1217 : vector<2x38xf32>
      %1219 = vector.broadcast %17 : vector<1x38xf32> to vector<2x38xf32>
      %1220 = arith.mulf %1123, %1219 : vector<2x38xf32>
      %1221 = arith.addf %1215, %1220 : vector<2x38xf32>
      %1222 = vector.broadcast %21 : vector<1x38xf32> to vector<2x38xf32>
      %1223 = arith.mulf %1123, %1222 : vector<2x38xf32>
      %1224 = arith.addf %1218, %1223 : vector<2x38xf32>
      %1225 = vector.broadcast %18 : vector<1x38xf32> to vector<2x38xf32>
      %1226 = arith.mulf %1167, %1225 : vector<2x38xf32>
      %1227 = arith.addf %1221, %1226 : vector<2x38xf32>
      %1228 = vector.broadcast %22 : vector<1x38xf32> to vector<2x38xf32>
      %1229 = arith.mulf %1167, %1228 : vector<2x38xf32>
      %1230 = arith.addf %1224, %1229 : vector<2x38xf32>
      %1231 = vector.broadcast %19 : vector<1x38xf32> to vector<2x38xf32>
      %1232 = arith.mulf %1211, %1231 : vector<2x38xf32>
      %1233 = arith.addf %1227, %1232 : vector<2x38xf32>
      %1234 = vector.broadcast %23 : vector<1x38xf32> to vector<2x38xf32>
      %1235 = arith.mulf %1211, %1234 : vector<2x38xf32>
      %1236 = arith.addf %1230, %1235 : vector<2x38xf32>
      %cst_164 = arith.constant dense<0.000000e+00> : vector<2xf32>
      %1237 = vector.multi_reduction <add>, %1233, %cst_164 [1] : vector<2x38xf32> to vector<2xf32>
      %1238 = vector.shape_cast %1237 : vector<2xf32> to vector<2x1xf32>
      %1239 = vector.broadcast %1238 : vector<2x1xf32> to vector<2x38xf32>
      %1240 = arith.subf %1239, %1233 : vector<2x38xf32>
      %1241 = arith.addf %15, %1240 : vector<2x38xf32>
      %1242 = arith.addf %1241, %1236 : vector<2x38xf32>
      %1243 = math.exp %1242 : vector<2x38xf32>
      %1244 = vector.shape_cast %1243 : vector<2x38xf32> to vector<1x2x38xf32>
      %cst_165 = arith.constant dense<0.000000e+00> : vector<1xf32>
      %1245 = vector.multi_reduction <add>, %1244, %cst_165 [1, 2] : vector<1x2x38xf32> to vector<1xf32>
      %1246 = vector.shape_cast %1245 : vector<1xf32> to vector<1x1x1xf32>
      %1247 = vector.extract %1246[0, 0, 0] : f32 from vector<1x1x1xf32>
      %1248 = vector.broadcast %1247 : f32 to vector<1x1xf32>
      %cst_166 = arith.constant 7.600000e+01 : f32
      %1249 = vector.broadcast %cst_166 : f32 to vector<1x1xf32>
      %1250 = arith.divf %1248, %1249 : vector<1x1xf32>
      %1251 = vector.broadcast %1250 : vector<1x1xf32> to vector<2x38xf32>
      %1252 = arith.cmpf ogt, %1243, %1251 : vector<2x38xf32>
      %cst_167 = arith.constant 1.000000e+00 : f32
      %cst_168 = arith.constant 0.000000e+00 : f32
      %1253 = vector.broadcast %cst_167 : f32 to vector<2x38xf32>
      %1254 = vector.broadcast %cst_168 : f32 to vector<2x38xf32>
      %1255 = arith.select %1252, %1253, %1254 : vector<2x38xi1>, vector<2x38xf32>
      %1256 = arith.addf %1212, %1255 : vector<2x38xf32>
      %c28_i32 = arith.constant 28 : i32
      %1257 = vector.broadcast %16 : vector<1x38xf32> to vector<2x38xf32>
      %1258 = arith.mulf %1123, %1257 : vector<2x38xf32>
      %1259 = arith.addf %24, %1258 : vector<2x38xf32>
      %1260 = vector.broadcast %20 : vector<1x38xf32> to vector<2x38xf32>
      %1261 = arith.mulf %1123, %1260 : vector<2x38xf32>
      %1262 = arith.addf %24, %1261 : vector<2x38xf32>
      %1263 = vector.broadcast %17 : vector<1x38xf32> to vector<2x38xf32>
      %1264 = arith.mulf %1167, %1263 : vector<2x38xf32>
      %1265 = arith.addf %1259, %1264 : vector<2x38xf32>
      %1266 = vector.broadcast %21 : vector<1x38xf32> to vector<2x38xf32>
      %1267 = arith.mulf %1167, %1266 : vector<2x38xf32>
      %1268 = arith.addf %1262, %1267 : vector<2x38xf32>
      %1269 = vector.broadcast %18 : vector<1x38xf32> to vector<2x38xf32>
      %1270 = arith.mulf %1211, %1269 : vector<2x38xf32>
      %1271 = arith.addf %1265, %1270 : vector<2x38xf32>
      %1272 = vector.broadcast %22 : vector<1x38xf32> to vector<2x38xf32>
      %1273 = arith.mulf %1211, %1272 : vector<2x38xf32>
      %1274 = arith.addf %1268, %1273 : vector<2x38xf32>
      %1275 = vector.broadcast %19 : vector<1x38xf32> to vector<2x38xf32>
      %1276 = arith.mulf %1255, %1275 : vector<2x38xf32>
      %1277 = arith.addf %1271, %1276 : vector<2x38xf32>
      %1278 = vector.broadcast %23 : vector<1x38xf32> to vector<2x38xf32>
      %1279 = arith.mulf %1255, %1278 : vector<2x38xf32>
      %1280 = arith.addf %1274, %1279 : vector<2x38xf32>
      %cst_169 = arith.constant dense<0.000000e+00> : vector<2xf32>
      %1281 = vector.multi_reduction <add>, %1277, %cst_169 [1] : vector<2x38xf32> to vector<2xf32>
      %1282 = vector.shape_cast %1281 : vector<2xf32> to vector<2x1xf32>
      %1283 = vector.broadcast %1282 : vector<2x1xf32> to vector<2x38xf32>
      %1284 = arith.subf %1283, %1277 : vector<2x38xf32>
      %1285 = arith.addf %15, %1284 : vector<2x38xf32>
      %1286 = arith.addf %1285, %1280 : vector<2x38xf32>
      %1287 = math.exp %1286 : vector<2x38xf32>
      %1288 = vector.shape_cast %1287 : vector<2x38xf32> to vector<1x2x38xf32>
      %cst_170 = arith.constant dense<0.000000e+00> : vector<1xf32>
      %1289 = vector.multi_reduction <add>, %1288, %cst_170 [1, 2] : vector<1x2x38xf32> to vector<1xf32>
      %1290 = vector.shape_cast %1289 : vector<1xf32> to vector<1x1x1xf32>
      %1291 = vector.extract %1290[0, 0, 0] : f32 from vector<1x1x1xf32>
      %1292 = vector.broadcast %1291 : f32 to vector<1x1xf32>
      %cst_171 = arith.constant 7.600000e+01 : f32
      %1293 = vector.broadcast %cst_171 : f32 to vector<1x1xf32>
      %1294 = arith.divf %1292, %1293 : vector<1x1xf32>
      %1295 = vector.broadcast %1294 : vector<1x1xf32> to vector<2x38xf32>
      %1296 = arith.cmpf ogt, %1287, %1295 : vector<2x38xf32>
      %cst_172 = arith.constant 1.000000e+00 : f32
      %cst_173 = arith.constant 0.000000e+00 : f32
      %1297 = vector.broadcast %cst_172 : f32 to vector<2x38xf32>
      %1298 = vector.broadcast %cst_173 : f32 to vector<2x38xf32>
      %1299 = arith.select %1296, %1297, %1298 : vector<2x38xi1>, vector<2x38xf32>
      %1300 = arith.addf %1256, %1299 : vector<2x38xf32>
      %c29_i32 = arith.constant 29 : i32
      %1301 = vector.broadcast %16 : vector<1x38xf32> to vector<2x38xf32>
      %1302 = arith.mulf %1167, %1301 : vector<2x38xf32>
      %1303 = arith.addf %24, %1302 : vector<2x38xf32>
      %1304 = vector.broadcast %20 : vector<1x38xf32> to vector<2x38xf32>
      %1305 = arith.mulf %1167, %1304 : vector<2x38xf32>
      %1306 = arith.addf %24, %1305 : vector<2x38xf32>
      %1307 = vector.broadcast %17 : vector<1x38xf32> to vector<2x38xf32>
      %1308 = arith.mulf %1211, %1307 : vector<2x38xf32>
      %1309 = arith.addf %1303, %1308 : vector<2x38xf32>
      %1310 = vector.broadcast %21 : vector<1x38xf32> to vector<2x38xf32>
      %1311 = arith.mulf %1211, %1310 : vector<2x38xf32>
      %1312 = arith.addf %1306, %1311 : vector<2x38xf32>
      %1313 = vector.broadcast %18 : vector<1x38xf32> to vector<2x38xf32>
      %1314 = arith.mulf %1255, %1313 : vector<2x38xf32>
      %1315 = arith.addf %1309, %1314 : vector<2x38xf32>
      %1316 = vector.broadcast %22 : vector<1x38xf32> to vector<2x38xf32>
      %1317 = arith.mulf %1255, %1316 : vector<2x38xf32>
      %1318 = arith.addf %1312, %1317 : vector<2x38xf32>
      %1319 = vector.broadcast %19 : vector<1x38xf32> to vector<2x38xf32>
      %1320 = arith.mulf %1299, %1319 : vector<2x38xf32>
      %1321 = arith.addf %1315, %1320 : vector<2x38xf32>
      %1322 = vector.broadcast %23 : vector<1x38xf32> to vector<2x38xf32>
      %1323 = arith.mulf %1299, %1322 : vector<2x38xf32>
      %1324 = arith.addf %1318, %1323 : vector<2x38xf32>
      %cst_174 = arith.constant dense<0.000000e+00> : vector<2xf32>
      %1325 = vector.multi_reduction <add>, %1321, %cst_174 [1] : vector<2x38xf32> to vector<2xf32>
      %1326 = vector.shape_cast %1325 : vector<2xf32> to vector<2x1xf32>
      %1327 = vector.broadcast %1326 : vector<2x1xf32> to vector<2x38xf32>
      %1328 = arith.subf %1327, %1321 : vector<2x38xf32>
      %1329 = arith.addf %15, %1328 : vector<2x38xf32>
      %1330 = arith.addf %1329, %1324 : vector<2x38xf32>
      %1331 = math.exp %1330 : vector<2x38xf32>
      %1332 = vector.shape_cast %1331 : vector<2x38xf32> to vector<1x2x38xf32>
      %cst_175 = arith.constant dense<0.000000e+00> : vector<1xf32>
      %1333 = vector.multi_reduction <add>, %1332, %cst_175 [1, 2] : vector<1x2x38xf32> to vector<1xf32>
      %1334 = vector.shape_cast %1333 : vector<1xf32> to vector<1x1x1xf32>
      %1335 = vector.extract %1334[0, 0, 0] : f32 from vector<1x1x1xf32>
      %1336 = vector.broadcast %1335 : f32 to vector<1x1xf32>
      %cst_176 = arith.constant 7.600000e+01 : f32
      %1337 = vector.broadcast %cst_176 : f32 to vector<1x1xf32>
      %1338 = arith.divf %1336, %1337 : vector<1x1xf32>
      %1339 = vector.broadcast %1338 : vector<1x1xf32> to vector<2x38xf32>
      %1340 = arith.cmpf ogt, %1331, %1339 : vector<2x38xf32>
      %cst_177 = arith.constant 1.000000e+00 : f32
      %cst_178 = arith.constant 0.000000e+00 : f32
      %1341 = vector.broadcast %cst_177 : f32 to vector<2x38xf32>
      %1342 = vector.broadcast %cst_178 : f32 to vector<2x38xf32>
      %1343 = arith.select %1340, %1341, %1342 : vector<2x38xi1>, vector<2x38xf32>
      %1344 = arith.addf %1300, %1343 : vector<2x38xf32>
      %cst_179 = arith.constant 0.000000e+00 : f32
      %1345 = vector.broadcast %cst_179 : f32 to vector<2x38xf32>
      %1346 = arith.maximumf %1344, %1345 : vector<2x38xf32>
      %1347 = math.absf %1344 : vector<2x38xf32>
      %cst_180 = arith.constant 0.000000e+00 : f32
      %1348 = vector.broadcast %cst_180 : f32 to vector<2x38xf32>
      %1349 = arith.subf %1348, %1347 : vector<2x38xf32>
      %1350 = math.exp %1349 : vector<2x38xf32>
      %cst_181 = arith.constant 1.000000e+00 : f32
      %1351 = vector.broadcast %cst_181 : f32 to vector<2x38xf32>
      %1352 = arith.addf %1351, %1350 : vector<2x38xf32>
      %1353 = math.log %1352 : vector<2x38xf32>
      %1354 = arith.addf %1346, %1353 : vector<2x38xf32>
      %c0_182 = arith.constant 0 : index
      %c0_183 = arith.constant 0 : index
      %1355 = vector.load %arg6[%c0_182, %c0_183] : memref<2x38xf32, #tpu.memory_space<vmem>>, vector<2x38xf32>
      tpu.vector_store %arg6[%c0_182, %c0_183], %1354 {strides = array<i32>} : memref<2x38xf32, #tpu.memory_space<vmem>>, vector<2x38xf32>,
    } else {
    }
    return
  }
  func.func @transform_0(%arg0: i32) -> (i32, i32) {
    %c0_i32 = arith.constant 0 : i32
    %c0_i32_0 = arith.constant 0 : i32
    return %c0_i32, %arg0 : i32, i32
  }
  func.func @transform_1(%arg0: i32) -> (i32, i32) {
    %c0_i32 = arith.constant 0 : i32
    %c0_i32_0 = arith.constant 0 : i32
    return %arg0, %c0_i32 : i32, i32
  }
  func.func @transform_2(%arg0: i32) -> (i32, i32) {
    %c0_i32 = arith.constant 0 : i32
    %c0_i32_0 = arith.constant 0 : i32
    %c0_i32_1 = arith.constant 0 : i32
    return %c0_i32, %c0_i32_0 : i32, i32
  }
  func.func @transform_3(%arg0: i32) -> (i32, i32) {
    %c0_i32 = arith.constant 0 : i32
    %c0_i32_0 = arith.constant 0 : i32
    %c0_i32_1 = arith.constant 0 : i32
    return %c0_i32, %c0_i32_0 : i32, i32
  }
  func.func @transform_4(%arg0: i32) -> (i32, i32) {
    %c0_i32 = arith.constant 0 : i32
    %c0_i32_0 = arith.constant 0 : i32
    %c0_i32_1 = arith.constant 0 : i32
    return %c0_i32, %c0_i32_0 : i32, i32
  }
  func.func @transform_5(%arg0: i32) -> (i32, i32) {
    %c0_i32 = arith.constant 0 : i32
    %c0_i32_0 = arith.constant 0 : i32
    %c0_i32_1 = arith.constant 0 : i32
    return %c0_i32, %c0_i32_0 : i32, i32
  }
}

</mosaic_0001>

<bundles_post_ra>
// kernel: glm_ni1_forward.1
= control target key start
LH: loop header
LB: loop body
LE: loop exit
PB: predicated region body
PF: predicated region fallthrough
CT: control target
= control target key end

     0   :  { %10 = vsyncpa [#allocation4], 0  ;;  %s1907_s18 = smov 0   ;;  %s2512_s0 = inlined_call_operand.vmem [shape: f32[2,4096], index: 0, kind: input, shape index: {}]   ;;  %s2513_s1 = inlined_call_operand.vmem [shape: f32[4096,38], index: 1, kind: input, shape index: {}]   ;;  %s2514_s2 = inlined_call_operand.vmem [shape: f32[1,38], index: 2, kind: input, shape index: {}]   ;;  %s2515_s3 = inlined_call_operand.vmem [shape: f32[4,38], index: 3, kind: input, shape index: {}]   ;;  %s2516_s4 = inlined_call_operand.vmem [shape: f32[4,38], index: 4, kind: input, shape index: {}]   ;;  %s2517_s5 = inlined_call_operand.hbm [shape: f32[2,38], index: 5, kind: output, shape index: {}]  }
   0x1 LB: > { %s1913_s19 = sadd.s32 4294967295, %s1871_s18   ;;  %p1653_p0 = scmp.ge.s32.totalorder %s1871_s18, 1  ;;  %s1871_s18 = sphi %s1907_s18, %s16_s18  }
   0x2   : > { %p195_p1 = scmp.lt.s32.totalorder %s1871_s18, 9 }
   0x4   : > { %p196_p2 = pnand %p1653_p0, %p195_p1 }
   0x5   : > { %s1654_s20 = sshll.u32 (!%p196_p2), %s1913_s19, 2  ;;  %s1656_s21 = sshll.u32 (!%p196_p2), %s1913_s19, 6 }
   0x6   : > { %199 = sbr.rel (%p196_p2) target bundleno = 9832 (0x2668), region = 40  ;;  %p224_p3 = scmp.lt.s32.totalorder (!%p196_p2), %s1654_s20, 31 }
   0x7   : > { %p230_p4 = scmp.lt.s32.totalorder (!%p196_p2), %s1656_s21, 511  ;;  %p1658_p5 = scmp.ne.s32.totalorder (!%p196_p2), %s1913_s19, 0 }
   0xb   : > { %s2519_s20 = smov (!%p224_p3, %s1654_s20), 31  ;;  %s2521_s21 = smov (!%p230_p4, %s1656_s21), 511 }
   0xc   : > { %s1655_s22 = sshll.u32 %s2519_s20, 1  ;;  %s1657_s26 = sshll.u32 %s2521_s21, 3 }
   0xd   : > { %s1922_s25 = scalar_lea.vmem %s2512_s0, %s1655_s22  ;;  %s1927_s29 = scalar_lea.vmem %s2513_s1, %s1657_s26 }
   0xe   : > { %238 = sbr.rel (%p1658_p5) target bundleno = 21 (0x15), region = 44 }
  0x13   : > { %vm239_vm0 = vcmask 304128   ;;  %v1873_v0 = vmov 0.0  }
  0x14   : > { %240 = vst.msk [vmem:[#allocation2] sm:$0x3] %vm239_vm0, %v1873_v0 }
  0x15 PF: > { %v290_v1 = vld [vmem:[%s1927_s29 + $0x178] sm:$0xff]  ;;  %v289_v2 = vld [vmem:[%s1927_s29 + $0x170] sm:$0xff]  ;;  %v288_v6 = vld [vmem:[%s1927_s29 + $0x168] sm:$0xff]  ;;  %vm398_vm1 = vcmask 304128   ;;  %p1659_p6 = scmp.ne.s32.totalorder %s1913_s19, 7 }
  0x16   : > { %v306_v3 = vld [vmem:[%s1927_s29 + $0x1f8] sm:$0xff]  ;;  %357 = vmatpush.msra.mxu2 %v290_v1  ;;  %v305_v7 = vld [vmem:[%s1927_s29 + $0x1f0] sm:$0xff]  ;;  %v304_v10 = vld [vmem:[%s1927_s29 + $0x1e8] sm:$0xff] }
  0x17   : > { %377 = vmatpush.msra.mxu3 %v306_v3  ;;  %v258_v4 = vld [vmem:[%s1927_s29 + $0x78] sm:$0xff]  ;;  %v257_v8 = vld [vmem:[%s1927_s29 + $0x70] sm:$0xff]  ;;  %v256_v11 = vld [vmem:[%s1927_s29 + $0x68] sm:$0xff] }
  0x18   : > { %v274_v5 = vld [vmem:[%s1927_s29 + $0xf8] sm:$0xff]  ;;  %317 = vmatpush.msra.mxu0 %v258_v4  ;;  %v273_v9 = vld [vmem:[%s1927_s29 + $0xf0] sm:$0xff]  ;;  %358 = vmatpush.msra.mxu2 %v289_v2  ;;  %v287_v12 = vld [vmem:[%s1927_s29 + $0x160] sm:$0xff] }
  0x19   : > { %337 = vmatpush.msra.mxu1 %v274_v5  ;;  %378 = vmatpush.msra.mxu3 %v305_v7  ;;  %v272_v13 = vld [vmem:[%s1927_s29 + $0xe8] sm:$0xff]  ;;  %v303_v14 = vld [vmem:[%s1927_s29 + $0x1e0] sm:$0xff]  ;;  %v286_v17 = vld [vmem:[%s1927_s29 + $0x158] sm:$0xff] }
  0x1a   : > { %318 = vmatpush.msra.mxu0 %v257_v8  ;;  %359 = vmatpush.msra.mxu2 %v288_v6  ;;  %v255_v15 = vld [vmem:[%s1927_s29 + $0x60] sm:$0xff]  ;;  %v302_v18 = vld [vmem:[%s1927_s29 + $0x1d8] sm:$0xff]  ;;  %v285_v21 = vld [vmem:[%s1927_s29 + $0x150] sm:$0xff] }
  0x1b   : > { %338 = vmatpush.msra.mxu1 %v273_v9  ;;  %379 = vmatpush.msra.mxu3 %v304_v10  ;;  %v271_v16 = vld [vmem:[%s1927_s29 + $0xe0] sm:$0xff]  ;;  %v254_v19 = vld [vmem:[%s1927_s29 + $0x58] sm:$0xff]  ;;  %v301_v22 = vld [vmem:[%s1927_s29 + $0x1d0] sm:$0xff] }
  0x1c   : > { %319 = vmatpush.msra.mxu0 %v256_v11  ;;  %360 = vmatpush.msra.mxu2 %v287_v12  ;;  %v270_v20 = vld [vmem:[%s1927_s29 + $0xd8] sm:$0xff]  ;;  %v253_v23 = vld [vmem:[%s1927_s29 + $0x50] sm:$0xff]  ;;  %v284_v25 = vld [vmem:[%s1927_s29 + $0x148] sm:$0xff] }
  0x1d   : > { %339 = vmatpush.msra.mxu1 %v272_v13  ;;  %380 = vmatpush.msra.mxu3 %v303_v14  ;;  %v269_v24 = vld [vmem:[%s1927_s29 + $0xd0] sm:$0xff]  ;;  %v300_v26 = vld [vmem:[%s1927_s29 + $0x1c8] sm:$0xff]  ;;  %v283_v29 = vld [vmem:[%s1927_s29 + $0x140] sm:$0xff] }
  0x1e   : > { %320 = vmatpush.msra.mxu0 %v255_v15  ;;  %361 = vmatpush.msra.mxu2 %v286_v17  ;;  %v252_v27 = vld [vmem:[%s1927_s29 + $0x48] sm:$0xff]  ;;  %v299_v30 = vld [vmem:[%s1927_s29 + $0x1c0] sm:$0xff]  ;;  %v282_v33 = vld [vmem:[%s1927_s29 + $0x138] sm:$0xff] }
  0x1f   : > { %340 = vmatpush.msra.mxu1 %v271_v16  ;;  %381 = vmatpush.msra.mxu3 %v302_v18  ;;  %v268_v28 = vld [vmem:[%s1927_s29 + $0xc8] sm:$0xff]  ;;  %v251_v31 = vld [vmem:[%s1927_s29 + $0x40] sm:$0xff]  ;;  %v298_v34 = vld [vmem:[%s1927_s29 + $0x1b8] sm:$0xff] }
  0x20   : > { %321 = vmatpush.msra.mxu0 %v254_v19  ;;  %362 = vmatpush.msra.mxu2 %v285_v21  ;;  %v267_v32 = vld [vmem:[%s1927_s29 + $0xc0] sm:$0xff]  ;;  %v250_v35 = vld [vmem:[%s1927_s29 + $0x38] sm:$0xff]  ;;  %v281_v37 = vld [vmem:[%s1927_s29 + $0x130] sm:$0xff] }
  0x21   : > { %341 = vmatpush.msra.mxu1 %v270_v20  ;;  %382 = vmatpush.msra.mxu3 %v301_v22  ;;  %v266_v36 = vld [vmem:[%s1927_s29 + $0xb8] sm:$0xff]  ;;  %v297_v38 = vld [vmem:[%s1927_s29 + $0x1b0] sm:$0xff]  ;;  %v280_v41 = vld [vmem:[%s1927_s29 + $0x128] sm:$0xff] }
  0x22   : > { %322 = vmatpush.msra.mxu0 %v253_v23  ;;  %363 = vmatpush.msra.mxu2 %v284_v25  ;;  %v249_v39 = vld [vmem:[%s1927_s29 + $0x30] sm:$0xff]  ;;  %v296_v42 = vld [vmem:[%s1927_s29 + $0x1a8] sm:$0xff]  ;;  %v242_v45 = vld [vmem:[%s1922_s25] sm:$0xff] }
  0x23   : > { %342 = vmatpush.msra.mxu1 %v269_v24  ;;  %383 = vmatpush.msra.mxu3 %v300_v26  ;;  %v265_v40 = vld [vmem:[%s1927_s29 + $0xb0] sm:$0xff]  ;;  %v248_v43 = vld [vmem:[%s1927_s29 + $0x28] sm:$0xff]  ;;  %v279_v46 = vld [vmem:[%s1927_s29 + $0x120] sm:$0xff]  ;;  %308 = vst [vmem:[#allocation1] ss:$4 sm:$0xff] %v242_v45 }
  0x24   : > { %323 = vmatpush.msra.mxu0 %v252_v27  ;;  %364 = vmatpush.msra.mxu2 %v283_v29  ;;  %v264_v44 = vld [vmem:[%s1927_s29 + $0xa8] sm:$0xff]  ;;  %v295_v47 = vld [vmem:[%s1927_s29 + $0x1a0] sm:$0xff]  ;;  %v278_v50 = vld [vmem:[%s1927_s29 + $0x118] sm:$0xff] }
  0x25   : > { %343 = vmatpush.msra.mxu1 %v268_v28  ;;  %384 = vmatpush.msra.mxu3 %v299_v30  ;;  %v247_v48 = vld [vmem:[%s1927_s29 + $0x20] sm:$0xff]  ;;  %v294_v51 = vld [vmem:[%s1927_s29 + $0x198] sm:$0xff]  ;;  %v277_v54 = vld [vmem:[%s1927_s29 + $0x110] sm:$0xff] }
  0x26   : > { %324 = vmatpush.msra.mxu0 %v251_v31  ;;  %365 = vmatpush.msra.mxu2 %v282_v33  ;;  %v263_v49 = vld [vmem:[%s1927_s29 + $0xa0] sm:$0xff]  ;;  %v246_v52 = vld [vmem:[%s1927_s29 + $0x18] sm:$0xff]  ;;  %v293_v55 = vld [vmem:[%s1927_s29 + $0x190] sm:$0xff] }
  0x27   : > { %344 = vmatpush.msra.mxu1 %v267_v32  ;;  %385 = vmatpush.msra.mxu3 %v298_v34  ;;  %v262_v53 = vld [vmem:[%s1927_s29 + $0x98] sm:$0xff]  ;;  %v245_v56 = vld [vmem:[%s1927_s29 + $0x10] sm:$0xff]  ;;  %v276_v58 = vld [vmem:[%s1927_s29 + $0x108] sm:$0xff] }
  0x28   : > { %325 = vmatpush.msra.mxu0 %v250_v35  ;;  %366 = vmatpush.msra.mxu2 %v281_v37  ;;  %v261_v57 = vld [vmem:[%s1927_s29 + $0x90] sm:$0xff]  ;;  %v292_v59 = vld [vmem:[%s1927_s29 + $0x188] sm:$0xff]  ;;  %v275_v62 = vld [vmem:[%s1927_s29 + $0x100] sm:$0xff] }
  0x29   : > { %345 = vmatpush.msra.mxu1 %v266_v36  ;;  %386 = vmatpush.msra.mxu3 %v297_v38  ;;  %v244_v60 = vld [vmem:[%s1927_s29 + $0x8] sm:$0xff]  ;;  %v291_v63 = vld [vmem:[%s1927_s29 + $0x180] sm:$0xff] }
  0x2a   : > { %326 = vmatpush.msra.mxu0 %v249_v39  ;;  %367 = vmatpush.msra.mxu2 %v280_v41  ;;  %v260_v61 = vld [vmem:[%s1927_s29 + $0x88] sm:$0xff]  ;;  %v311_v0 = vld.sshfl [vmem:[#allocation1 + $0x10] sm:$0xff pattern:$0x73625140]  ;;  %v243_v2 = vld [vmem:[%s1927_s29] sm:$0xff] }
  0x2b   : > { %346 = vmatpush.msra.mxu1 %v265_v40  ;;  %387 = vmatpush.msra.mxu3 %v296_v42  ;;  %v312_v1 = vld.sshfl [vmem:[#allocation1 + $0x18] sm:$0xff pattern:$0x73625140]  ;;  %v259_v3 = vld [vmem:[%s1927_s29 + $0x80] sm:$0xff]  ;;  %v241_v12 = vld [vmem:[#allocation2] sm:$0x3] }
  0x2c   : > { %327 = vmatpush.msra.mxu0 %v248_v43  ;;  %368 = vmatpush.msra.mxu2 %v279_v46  ;;  %v309_v4 = vld.sshfl [vmem:[#allocation1] sm:$0xff pattern:$0x73625140]  ;;  %v310_v5 = vld.sshfl [vmem:[#allocation1 + $0x8] sm:$0xff pattern:$0x73625140] }
  0x2d   : > { %347 = vmatpush.msra.mxu1 %v264_v44  ;;  %388 = vmatpush.msra.mxu3 %v295_v47 }
  0x2e   : > { %328 = vmatpush.msra.mxu0 %v247_v48  ;;  %369 = vmatpush.msra.mxu2 %v278_v50 }
  0x2f   : > { %348 = vmatpush.msra.mxu1 %v263_v49  ;;  %389 = vmatpush.msra.mxu3 %v294_v51 }
  0x30   : > { %329 = vmatpush.msra.mxu0 %v246_v52  ;;  %370 = vmatpush.msra.mxu2 %v277_v54 }
  0x31   : > { %349 = vmatpush.msra.mxu1 %v262_v53  ;;  %390 = vmatpush.msra.mxu3 %v293_v55 }
  0x32   : > { %330 = vmatpush.msra.mxu0 %v245_v56  ;;  %371 = vmatpush.msra.mxu2 %v276_v58 }
  0x33   : > { %350 = vmatpush.msra.mxu1 %v261_v57  ;;  %391 = vmatpush.msra.mxu3 %v292_v59 }
  0x34   : > { %331 = vmatpush.msra.mxu0 %v244_v60  ;;  %372 = vmatpush.msra.mxu2 %v275_v62 }
  0x35   : > { %351 = vmatpush.msra.mxu1 %v260_v61  ;;  %392 = vmatpush.msra.mxu3 %v291_v63 }
  0x36   : > { %373 = vmatmul.f32.vlgmr.msra.gmra.mxu2 %v311_v0  ;;  %393 = vmatmul.f32.vlgmr.msra.gmra.mxu3 %v312_v1 }
  0x37   : > { %332 = vmatpush.msra.mxu0 %v243_v2  ;;  %352 = vmatpush.msra.mxu1 %v259_v3 }
  0x38   : > { %333 = vmatmul.f32.vlgmr.msra.gmra.mxu0 %v309_v4  ;;  %353 = vmatmul.f32.vlgmr.msra.gmra.mxu1 %v310_v5 }
  0xb5   : > { %v334_v6 = vpop.f32.mrf.mxu0  ;;  %v354_v7 = vpop.f32.mrf.mxu1 }
  0xb6   : > { %v355_v8 = vadd.f32 %v354_v7, %v334_v6 }
  0xb9   : > { %v374_v9 = vpop.f32.mrf.mxu2  ;;  %v394_v10 = vpop.f32.mrf.mxu3 }
  0xba   : > { %v375_v11 = vadd.f32 %v374_v9, %v355_v8 }
  0xbc   : > { %v395_v13 = vadd.f32 %v394_v10, %v375_v11  ;;  %403 = sbr.rel (%p1659_p6) target bundleno = 9827 (0x2663), region = 48 }
  0xbe   : > { %v397_v14 = vadd.f32 %v395_v13, %v241_v12 }
  0xc0   : > { %399 = vst.msk [vmem:[#allocation2] sm:$0x3] %vm398_vm1, %v397_v14 }
  0xc1   : > { %v2000_v15 = vld [vmem:[%s2515_s3] ss:$0 sm:$0xff]  ;;  %v2005_v16 = vld [vmem:[%s2515_s3 + $0x1] ss:$0 sm:$0xff]  ;;  %v2010_v17 = vld [vmem:[%s2515_s3 + $0x2] ss:$0 sm:$0xff] }
  0xc2   : > { %v2015_v18 = vld [vmem:[%s2515_s3 + $0x3] ss:$0 sm:$0xff]  ;;  %v2018_v19 = vmul.f32 0.0, %v2000_v15  ;;  %v425_v20 = vmul.f32 0.0, %v2005_v16  ;;  %v431_v21 = vmul.f32 0.0, %v2010_v17  ;;  %vm442_vm2 = vcmask 310272  }
  0xc3   : > { %v437_v23 = vmul.f32 0.0, %v2015_v18  ;;  %v2030_v27 = vld [vmem:[%s2516_s4] ss:$0 sm:$0xff]  ;;  %v2035_v28 = vld [vmem:[%s2516_s4 + $0x1] ss:$0 sm:$0xff]  ;;  %v1874_v55 = vmov 76.0  }
  0xc4   : > { %v2023_v22 = vadd.f32 %v425_v20, %v2018_v19  ;;  %v2038_v29 = vmul.f32 0.0, %v2030_v27  ;;  %v428_v30 = vmul.f32 0.0, %v2035_v28  ;;  %v2044_v31 = vld [vmem:[%s2516_s4 + $0x2] ss:$0 sm:$0xff]  ;;  %v2053_v34 = vld [vmem:[%s2516_s4 + $0x3] ss:$0 sm:$0xff] }
  0xc5   : > { %v434_v33 = vmul.f32 0.0, %v2044_v31  ;;  %v1750_v35 = vld [vmem:[%s2514_s2] ss:$0 sm:$0xff]  ;;  %v440_v38 = vmul.f32 0.0, %v2053_v34  ;;  %v1875_v0 = vmov 0.0  }
  0xc6   : > { %v432_v24 = vadd.f32 %v431_v21, %v2023_v22  ;;  %v2047_v32 = vadd.f32 %v428_v30, %v2038_v29 }
  0xc7   : > { %v404_v36 = vld [vmem:[#allocation2] sm:$0x3] }
  0xc8   : > { %v438_v25 = vadd.f32 %v437_v23, %v432_v24  ;;  %v435_v37 = vadd.f32 %v434_v33, %v2047_v32  ;;  %v2060_v39 = vadd.f32 %v1750_v35, %v404_v36 }
  0xca   : > { %v443_v26 = vsel %vm442_vm2, %v438_v25, 0.0  ;;  %v441_v41 = vadd.f32 %v440_v38, %v435_v37 }
  0xcb   : > { %444 = vadd.xlane.f32.xlu0 %v443_v26 }
 0x13e   : > { %v445_v40 = vpop.xlane.xlu0 %444 }
 0x13f   : > { %v446_v42 = vsub.f32 %v445_v40, %v438_v25 }
 0x141   : > { %v447_v43 = vadd.f32 %v446_v42, %v2060_v39 }
 0x143   : > { %v448_v44 = vadd.f32 %v447_v43, %v441_v41 }
 0x145   : > { %v449_v45 = vmul.f32 1.442695, %v448_v44 }
 0x147   : > { %1751 = vpow2.f32 %v449_v45 }
 0x148   : > { %1753 = vrcp.f32 %v1874_v55 }
 0x14d   : > { %v1752_v46 = vpop.eup %1751 }
 0x14e   : > { %v451_v47 = vsel %vm398_vm1, %v1752_v46, 0.0  ;;  %v1754_v56 = vpop.eup %1753 }
 0x14f   : > { %452 = vadd.xlane.f32.xlu0 %v451_v47  ;;  %v463_v57 = vmul.f32 76.0, %v1754_v56  ;;  %vm467_vm3 = vweird.f32 %v1754_v56 }
 0x151   : > { %v464_v58 = vsub.f32 1.0, %v463_v57 }
 0x153   : > { %v465_v59 = vmul.f32 %v1754_v56, %v464_v58 }
 0x155   : > { %v466_v60 = vadd.f32 %v1754_v56, %v465_v59 }
 0x157   : > { %v2064_v61 = vsel %vm467_vm3, %v1754_v56, %v466_v60 }
 0x1c2   : > { %v453_v48 = vpop.xlane.xlu0 %452 }
 0x1c3   : > { %v454_v49 = vrot.slane %v453_v48, 4 }
 0x1c5   : > { %v455_v50 = vadd.f32 %v454_v49, %v453_v48 }
 0x1c7   : > { %v456_v51 = vrot.slane %v455_v50, 2 }
 0x1c9   : > { %v457_v52 = vadd.f32 %v456_v51, %v455_v50 }
 0x1cb   : > { %v458_v53 = vrot.slane %v457_v52, 1 }
 0x1cd   : > { %v459_v54 = vadd.f32 %v458_v53, %v457_v52 }
 0x1cf   : > { %1664 = vpush %v459_v54 }
 0x200   : > { %s1665_s25 = spop %1664 }
 0x201   : > { %v461_v62 = vstv %s1665_s25 }
 0x202   : > { %v469_v63 = vmul.f32 %v2064_v61, %v461_v62 }
 0x204   : > { %vm470_vm4 = vcmp.gt.f32.partialorder %v1752_v46, %v469_v63 }
 0x205   : > { %v2068_v1 = vsel %vm470_vm4, 1.0, %v1875_v0 }
 0x206   : > { %v473_v2 = vmul.f32 %v2015_v18, %v2068_v1  ;;  %v475_v5 = vmul.f32 %v2053_v34, %v2068_v1  ;;  %v500_v35 = vmul.f32 %v2010_v17, %v2068_v1  ;;  %v502_v42 = vmul.f32 %v2044_v31, %v2068_v1 }
 0x207   : > { %v533_v59 = vmul.f32 %v2035_v28, %v2068_v1 }
 0x208   : > { %v474_v3 = vadd.f32 %v473_v2, %v432_v24  ;;  %v476_v8 = vadd.f32 %v475_v5, %v435_v37  ;;  %v501_v37 = vadd.f32 %v500_v35, %v2023_v22  ;;  %v503_v45 = vadd.f32 %v502_v42, %v2047_v32 }
 0x209   : > { %v531_v32 = vmul.f32 %v2005_v16, %v2068_v1  ;;  %v534_v5 = vadd.f32 %v533_v59, %v2038_v29 }
 0x20a   : > { %v477_v4 = vsel %vm398_vm1, %v474_v3, 0.0 }
 0x20b   : > { %478 = vadd.xlane.f32.xlu1 %v477_v4  ;;  %v532_v4 = vadd.f32 %v531_v32, %v2018_v19 }
 0x27e   : > { %v479_v6 = vpop.xlane.xlu1 %478 }
 0x27f   : > { %v480_v7 = vsub.f32 %v479_v6, %v474_v3  ;;  %v566_v6 = vmul.f32 %v2000_v15, %v2068_v1 }
 0x281   : > { %v481_v9 = vadd.f32 %v480_v7, %v2060_v39  ;;  %v568_v7 = vmul.f32 %v2030_v27, %v2068_v1 }
 0x283   : > { %v482_v10 = vadd.f32 %v481_v9, %v476_v8 }
 0x285   : > { %v483_v11 = vmul.f32 1.442695, %v482_v10 }
 0x287   : > { %1755 = vpow2.f32 %v483_v11 }
 0x28d   : > { %v1756_v12 = vpop.eup %1755 }
 0x28e   : > { %v485_v13 = vsel %vm398_vm1, %v1756_v12, 0.0 }
 0x28f   : > { %486 = vadd.xlane.f32.xlu1 %v485_v13 }
 0x302   : > { %v487_v14 = vpop.xlane.xlu1 %486 }
 0x303   : > { %v488_v20 = vrot.slane %v487_v14, 4 }
 0x305   : > { %v489_v21 = vadd.f32 %v488_v20, %v487_v14 }
 0x307   : > { %v490_v23 = vrot.slane %v489_v21, 2 }
 0x309   : > { %v491_v24 = vadd.f32 %v490_v23, %v489_v21 }
 0x30b   : > { %v492_v25 = vrot.slane %v491_v24, 1 }
 0x30d   : > { %v493_v26 = vadd.f32 %v492_v25, %v491_v24 }
 0x30f   : > { %1666 = vpush %v493_v26 }
 0x340   : > { %s1667_s26 = spop %1666 }
 0x341   : > { %v495_v30 = vstv %s1667_s26 }
 0x342   : > { %v496_v33 = vmul.f32 %v495_v30, %v2064_v61 }
 0x344   : > { %vm497_vm5 = vcmp.gt.f32.partialorder %v1756_v12, %v496_v33 }
 0x345   : > { %v498_v36 = vsel %vm497_vm5, 1.0, %v1875_v0 }
 0x346   : > { %v504_v38 = vmul.f32 %v2015_v18, %v498_v36  ;;  %v506_v43 = vmul.f32 %v2053_v34, %v498_v36  ;;  %v535_v60 = vmul.f32 %v2010_v17, %v498_v36  ;;  %v537_v63 = vmul.f32 %v2044_v31, %v498_v36 }
 0x347   : > { %v570_v2 = vmul.f32 %v2005_v16, %v498_v36  ;;  %v572_v8 = vmul.f32 %v2035_v28, %v498_v36  ;;  %v499_v9 = vadd.f32 %v498_v36, %v2068_v1  ;;  %v605_v11 = vmul.f32 %v2000_v15, %v498_v36 }
 0x348   : > { %v505_v40 = vadd.f32 %v504_v38, %v501_v37  ;;  %v507_v47 = vadd.f32 %v506_v43, %v503_v45  ;;  %v536_v10 = vadd.f32 %v535_v60, %v532_v4  ;;  %v538_v13 = vadd.f32 %v537_v63, %v534_v5 }
 0x349   : > { %v571_v19 = vadd.f32 %v570_v2, %v566_v6  ;;  %v607_v29 = vmul.f32 %v2030_v27, %v498_v36  ;;  %v573_v24 = vadd.f32 %v572_v8, %v568_v7 }
 0x34a   : > { %v508_v41 = vsel %vm398_vm1, %v505_v40, 0.0 }
 0x34b   : > { %509 = vadd.xlane.f32.xlu2 %v508_v41 }
 0x3be   : > { %v510_v44 = vpop.xlane.xlu2 %509 }
 0x3bf   : > { %v511_v46 = vsub.f32 %v510_v44, %v505_v40 }
 0x3c1   : > { %v512_v48 = vadd.f32 %v511_v46, %v2060_v39 }
 0x3c3   : > { %v513_v49 = vadd.f32 %v512_v48, %v507_v47 }
 0x3c5   : > { %v514_v22 = vmul.f32 1.442695, %v513_v49 }
 0x3c7   : > { %1757 = vpow2.f32 %v514_v22 }
 0x3cd   : > { %v1758_v50 = vpop.eup %1757 }
 0x3ce   : > { %v516_v51 = vsel %vm398_vm1, %v1758_v50, 0.0 }
 0x3cf   : > { %517 = vadd.xlane.f32.xlu2 %v516_v51 }
 0x442   : > { %v518_v52 = vpop.xlane.xlu2 %517 }
 0x443   : > { %v519_v53 = vrot.slane %v518_v52, 4 }
 0x445   : > { %v520_v54 = vadd.f32 %v519_v53, %v518_v52 }
 0x447   : > { %v521_v55 = vrot.slane %v520_v54, 2 }
 0x449   : > { %v522_v56 = vadd.f32 %v521_v55, %v520_v54 }
 0x44b   : > { %v523_v57 = vrot.slane %v522_v56, 1 }
 0x44d   : > { %v524_v58 = vadd.f32 %v523_v57, %v522_v56 }
 0x44f   : > { %1668 = vpush %v524_v58 }
 0x480   : > { %s1669_s27 = spop %1668 }
 0x481   : > { %v526_v62 = vstv %s1669_s27 }
 0x482   : > { %v527_v3 = vmul.f32 %v526_v62, %v2064_v61 }
 0x484   : > { %vm528_vm6 = vcmp.gt.f32.partialorder %v1758_v50, %v527_v3 }
 0x485   : > { %v529_v12 = vsel %vm528_vm6, 1.0, %v1875_v0 }
 0x486   : > { %v530_v14 = vadd.f32 %v529_v12, %v499_v9  ;;  %v539_v20 = vmul.f32 %v2015_v18, %v529_v12  ;;  %v541_v21 = vmul.f32 %v2053_v34, %v529_v12  ;;  %v574_v23 = vmul.f32 %v2010_v17, %v529_v12 }
 0x487   : > { %v576_v1 = vmul.f32 %v2044_v31, %v529_v12  ;;  %v609_v25 = vmul.f32 %v2005_v16, %v529_v12  ;;  %v611_v26 = vmul.f32 %v2035_v28, %v529_v12  ;;  %v644_v57 = vmul.f32 %v2000_v15, %v529_v12 }
 0x488   : > { %v540_v30 = vadd.f32 %v539_v20, %v536_v10  ;;  %v542_v33 = vadd.f32 %v541_v21, %v538_v13  ;;  %v575_v35 = vadd.f32 %v574_v23, %v571_v19  ;;  %v646_v2 = vmul.f32 %v2030_v27, %v529_v12 }
 0x489   : > { %v577_v37 = vadd.f32 %v576_v1, %v573_v24  ;;  %v610_v38 = vadd.f32 %v609_v25, %v605_v11  ;;  %v612_v36 = vadd.f32 %v611_v26, %v607_v29 }
 0x48a   : > { %v543_v40 = vsel %vm398_vm1, %v540_v30, 0.0 }
 0x48b   : > { %544 = vadd.xlane.f32.xlu0 %v543_v40 }
 0x4fe   : > { %v545_v41 = vpop.xlane.xlu0 %544 }
 0x4ff   : > { %v546_v42 = vsub.f32 %v545_v41, %v540_v30 }
 0x501   : > { %v547_v43 = vadd.f32 %v546_v42, %v2060_v39 }
 0x503   : > { %v548_v44 = vadd.f32 %v547_v43, %v542_v33 }
 0x505   : > { %v549_v45 = vmul.f32 1.442695, %v548_v44 }
 0x507   : > { %1759 = vpow2.f32 %v549_v45 }
 0x50d   : > { %v1760_v46 = vpop.eup %1759 }
 0x50e   : > { %v551_v47 = vsel %vm398_vm1, %v1760_v46, 0.0 }
 0x50f   : > { %552 = vadd.xlane.f32.xlu1 %v551_v47 }
 0x582   : > { %v553_v48 = vpop.xlane.xlu1 %552 }
 0x583   : > { %v554_v49 = vrot.slane %v553_v48, 4 }
 0x585   : > { %v555_v22 = vadd.f32 %v554_v49, %v553_v48 }
 0x587   : > { %v556_v50 = vrot.slane %v555_v22, 2 }
 0x589   : > { %v557_v51 = vadd.f32 %v556_v50, %v555_v22 }
 0x58b   : > { %v558_v52 = vrot.slane %v557_v51, 1 }
 0x58d   : > { %v559_v53 = vadd.f32 %v558_v52, %v557_v51 }
 0x58f   : > { %1670 = vpush %v559_v53 }
 0x5c0   : > { %s1671_s28 = spop %1670 }
 0x5c1   : > { %v561_v54 = vstv %s1671_s28 }
 0x5c2   : > { %v562_v55 = vmul.f32 %v561_v54, %v2064_v61 }
 0x5c4   : > { %vm563_vm7 = vcmp.gt.f32.partialorder %v1760_v46, %v562_v55 }
 0x5c5   : > { %v564_v56 = vsel %vm563_vm7, 1.0, %v1875_v0 }
 0x5c6   : > { %v565_v58 = vadd.f32 %v564_v56, %v530_v14  ;;  %v578_v32 = vmul.f32 %v2015_v18, %v564_v56  ;;  %v580_v59 = vmul.f32 %v2053_v34, %v564_v56  ;;  %v613_v60 = vmul.f32 %v2010_v17, %v564_v56 }
 0x5c7   : > { %v615_v62 = vmul.f32 %v2044_v31, %v564_v56  ;;  %v648_v63 = vmul.f32 %v2005_v16, %v564_v56  ;;  %v650_v3 = vmul.f32 %v2035_v28, %v564_v56  ;;  %v685_v45 = vmul.f32 %v2030_v27, %v564_v56 }
 0x5c8   : > { %v579_v4 = vadd.f32 %v578_v32, %v575_v35  ;;  %v581_v5 = vadd.f32 %v580_v59, %v577_v37  ;;  %v614_v6 = vadd.f32 %v613_v60, %v610_v38  ;;  %v683_v38 = vmul.f32 %v2000_v15, %v564_v56 }
 0x5c9   : > { %v616_v7 = vadd.f32 %v615_v62, %v612_v36  ;;  %v649_v8 = vadd.f32 %v648_v63, %v644_v57  ;;  %v651_v9 = vadd.f32 %v650_v3, %v646_v2 }
 0x5ca   : > { %v582_v10 = vsel %vm398_vm1, %v579_v4, 0.0 }
 0x5cb   : > { %583 = vadd.xlane.f32.xlu2 %v582_v10 }
 0x63e   : > { %v584_v11 = vpop.xlane.xlu2 %583 }
 0x63f   : > { %v585_v13 = vsub.f32 %v584_v11, %v579_v4 }
 0x641   : > { %v586_v19 = vadd.f32 %v585_v13, %v2060_v39 }
 0x643   : > { %v587_v29 = vadd.f32 %v586_v19, %v581_v5 }
 0x645   : > { %v588_v14 = vmul.f32 1.442695, %v587_v29 }
 0x647   : > { %1761 = vpow2.f32 %v588_v14 }
 0x64d   : > { %v1762_v20 = vpop.eup %1761 }
 0x64e   : > { %v590_v12 = vsel %vm398_vm1, %v1762_v20, 0.0 }
 0x64f   : > { %591 = vadd.xlane.f32.xlu0 %v590_v12 }
 0x6c2   : > { %v592_v21 = vpop.xlane.xlu0 %591 }
 0x6c3   : > { %v593_v23 = vrot.slane %v592_v21, 4 }
 0x6c5   : > { %v594_v24 = vadd.f32 %v593_v23, %v592_v21 }
 0x6c7   : > { %v595_v1 = vrot.slane %v594_v24, 2 }
 0x6c9   : > { %v596_v25 = vadd.f32 %v595_v1, %v594_v24 }
 0x6cb   : > { %v597_v26 = vrot.slane %v596_v25, 1 }
 0x6cd   : > { %v598_v30 = vadd.f32 %v597_v26, %v596_v25 }
 0x6cf   : > { %1672 = vpush %v598_v30 }
 0x700   : > { %s1673_s29 = spop %1672 }
 0x701   : > { %v600_v33 = vstv %s1673_s29 }
 0x702   : > { %v601_v35 = vmul.f32 %v600_v33, %v2064_v61 }
 0x704   : > { %vm602_vm8 = vcmp.gt.f32.partialorder %v1762_v20, %v601_v35 }
 0x705   : > { %v603_v37 = vsel %vm602_vm8, 1.0, %v1875_v0 }
 0x706   : > { %v604_v36 = vadd.f32 %v603_v37, %v565_v58  ;;  %v617_v40 = vmul.f32 %v2015_v18, %v603_v37  ;;  %v619_v41 = vmul.f32 %v2053_v34, %v603_v37  ;;  %v652_v42 = vmul.f32 %v2010_v17, %v603_v37 }
 0x707   : > { %v654_v43 = vmul.f32 %v2044_v31, %v603_v37  ;;  %v687_v44 = vmul.f32 %v2005_v16, %v603_v37  ;;  %v689_v46 = vmul.f32 %v2035_v28, %v603_v37  ;;  %v724_v14 = vmul.f32 %v2030_v27, %v603_v37 }
 0x708   : > { %v618_v47 = vadd.f32 %v617_v40, %v614_v6  ;;  %v620_v48 = vadd.f32 %v619_v41, %v616_v7  ;;  %v653_v49 = vadd.f32 %v652_v42, %v649_v8  ;;  %v722_v8 = vmul.f32 %v2000_v15, %v603_v37 }
 0x709   : > { %v655_v22 = vadd.f32 %v654_v43, %v651_v9  ;;  %v688_v50 = vadd.f32 %v687_v44, %v683_v38  ;;  %v690_v51 = vadd.f32 %v689_v46, %v685_v45 }
 0x70a   : > { %v621_v52 = vsel %vm398_vm1, %v618_v47, 0.0 }
 0x70b   : > { %622 = vadd.xlane.f32.xlu1 %v621_v52 }
 0x77e   : > { %v623_v53 = vpop.xlane.xlu1 %622 }
 0x77f   : > { %v624_v54 = vsub.f32 %v623_v53, %v618_v47 }
 0x781   : > { %v625_v55 = vadd.f32 %v624_v54, %v2060_v39 }
 0x783   : > { %v626_v57 = vadd.f32 %v625_v55, %v620_v48 }
 0x785   : > { %v627_v58 = vmul.f32 1.442695, %v626_v57 }
 0x787   : > { %1763 = vpow2.f32 %v627_v58 }
 0x78d   : > { %v1764_v32 = vpop.eup %1763 }
 0x78e   : > { %v629_v56 = vsel %vm398_vm1, %v1764_v32, 0.0 }
 0x78f   : > { %630 = vadd.xlane.f32.xlu2 %v629_v56 }
 0x802   : > { %v631_v59 = vpop.xlane.xlu2 %630 }
 0x803   : > { %v632_v60 = vrot.slane %v631_v59, 4 }
 0x805   : > { %v633_v62 = vadd.f32 %v632_v60, %v631_v59 }
 0x807   : > { %v634_v63 = vrot.slane %v633_v62, 2 }
 0x809   : > { %v635_v2 = vadd.f32 %v634_v63, %v633_v62 }
 0x80b   : > { %v636_v3 = vrot.slane %v635_v2, 1 }
 0x80d   : > { %v637_v4 = vadd.f32 %v636_v3, %v635_v2 }
 0x80f   : > { %1674 = vpush %v637_v4 }
 0x840   : > { %s1675_s30 = spop %1674 }
 0x841   : > { %v639_v5 = vstv %s1675_s30 }
 0x842   : > { %v640_v6 = vmul.f32 %v639_v5, %v2064_v61 }
 0x844   : > { %vm641_vm9 = vcmp.gt.f32.partialorder %v1764_v32, %v640_v6 }
 0x845   : > { %v642_v7 = vsel %vm641_vm9, 1.0, %v1875_v0 }
 0x846   : > { %v643_v9 = vadd.f32 %v642_v7, %v604_v36  ;;  %v656_v10 = vmul.f32 %v2015_v18, %v642_v7  ;;  %v658_v11 = vmul.f32 %v2053_v34, %v642_v7  ;;  %v691_v13 = vmul.f32 %v2010_v17, %v642_v7 }
 0x847   : > { %v693_v19 = vmul.f32 %v2044_v31, %v642_v7  ;;  %v726_v29 = vmul.f32 %v2005_v16, %v642_v7  ;;  %v728_v20 = vmul.f32 %v2035_v28, %v642_v7  ;;  %v763_v58 = vmul.f32 %v2030_v27, %v642_v7 }
 0x848   : > { %v657_v12 = vadd.f32 %v656_v10, %v653_v49  ;;  %v659_v21 = vadd.f32 %v658_v11, %v655_v22  ;;  %v692_v23 = vadd.f32 %v691_v13, %v688_v50  ;;  %v761_v50 = vmul.f32 %v2000_v15, %v642_v7 }
 0x849   : > { %v694_v24 = vadd.f32 %v693_v19, %v690_v51  ;;  %v727_v1 = vadd.f32 %v726_v29, %v722_v8  ;;  %v729_v25 = vadd.f32 %v728_v20, %v724_v14 }
 0x84a   : > { %v660_v26 = vsel %vm398_vm1, %v657_v12, 0.0 }
 0x84b   : > { %661 = vadd.xlane.f32.xlu0 %v660_v26 }
 0x8be   : > { %v662_v30 = vpop.xlane.xlu0 %661 }
 0x8bf   : > { %v663_v33 = vsub.f32 %v662_v30, %v657_v12 }
 0x8c1   : > { %v664_v35 = vadd.f32 %v663_v33, %v2060_v39 }
 0x8c3   : > { %v665_v38 = vadd.f32 %v664_v35, %v659_v21 }
 0x8c5   : > { %v666_v36 = vmul.f32 1.442695, %v665_v38 }
 0x8c7   : > { %1765 = vpow2.f32 %v666_v36 }
 0x8cd   : > { %v1766_v40 = vpop.eup %1765 }
 0x8ce   : > { %v668_v37 = vsel %vm398_vm1, %v1766_v40, 0.0 }
 0x8cf   : > { %669 = vadd.xlane.f32.xlu1 %v668_v37 }
 0x942   : > { %v670_v41 = vpop.xlane.xlu1 %669 }
 0x943   : > { %v671_v42 = vrot.slane %v670_v41, 4 }
 0x945   : > { %v672_v43 = vadd.f32 %v671_v42, %v670_v41 }
 0x947   : > { %v673_v44 = vrot.slane %v672_v43, 2 }
 0x949   : > { %v674_v45 = vadd.f32 %v673_v44, %v672_v43 }
 0x94b   : > { %v675_v46 = vrot.slane %v674_v45, 1 }
 0x94d   : > { %v676_v47 = vadd.f32 %v675_v46, %v674_v45 }
 0x94f   : > { %1676 = vpush %v676_v47 }
 0x980   : > { %s1677_s6 = spop %1676 }
 0x981   : > { %v678_v48 = vstv %s1677_s6 }
 0x982   : > { %v679_v49 = vmul.f32 %v678_v48, %v2064_v61 }
 0x984   : > { %vm680_vm10 = vcmp.gt.f32.partialorder %v1766_v40, %v679_v49 }
 0x985   : > { %v681_v22 = vsel %vm680_vm10, 1.0, %v1875_v0 }
 0x986   : > { %v682_v51 = vadd.f32 %v681_v22, %v643_v9  ;;  %v695_v52 = vmul.f32 %v2015_v18, %v681_v22  ;;  %v697_v53 = vmul.f32 %v2053_v34, %v681_v22  ;;  %v730_v54 = vmul.f32 %v2010_v17, %v681_v22 }
 0x987   : > { %v732_v55 = vmul.f32 %v2044_v31, %v681_v22  ;;  %v765_v57 = vmul.f32 %v2005_v16, %v681_v22  ;;  %v767_v32 = vmul.f32 %v2035_v28, %v681_v22  ;;  %v802_v36 = vmul.f32 %v2030_v27, %v681_v22 }
 0x988   : > { %v696_v56 = vadd.f32 %v695_v52, %v692_v23  ;;  %v698_v59 = vadd.f32 %v697_v53, %v694_v24  ;;  %v731_v60 = vadd.f32 %v730_v54, %v727_v1  ;;  %v800_v1 = vmul.f32 %v2000_v15, %v681_v22 }
 0x989   : > { %v733_v62 = vadd.f32 %v732_v55, %v729_v25  ;;  %v766_v63 = vadd.f32 %v765_v57, %v761_v50  ;;  %v768_v2 = vadd.f32 %v767_v32, %v763_v58 }
 0x98a   : > { %v699_v3 = vsel %vm398_vm1, %v696_v56, 0.0 }
 0x98b   : > { %700 = vadd.xlane.f32.xlu2 %v699_v3 }
 0x9fe   : > { %v701_v4 = vpop.xlane.xlu2 %700 }
 0x9ff   : > { %v702_v5 = vsub.f32 %v701_v4, %v696_v56 }
 0xa01   : > { %v703_v6 = vadd.f32 %v702_v5, %v2060_v39 }
 0xa03   : > { %v704_v8 = vadd.f32 %v703_v6, %v698_v59 }
 0xa05   : > { %v705_v9 = vmul.f32 1.442695, %v704_v8 }
 0xa07   : > { %1767 = vpow2.f32 %v705_v9 }
 0xa0d   : > { %v1768_v10 = vpop.eup %1767 }
 0xa0e   : > { %v707_v7 = vsel %vm398_vm1, %v1768_v10, 0.0 }
 0xa0f   : > { %708 = vadd.xlane.f32.xlu0 %v707_v7 }
 0xa82   : > { %v709_v11 = vpop.xlane.xlu0 %708 }
 0xa83   : > { %v710_v13 = vrot.slane %v709_v11, 4 }
 0xa85   : > { %v711_v19 = vadd.f32 %v710_v13, %v709_v11 }
 0xa87   : > { %v712_v29 = vrot.slane %v711_v19, 2 }
 0xa89   : > { %v713_v14 = vadd.f32 %v712_v29, %v711_v19 }
 0xa8b   : > { %v714_v20 = vrot.slane %v713_v14, 1 }
 0xa8d   : > { %v715_v12 = vadd.f32 %v714_v20, %v713_v14 }
 0xa8f   : > { %1678 = vpush %v715_v12 }
 0xac0   : > { %s1679_s7 = spop %1678 }
 0xac1   : > { %v717_v21 = vstv %s1679_s7 }
 0xac2   : > { %v718_v23 = vmul.f32 %v717_v21, %v2064_v61 }
 0xac4   : > { %vm719_vm11 = vcmp.gt.f32.partialorder %v1768_v10, %v718_v23 }
 0xac5   : > { %v720_v24 = vsel %vm719_vm11, 1.0, %v1875_v0 }
 0xac6   : > { %v721_v25 = vadd.f32 %v720_v24, %v682_v51  ;;  %v734_v26 = vmul.f32 %v2015_v18, %v720_v24  ;;  %v736_v30 = vmul.f32 %v2053_v34, %v720_v24  ;;  %v769_v33 = vmul.f32 %v2010_v17, %v720_v24 }
 0xac7   : > { %v771_v35 = vmul.f32 %v2044_v31, %v720_v24  ;;  %v804_v38 = vmul.f32 %v2005_v16, %v720_v24  ;;  %v806_v40 = vmul.f32 %v2035_v28, %v720_v24  ;;  %v841_v9 = vmul.f32 %v2030_v27, %v720_v24 }
 0xac8   : > { %v735_v37 = vadd.f32 %v734_v26, %v731_v60  ;;  %v737_v41 = vadd.f32 %v736_v30, %v733_v62  ;;  %v770_v42 = vadd.f32 %v769_v33, %v766_v63  ;;  %v839_v63 = vmul.f32 %v2000_v15, %v720_v24 }
 0xac9   : > { %v772_v43 = vadd.f32 %v771_v35, %v768_v2  ;;  %v805_v44 = vadd.f32 %v804_v38, %v800_v1  ;;  %v807_v45 = vadd.f32 %v806_v40, %v802_v36 }
 0xaca   : > { %v738_v46 = vsel %vm398_vm1, %v735_v37, 0.0 }
 0xacb   : > { %739 = vadd.xlane.f32.xlu1 %v738_v46 }
 0xb3e   : > { %v740_v47 = vpop.xlane.xlu1 %739 }
 0xb3f   : > { %v741_v48 = vsub.f32 %v740_v47, %v735_v37 }
 0xb41   : > { %v742_v49 = vadd.f32 %v741_v48, %v2060_v39 }
 0xb43   : > { %v743_v50 = vadd.f32 %v742_v49, %v737_v41 }
 0xb45   : > { %v744_v51 = vmul.f32 1.442695, %v743_v50 }
 0xb47   : > { %1769 = vpow2.f32 %v744_v51 }
 0xb4d   : > { %v1770_v52 = vpop.eup %1769 }
 0xb4e   : > { %v746_v22 = vsel %vm398_vm1, %v1770_v52, 0.0 }
 0xb4f   : > { %747 = vadd.xlane.f32.xlu2 %v746_v22 }
 0xbc2   : > { %v748_v53 = vpop.xlane.xlu2 %747 }
 0xbc3   : > { %v749_v54 = vrot.slane %v748_v53, 4 }
 0xbc5   : > { %v750_v55 = vadd.f32 %v749_v54, %v748_v53 }
 0xbc7   : > { %v751_v57 = vrot.slane %v750_v55, 2 }
 0xbc9   : > { %v752_v58 = vadd.f32 %v751_v57, %v750_v55 }
 0xbcb   : > { %v753_v32 = vrot.slane %v752_v58, 1 }
 0xbcd   : > { %v754_v56 = vadd.f32 %v753_v32, %v752_v58 }
 0xbcf   : > { %1680 = vpush %v754_v56 }
 0xc00   : > { %s1681_s8 = spop %1680 }
 0xc01   : > { %v756_v59 = vstv %s1681_s8 }
 0xc02   : > { %v757_v60 = vmul.f32 %v756_v59, %v2064_v61 }
 0xc04   : > { %vm758_vm12 = vcmp.gt.f32.partialorder %v1770_v52, %v757_v60 }
 0xc05   : > { %v759_v62 = vsel %vm758_vm12, 1.0, %v1875_v0 }
 0xc06   : > { %v760_v2 = vadd.f32 %v759_v62, %v721_v25  ;;  %v773_v3 = vmul.f32 %v2015_v18, %v759_v62  ;;  %v775_v4 = vmul.f32 %v2053_v34, %v759_v62  ;;  %v808_v5 = vmul.f32 %v2010_v17, %v759_v62 }
 0xc07   : > { %v810_v6 = vmul.f32 %v2044_v31, %v759_v62  ;;  %v843_v8 = vmul.f32 %v2005_v16, %v759_v62  ;;  %v845_v10 = vmul.f32 %v2035_v28, %v759_v62  ;;  %v880_v51 = vmul.f32 %v2030_v27, %v759_v62 }
 0xc08   : > { %v774_v7 = vadd.f32 %v773_v3, %v770_v42  ;;  %v776_v11 = vadd.f32 %v775_v4, %v772_v43  ;;  %v809_v13 = vadd.f32 %v808_v5, %v805_v44  ;;  %v878_v44 = vmul.f32 %v2000_v15, %v759_v62 }
 0xc09   : > { %v811_v19 = vadd.f32 %v810_v6, %v807_v45  ;;  %v844_v29 = vadd.f32 %v843_v8, %v839_v63  ;;  %v846_v14 = vadd.f32 %v845_v10, %v841_v9 }
 0xc0a   : > { %v777_v20 = vsel %vm398_vm1, %v774_v7, 0.0 }
 0xc0b   : > { %778 = vadd.xlane.f32.xlu0 %v777_v20 }
 0xc7e   : > { %v779_v12 = vpop.xlane.xlu0 %778 }
 0xc7f   : > { %v780_v21 = vsub.f32 %v779_v12, %v774_v7 }
 0xc81   : > { %v781_v23 = vadd.f32 %v780_v21, %v2060_v39 }
 0xc83   : > { %v782_v1 = vadd.f32 %v781_v23, %v776_v11 }
 0xc85   : > { %v783_v25 = vmul.f32 1.442695, %v782_v1 }
 0xc87   : > { %1771 = vpow2.f32 %v783_v25 }
 0xc8d   : > { %v1772_v26 = vpop.eup %1771 }
 0xc8e   : > { %v785_v24 = vsel %vm398_vm1, %v1772_v26, 0.0 }
 0xc8f   : > { %786 = vadd.xlane.f32.xlu1 %v785_v24 }
 0xd02   : > { %v787_v30 = vpop.xlane.xlu1 %786 }
 0xd03   : > { %v788_v33 = vrot.slane %v787_v30, 4 }
 0xd05   : > { %v789_v35 = vadd.f32 %v788_v33, %v787_v30 }
 0xd07   : > { %v790_v38 = vrot.slane %v789_v35, 2 }
 0xd09   : > { %v791_v36 = vadd.f32 %v790_v38, %v789_v35 }
 0xd0b   : > { %v792_v40 = vrot.slane %v791_v36, 1 }
 0xd0d   : > { %v793_v37 = vadd.f32 %v792_v40, %v791_v36 }
 0xd0f   : > { %1682 = vpush %v793_v37 }
 0xd40   : > { %s1683_s9 = spop %1682 }
 0xd41   : > { %v795_v41 = vstv %s1683_s9 }
 0xd42   : > { %v796_v42 = vmul.f32 %v795_v41, %v2064_v61 }
 0xd44   : > { %vm797_vm13 = vcmp.gt.f32.partialorder %v1772_v26, %v796_v42 }
 0xd45   : > { %v798_v43 = vsel %vm797_vm13, 1.0, %v1875_v0 }
 0xd46   : > { %v799_v45 = vadd.f32 %v798_v43, %v760_v2  ;;  %v812_v46 = vmul.f32 %v2015_v18, %v798_v43  ;;  %v814_v47 = vmul.f32 %v2053_v34, %v798_v43  ;;  %v847_v48 = vmul.f32 %v2010_v17, %v798_v43 }
 0xd47   : > { %v849_v49 = vmul.f32 %v2044_v31, %v798_v43  ;;  %v882_v50 = vmul.f32 %v2005_v16, %v798_v43  ;;  %v884_v52 = vmul.f32 %v2035_v28, %v798_v43  ;;  %v919_v25 = vmul.f32 %v2030_v27, %v798_v43 }
 0xd48   : > { %v813_v22 = vadd.f32 %v812_v46, %v809_v13  ;;  %v815_v53 = vadd.f32 %v814_v47, %v811_v19  ;;  %v848_v54 = vadd.f32 %v847_v48, %v844_v29  ;;  %v917_v29 = vmul.f32 %v2000_v15, %v798_v43 }
 0xd49   : > { %v850_v55 = vadd.f32 %v849_v49, %v846_v14  ;;  %v883_v57 = vadd.f32 %v882_v50, %v878_v44  ;;  %v885_v58 = vadd.f32 %v884_v52, %v880_v51 }
 0xd4a   : > { %v816_v32 = vsel %vm398_vm1, %v813_v22, 0.0 }
 0xd4b   : > { %817 = vadd.xlane.f32.xlu2 %v816_v32 }
 0xdbe   : > { %v818_v56 = vpop.xlane.xlu2 %817 }
 0xdbf   : > { %v819_v59 = vsub.f32 %v818_v56, %v813_v22 }
 0xdc1   : > { %v820_v60 = vadd.f32 %v819_v59, %v2060_v39 }
 0xdc3   : > { %v821_v63 = vadd.f32 %v820_v60, %v815_v53 }
 0xdc5   : > { %v822_v2 = vmul.f32 1.442695, %v821_v63 }
 0xdc7   : > { %1773 = vpow2.f32 %v822_v2 }
 0xdcd   : > { %v1774_v3 = vpop.eup %1773 }
 0xdce   : > { %v824_v62 = vsel %vm398_vm1, %v1774_v3, 0.0 }
 0xdcf   : > { %825 = vadd.xlane.f32.xlu0 %v824_v62 }
 0xe42   : > { %v826_v4 = vpop.xlane.xlu0 %825 }
 0xe43   : > { %v827_v5 = vrot.slane %v826_v4, 4 }
 0xe45   : > { %v828_v6 = vadd.f32 %v827_v5, %v826_v4 }
 0xe47   : > { %v829_v8 = vrot.slane %v828_v6, 2 }
 0xe49   : > { %v830_v9 = vadd.f32 %v829_v8, %v828_v6 }
 0xe4b   : > { %v831_v10 = vrot.slane %v830_v9, 1 }
 0xe4d   : > { %v832_v7 = vadd.f32 %v831_v10, %v830_v9 }
 0xe4f   : > { %1684 = vpush %v832_v7 }
 0xe80   : > { %s1685_s10 = spop %1684 }
 0xe81   : > { %v834_v11 = vstv %s1685_s10 }
 0xe82   : > { %v835_v13 = vmul.f32 %v834_v11, %v2064_v61 }
 0xe84   : > { %vm836_vm14 = vcmp.gt.f32.partialorder %v1774_v3, %v835_v13 }
 0xe85   : > { %v837_v19 = vsel %vm836_vm14, 1.0, %v1875_v0 }
 0xe86   : > { %v838_v14 = vadd.f32 %v837_v19, %v799_v45  ;;  %v851_v20 = vmul.f32 %v2015_v18, %v837_v19  ;;  %v853_v12 = vmul.f32 %v2053_v34, %v837_v19  ;;  %v886_v21 = vmul.f32 %v2010_v17, %v837_v19 }
 0xe87   : > { %v888_v23 = vmul.f32 %v2044_v31, %v837_v19  ;;  %v921_v1 = vmul.f32 %v2005_v16, %v837_v19  ;;  %v923_v26 = vmul.f32 %v2035_v28, %v837_v19  ;;  %v958_v2 = vmul.f32 %v2030_v27, %v837_v19 }
 0xe88   : > { %v852_v24 = vadd.f32 %v851_v20, %v848_v54  ;;  %v854_v30 = vadd.f32 %v853_v12, %v850_v55  ;;  %v887_v33 = vadd.f32 %v886_v21, %v883_v57  ;;  %v956_v57 = vmul.f32 %v2000_v15, %v837_v19 }
 0xe89   : > { %v889_v35 = vadd.f32 %v888_v23, %v885_v58  ;;  %v922_v38 = vadd.f32 %v921_v1, %v917_v29  ;;  %v924_v36 = vadd.f32 %v923_v26, %v919_v25  ;;  %v2240_v1 = vld [vmem:[%s2515_s3] ss:$0 sm:$0xff] }
 0xe8a   : > { %v855_v40 = vsel %vm398_vm1, %v852_v24, 0.0 }
 0xe8b   : > { %856 = vadd.xlane.f32.xlu1 %v855_v40 }
 0xefe   : > { %v857_v37 = vpop.xlane.xlu1 %856 }
 0xeff   : > { %v858_v41 = vsub.f32 %v857_v37, %v852_v24  ;;  %v2246_v24 = vld [vmem:[%s2515_s3 + $0x3] ss:$0 sm:$0xff]  ;;  %v2265_v37 = vld [vmem:[%s2515_s3 + $0x1] ss:$0 sm:$0xff] }
 0xf01   : > { %v859_v42 = vadd.f32 %v858_v41, %v2060_v39  ;;  %v2271_v41 = vld [vmem:[%s2516_s4] ss:$0 sm:$0xff] }
 0xf03   : > { %v860_v44 = vadd.f32 %v859_v42, %v854_v30 }
 0xf05   : > { %v861_v45 = vmul.f32 1.442695, %v860_v44  ;;  %v2277_v44 = vld [vmem:[%s2516_s4 + $0x1] ss:$0 sm:$0xff] }
 0xf07   : > { %1775 = vpow2.f32 %v861_v45 }
 0xf0d   : > { %v1776_v46 = vpop.eup %1775 }
 0xf0e   : > { %v863_v43 = vsel %vm398_vm1, %v1776_v46, 0.0 }
 0xf0f   : > { %864 = vadd.xlane.f32.xlu2 %v863_v43 }
 0xf82   : > { %v865_v47 = vpop.xlane.xlu2 %864 }
 0xf83   : > { %v866_v48 = vrot.slane %v865_v47, 4 }
 0xf85   : > { %v867_v49 = vadd.f32 %v866_v48, %v865_v47 }
 0xf87   : > { %v868_v50 = vrot.slane %v867_v49, 2 }
 0xf89   : > { %v869_v51 = vadd.f32 %v868_v50, %v867_v49 }
 0xf8b   : > { %v870_v52 = vrot.slane %v869_v51, 1 }
 0xf8d   : > { %v871_v22 = vadd.f32 %v870_v52, %v869_v51 }
 0xf8f   : > { %1686 = vpush %v871_v22 }
 0xfc0   : > { %s1687_s11 = spop %1686 }
 0xfc1   : > { %v873_v53 = vstv %s1687_s11 }
 0xfc2   : > { %v874_v54 = vmul.f32 %v873_v53, %v2064_v61 }
 0xfc4   : > { %vm875_vm15 = vcmp.gt.f32.partialorder %v1776_v46, %v874_v54 }
 0xfc5   : > { %v876_v55 = vsel %vm875_vm15, 1.0, %v1875_v0 }
 0xfc6   : > { %v877_v58 = vadd.f32 %v876_v55, %v838_v14  ;;  %v890_v32 = vmul.f32 %v2015_v18, %v876_v55  ;;  %v892_v56 = vmul.f32 %v2053_v34, %v876_v55  ;;  %v925_v59 = vmul.f32 %v2010_v17, %v876_v55 }
 0xfc7   : > { %v927_v60 = vmul.f32 %v2044_v31, %v876_v55  ;;  %v960_v63 = vmul.f32 %v2005_v16, %v876_v55  ;;  %v962_v3 = vmul.f32 %v2035_v28, %v876_v55  ;;  %v995_v25 = vmul.f32 %v2240_v1, %v876_v55 }
 0xfc8   : > { %v891_v62 = vadd.f32 %v890_v32, %v887_v33  ;;  %v893_v4 = vadd.f32 %v892_v56, %v889_v35  ;;  %v926_v5 = vadd.f32 %v925_v59, %v922_v38  ;;  %v2253_v35 = vld [vmem:[%s2515_s3 + $0x2] ss:$0 sm:$0xff]  ;;  %v997_v42 = vmul.f32 %v2271_v41, %v876_v55 }
 0xfc9   : > { %v928_v6 = vadd.f32 %v927_v60, %v924_v36  ;;  %v961_v15 = vadd.f32 %v960_v63, %v956_v57  ;;  %v963_v8 = vadd.f32 %v962_v3, %v958_v2  ;;  %v2259_v36 = vld [vmem:[%s2516_s4 + $0x2] ss:$0 sm:$0xff] }
 0xfca   : > { %v894_v18 = vsel %vm398_vm1, %v891_v62, 0.0 }
 0xfcb   : > { %895 = vadd.xlane.f32.xlu0 %v894_v18  ;;  %v2290_v18 = vld [vmem:[%s2516_s4 + $0x3] ss:$0 sm:$0xff] }
0x103e   : > { %v896_v9 = vpop.xlane.xlu0 %895 }
0x103f   : > { %v897_v10 = vsub.f32 %v896_v9, %v891_v62 }
0x1041   : > { %v898_v17 = vadd.f32 %v897_v10, %v2060_v39 }
0x1043   : > { %v899_v31 = vadd.f32 %v898_v17, %v893_v4 }
0x1045   : > { %v900_v7 = vmul.f32 1.442695, %v899_v31 }
0x1047   : > { %1777 = vpow2.f32 %v900_v7 }
0x104d   : > { %v1778_v16 = vpop.eup %1777 }
0x104e   : > { %v902_v27 = vsel %vm398_vm1, %v1778_v16, 0.0 }
0x104f   : > { %903 = vadd.xlane.f32.xlu1 %v902_v27 }
0x10c2   : > { %v904_v28 = vpop.xlane.xlu1 %903 }
0x10c3   : > { %v905_v11 = vrot.slane %v904_v28, 4 }
0x10c5   : > { %v906_v13 = vadd.f32 %v905_v11, %v904_v28 }
0x10c7   : > { %v907_v19 = vrot.slane %v906_v13, 2 }
0x10c9   : > { %v908_v29 = vadd.f32 %v907_v19, %v906_v13 }
0x10cb   : > { %v909_v14 = vrot.slane %v908_v29, 1 }
0x10cd   : > { %v910_v20 = vadd.f32 %v909_v14, %v908_v29 }
0x10cf   : > { %1688 = vpush %v910_v20 }
0x1100   : > { %s1689_s12 = spop %1688 }
0x1101   : > { %v912_v12 = vstv %s1689_s12 }
0x1102   : > { %v913_v21 = vmul.f32 %v912_v12, %v2064_v61 }
0x1104   : > { %vm914_vm0 = vcmp.gt.f32.partialorder %v1778_v16, %v913_v21 }
0x1105   : > { %v915_v23 = vsel %vm914_vm0, 1.0, %v1875_v0 }
0x1106   : > { %v916_v26 = vadd.f32 %v915_v23, %v877_v58  ;;  %v929_v30 = vmul.f32 %v2246_v24, %v915_v23  ;;  %v931_v33 = vmul.f32 %v2053_v34, %v915_v23  ;;  %v964_v38 = vmul.f32 %v2253_v35, %v915_v23 }
0x1107   : > { %v966_v40 = vmul.f32 %v2259_v36, %v915_v23  ;;  %v999_v34 = vmul.f32 %v2265_v37, %v915_v23  ;;  %v1001_v45 = vmul.f32 %v2277_v44, %v915_v23  ;;  %v1036_v7 = vmul.f32 %v2271_v41, %v915_v23 }
0x1108   : > { %v930_v46 = vadd.f32 %v929_v30, %v926_v5  ;;  %v932_v43 = vadd.f32 %v931_v33, %v928_v6  ;;  %v965_v47 = vadd.f32 %v964_v38, %v961_v15  ;;  %v1034_v6 = vmul.f32 %v2240_v1, %v915_v23 }
0x1109   : > { %v967_v48 = vadd.f32 %v966_v40, %v963_v8  ;;  %v1000_v49 = vadd.f32 %v999_v34, %v995_v25  ;;  %v1002_v50 = vadd.f32 %v1001_v45, %v997_v42 }
0x110a   : > { %v933_v51 = vsel %vm398_vm1, %v930_v46, 0.0 }
0x110b   : > { %934 = vadd.xlane.f32.xlu2 %v933_v51 }
0x117e   : > { %v935_v52 = vpop.xlane.xlu2 %934 }
0x117f   : > { %v936_v22 = vsub.f32 %v935_v52, %v930_v46 }
0x1181   : > { %v937_v53 = vadd.f32 %v936_v22, %v2060_v39 }
0x1183   : > { %v938_v54 = vadd.f32 %v937_v53, %v932_v43 }
0x1185   : > { %v939_v55 = vmul.f32 1.442695, %v938_v54 }
0x1187   : > { %1779 = vpow2.f32 %v939_v55 }
0x118d   : > { %v1780_v57 = vpop.eup %1779 }
0x118e   : > { %v941_v58 = vsel %vm398_vm1, %v1780_v57, 0.0 }
0x118f   : > { %942 = vadd.xlane.f32.xlu0 %v941_v58 }
0x1202   : > { %v943_v32 = vpop.xlane.xlu0 %942 }
0x1203   : > { %v944_v56 = vrot.slane %v943_v32, 4 }
0x1205   : > { %v945_v59 = vadd.f32 %v944_v56, %v943_v32 }
0x1207   : > { %v946_v60 = vrot.slane %v945_v59, 2 }
0x1209   : > { %v947_v63 = vadd.f32 %v946_v60, %v945_v59 }
0x120b   : > { %v948_v2 = vrot.slane %v947_v63, 1 }
0x120d   : > { %v949_v3 = vadd.f32 %v948_v2, %v947_v63 }
0x120f   : > { %1690 = vpush %v949_v3 }
0x1240   : > { %s1691_s29 = spop %1690 }
0x1241   : > { %v951_v62 = vstv %s1691_s29 }
0x1242   : > { %v952_v4 = vmul.f32 %v951_v62, %v2064_v61 }
0x1244   : > { %vm953_vm2 = vcmp.gt.f32.partialorder %v1780_v57, %v952_v4 }
0x1245   : > { %v954_v5 = vsel %vm953_vm2, 1.0, %v1875_v0 }
0x1246   : > { %v955_v15 = vadd.f32 %v954_v5, %v916_v26  ;;  %v968_v8 = vmul.f32 %v2246_v24, %v954_v5  ;;  %v970_v9 = vmul.f32 %v2290_v18, %v954_v5  ;;  %v1003_v10 = vmul.f32 %v2253_v35, %v954_v5 }
0x1247   : > { %v1005_v17 = vmul.f32 %v2259_v36, %v954_v5  ;;  %v1038_v31 = vmul.f32 %v2265_v37, %v954_v5  ;;  %v1040_v16 = vmul.f32 %v2277_v44, %v954_v5  ;;  %v1075_v55 = vmul.f32 %v2271_v41, %v954_v5 }
0x1248   : > { %v969_v27 = vadd.f32 %v968_v8, %v965_v47  ;;  %v971_v28 = vadd.f32 %v970_v9, %v967_v48  ;;  %v1004_v11 = vadd.f32 %v1003_v10, %v1000_v49  ;;  %v1073_v49 = vmul.f32 %v2240_v1, %v954_v5 }
0x1249   : > { %v1006_v13 = vadd.f32 %v1005_v17, %v1002_v50  ;;  %v1039_v19 = vadd.f32 %v1038_v31, %v1034_v6  ;;  %v1041_v29 = vadd.f32 %v1040_v16, %v1036_v7 }
0x124a   : > { %v972_v14 = vsel %vm398_vm1, %v969_v27, 0.0 }
0x124b   : > { %973 = vadd.xlane.f32.xlu1 %v972_v14 }
0x12be   : > { %v974_v20 = vpop.xlane.xlu1 %973 }
0x12bf   : > { %v975_v12 = vsub.f32 %v974_v20, %v969_v27 }
0x12c1   : > { %v976_v21 = vadd.f32 %v975_v12, %v2060_v39 }
0x12c3   : > { %v977_v25 = vadd.f32 %v976_v21, %v971_v28 }
0x12c5   : > { %v978_v26 = vmul.f32 1.442695, %v977_v25 }
0x12c7   : > { %1781 = vpow2.f32 %v978_v26 }
0x12cd   : > { %v1782_v30 = vpop.eup %1781 }
0x12ce   : > { %v980_v23 = vsel %vm398_vm1, %v1782_v30, 0.0 }
0x12cf   : > { %981 = vadd.xlane.f32.xlu2 %v980_v23 }
0x1342   : > { %v982_v33 = vpop.xlane.xlu2 %981 }
0x1343   : > { %v983_v38 = vrot.slane %v982_v33, 4 }
0x1345   : > { %v984_v40 = vadd.f32 %v983_v38, %v982_v33 }
0x1347   : > { %v985_v34 = vrot.slane %v984_v40, 2 }
0x1349   : > { %v986_v42 = vadd.f32 %v985_v34, %v984_v40 }
0x134b   : > { %v987_v45 = vrot.slane %v986_v42, 1 }
0x134d   : > { %v988_v46 = vadd.f32 %v987_v45, %v986_v42 }
0x134f   : > { %1692 = vpush %v988_v46 }
0x1380   : > { %s1693_s7 = spop %1692 }
0x1381   : > { %v990_v43 = vstv %s1693_s7 }
0x1382   : > { %v991_v47 = vmul.f32 %v990_v43, %v2064_v61 }
0x1384   : > { %vm992_vm3 = vcmp.gt.f32.partialorder %v1782_v30, %v991_v47 }
0x1385   : > { %v993_v48 = vsel %vm992_vm3, 1.0, %v1875_v0 }
0x1386   : > { %v994_v50 = vadd.f32 %v993_v48, %v955_v15  ;;  %v1007_v51 = vmul.f32 %v2246_v24, %v993_v48  ;;  %v1009_v52 = vmul.f32 %v2290_v18, %v993_v48  ;;  %v1042_v22 = vmul.f32 %v2253_v35, %v993_v48 }
0x1387   : > { %v1044_v53 = vmul.f32 %v2259_v36, %v993_v48  ;;  %v1077_v54 = vmul.f32 %v2265_v37, %v993_v48  ;;  %v1079_v57 = vmul.f32 %v2277_v44, %v993_v48  ;;  %v1114_v26 = vmul.f32 %v2271_v41, %v993_v48 }
0x1388   : > { %v1008_v58 = vadd.f32 %v1007_v51, %v1004_v11  ;;  %v1010_v32 = vadd.f32 %v1009_v52, %v1006_v13  ;;  %v1043_v56 = vadd.f32 %v1042_v22, %v1039_v19  ;;  %v1112_v19 = vmul.f32 %v2240_v1, %v993_v48 }
0x1389   : > { %v1045_v59 = vadd.f32 %v1044_v53, %v1041_v29  ;;  %v1078_v60 = vadd.f32 %v1077_v54, %v1073_v49  ;;  %v1080_v63 = vadd.f32 %v1079_v57, %v1075_v55 }
0x138a   : > { %v1011_v2 = vsel %vm398_vm1, %v1008_v58, 0.0 }
0x138b   : > { %1012 = vadd.xlane.f32.xlu0 %v1011_v2 }
0x13fe   : > { %v1013_v3 = vpop.xlane.xlu0 %1012 }
0x13ff   : > { %v1014_v62 = vsub.f32 %v1013_v3, %v1008_v58 }
0x1401   : > { %v1015_v4 = vadd.f32 %v1014_v62, %v2060_v39 }
0x1403   : > { %v1016_v6 = vadd.f32 %v1015_v4, %v1010_v32 }
0x1405   : > { %v1017_v15 = vmul.f32 1.442695, %v1016_v6 }
0x1407   : > { %1783 = vpow2.f32 %v1017_v15 }
0x140d   : > { %v1784_v8 = vpop.eup %1783 }
0x140e   : > { %v1019_v5 = vsel %vm398_vm1, %v1784_v8, 0.0 }
0x140f   : > { %1020 = vadd.xlane.f32.xlu1 %v1019_v5 }
0x1482   : > { %v1021_v9 = vpop.xlane.xlu1 %1020 }
0x1483   : > { %v1022_v10 = vrot.slane %v1021_v9, 4 }
0x1485   : > { %v1023_v17 = vadd.f32 %v1022_v10, %v1021_v9 }
0x1487   : > { %v1024_v31 = vrot.slane %v1023_v17, 2 }
0x1489   : > { %v1025_v7 = vadd.f32 %v1024_v31, %v1023_v17 }
0x148b   : > { %v1026_v16 = vrot.slane %v1025_v7, 1 }
0x148d   : > { %v1027_v27 = vadd.f32 %v1026_v16, %v1025_v7 }
0x148f   : > { %1694 = vpush %v1027_v27 }
0x14c0   : > { %s1695_s8 = spop %1694 }
0x14c1   : > { %v1029_v28 = vstv %s1695_s8 }
0x14c2   : > { %v1030_v11 = vmul.f32 %v1029_v28, %v2064_v61 }
0x14c4   : > { %vm1031_vm4 = vcmp.gt.f32.partialorder %v1784_v8, %v1030_v11 }
0x14c5   : > { %v1032_v13 = vsel %vm1031_vm4, 1.0, %v1875_v0 }
0x14c6   : > { %v1033_v29 = vadd.f32 %v1032_v13, %v994_v50  ;;  %v1046_v14 = vmul.f32 %v2246_v24, %v1032_v13  ;;  %v1048_v20 = vmul.f32 %v2290_v18, %v1032_v13  ;;  %v1081_v12 = vmul.f32 %v2253_v35, %v1032_v13 }
0x14c7   : > { %v1083_v21 = vmul.f32 %v2259_v36, %v1032_v13  ;;  %v1116_v25 = vmul.f32 %v2265_v37, %v1032_v13  ;;  %v1118_v30 = vmul.f32 %v2277_v44, %v1032_v13  ;;  %v1153_v15 = vmul.f32 %v2271_v41, %v1032_v13 }
0x14c8   : > { %v1047_v23 = vadd.f32 %v1046_v14, %v1043_v56  ;;  %v1049_v33 = vadd.f32 %v1048_v20, %v1045_v59  ;;  %v1082_v38 = vadd.f32 %v1081_v12, %v1078_v60  ;;  %v1151_v60 = vmul.f32 %v2240_v1, %v1032_v13 }
0x14c9   : > { %v1084_v40 = vadd.f32 %v1083_v21, %v1080_v63  ;;  %v1117_v34 = vadd.f32 %v1116_v25, %v1112_v19  ;;  %v1119_v42 = vadd.f32 %v1118_v30, %v1114_v26 }
0x14ca   : > { %v1050_v45 = vsel %vm398_vm1, %v1047_v23, 0.0 }
0x14cb   : > { %1051 = vadd.xlane.f32.xlu2 %v1050_v45 }
0x153e   : > { %v1052_v46 = vpop.xlane.xlu2 %1051 }
0x153f   : > { %v1053_v43 = vsub.f32 %v1052_v46, %v1047_v23 }
0x1541   : > { %v1054_v47 = vadd.f32 %v1053_v43, %v2060_v39 }
0x1543   : > { %v1055_v49 = vadd.f32 %v1054_v47, %v1049_v33 }
0x1545   : > { %v1056_v50 = vmul.f32 1.442695, %v1055_v49 }
0x1547   : > { %1785 = vpow2.f32 %v1056_v50 }
0x154d   : > { %v1786_v51 = vpop.eup %1785 }
0x154e   : > { %v1058_v48 = vsel %vm398_vm1, %v1786_v51, 0.0 }
0x154f   : > { %1059 = vadd.xlane.f32.xlu0 %v1058_v48 }
0x15c2   : > { %v1060_v52 = vpop.xlane.xlu0 %1059 }
0x15c3   : > { %v1061_v22 = vrot.slane %v1060_v52, 4 }
0x15c5   : > { %v1062_v53 = vadd.f32 %v1061_v22, %v1060_v52 }
0x15c7   : > { %v1063_v54 = vrot.slane %v1062_v53, 2 }
0x15c9   : > { %v1064_v55 = vadd.f32 %v1063_v54, %v1062_v53 }
0x15cb   : > { %v1065_v57 = vrot.slane %v1064_v55, 1 }
0x15cd   : > { %v1066_v58 = vadd.f32 %v1065_v57, %v1064_v55 }
0x15cf   : > { %1696 = vpush %v1066_v58 }
0x1600   : > { %s1697_s9 = spop %1696 }
0x1601   : > { %v1068_v32 = vstv %s1697_s9 }
0x1602   : > { %v1069_v56 = vmul.f32 %v1068_v32, %v2064_v61 }
0x1604   : > { %vm1070_vm5 = vcmp.gt.f32.partialorder %v1786_v51, %v1069_v56 }
0x1605   : > { %v1071_v59 = vsel %vm1070_vm5, 1.0, %v1875_v0 }
0x1606   : > { %v1072_v63 = vadd.f32 %v1071_v59, %v1033_v29  ;;  %v1085_v2 = vmul.f32 %v2246_v24, %v1071_v59  ;;  %v1087_v3 = vmul.f32 %v2290_v18, %v1071_v59  ;;  %v1120_v62 = vmul.f32 %v2253_v35, %v1071_v59 }
0x1607   : > { %v1122_v4 = vmul.f32 %v2259_v36, %v1071_v59  ;;  %v1155_v6 = vmul.f32 %v2265_v37, %v1071_v59  ;;  %v1157_v8 = vmul.f32 %v2277_v44, %v1071_v59  ;;  %v1192_v50 = vmul.f32 %v2271_v41, %v1071_v59 }
0x1608   : > { %v1086_v5 = vadd.f32 %v1085_v2, %v1082_v38  ;;  %v1088_v9 = vadd.f32 %v1087_v3, %v1084_v40  ;;  %v1121_v10 = vadd.f32 %v1120_v62, %v1117_v34  ;;  %v1190_v34 = vmul.f32 %v2240_v1, %v1071_v59 }
0x1609   : > { %v1123_v17 = vadd.f32 %v1122_v4, %v1119_v42  ;;  %v1156_v31 = vadd.f32 %v1155_v6, %v1151_v60  ;;  %v1158_v7 = vadd.f32 %v1157_v8, %v1153_v15 }
0x160a   : > { %v1089_v16 = vsel %vm398_vm1, %v1086_v5, 0.0 }
0x160b   : > { %1090 = vadd.xlane.f32.xlu1 %v1089_v16 }
0x167e   : > { %v1091_v27 = vpop.xlane.xlu1 %1090 }
0x167f   : > { %v1092_v28 = vsub.f32 %v1091_v27, %v1086_v5 }
0x1681   : > { %v1093_v11 = vadd.f32 %v1092_v28, %v2060_v39 }
0x1683   : > { %v1094_v19 = vadd.f32 %v1093_v11, %v1088_v9 }
0x1685   : > { %v1095_v29 = vmul.f32 1.442695, %v1094_v19 }
0x1687   : > { %1787 = vpow2.f32 %v1095_v29 }
0x168d   : > { %v1788_v14 = vpop.eup %1787 }
0x168e   : > { %v1097_v13 = vsel %vm398_vm1, %v1788_v14, 0.0 }
0x168f   : > { %1098 = vadd.xlane.f32.xlu2 %v1097_v13 }
0x1702   : > { %v1099_v20 = vpop.xlane.xlu2 %1098 }
0x1703   : > { %v1100_v12 = vrot.slane %v1099_v20, 4 }
0x1705   : > { %v1101_v21 = vadd.f32 %v1100_v12, %v1099_v20 }
0x1707   : > { %v1102_v25 = vrot.slane %v1101_v21, 2 }
0x1709   : > { %v1103_v26 = vadd.f32 %v1102_v25, %v1101_v21 }
0x170b   : > { %v1104_v30 = vrot.slane %v1103_v26, 1 }
0x170d   : > { %v1105_v23 = vadd.f32 %v1104_v30, %v1103_v26 }
0x170f   : > { %1698 = vpush %v1105_v23 }
0x1740   : > { %s1699_s10 = spop %1698 }
0x1741   : > { %v1107_v33 = vstv %s1699_s10 }
0x1742   : > { %v1108_v38 = vmul.f32 %v1107_v33, %v2064_v61 }
0x1744   : > { %vm1109_vm6 = vcmp.gt.f32.partialorder %v1788_v14, %v1108_v38 }
0x1745   : > { %v1110_v40 = vsel %vm1109_vm6, 1.0, %v1875_v0 }
0x1746   : > { %v1111_v42 = vadd.f32 %v1110_v40, %v1072_v63  ;;  %v1124_v45 = vmul.f32 %v2246_v24, %v1110_v40  ;;  %v1126_v46 = vmul.f32 %v2290_v18, %v1110_v40  ;;  %v1159_v43 = vmul.f32 %v2253_v35, %v1110_v40 }
0x1747   : > { %v1161_v47 = vmul.f32 %v2259_v36, %v1110_v40  ;;  %v1194_v49 = vmul.f32 %v2265_v37, %v1110_v40  ;;  %v1196_v51 = vmul.f32 %v2277_v44, %v1110_v40  ;;  %v1231_v29 = vmul.f32 %v2271_v41, %v1110_v40 }
0x1748   : > { %v1125_v48 = vadd.f32 %v1124_v45, %v1121_v10  ;;  %v1127_v52 = vadd.f32 %v1126_v46, %v1123_v17  ;;  %v1160_v22 = vadd.f32 %v1159_v43, %v1156_v31  ;;  %v1229_v31 = vmul.f32 %v2240_v1, %v1110_v40 }
0x1749   : > { %v1162_v53 = vadd.f32 %v1161_v47, %v1158_v7  ;;  %v1195_v54 = vadd.f32 %v1194_v49, %v1190_v34  ;;  %v1197_v55 = vadd.f32 %v1196_v51, %v1192_v50 }
0x174a   : > { %v1128_v57 = vsel %vm398_vm1, %v1125_v48, 0.0 }
0x174b   : > { %1129 = vadd.xlane.f32.xlu0 %v1128_v57 }
0x17be   : > { %v1130_v58 = vpop.xlane.xlu0 %1129 }
0x17bf   : > { %v1131_v32 = vsub.f32 %v1130_v58, %v1125_v48 }
0x17c1   : > { %v1132_v56 = vadd.f32 %v1131_v32, %v2060_v39 }
0x17c3   : > { %v1133_v60 = vadd.f32 %v1132_v56, %v1127_v52 }
0x17c5   : > { %v1134_v63 = vmul.f32 1.442695, %v1133_v60 }
0x17c7   : > { %1789 = vpow2.f32 %v1134_v63 }
0x17cd   : > { %v1790_v2 = vpop.eup %1789 }
0x17ce   : > { %v1136_v59 = vsel %vm398_vm1, %v1790_v2, 0.0 }
0x17cf   : > { %1137 = vadd.xlane.f32.xlu1 %v1136_v59 }
0x1842   : > { %v1138_v3 = vpop.xlane.xlu1 %1137 }
0x1843   : > { %v1139_v62 = vrot.slane %v1138_v3, 4 }
0x1845   : > { %v1140_v4 = vadd.f32 %v1139_v62, %v1138_v3 }
0x1847   : > { %v1141_v6 = vrot.slane %v1140_v4, 2 }
0x1849   : > { %v1142_v15 = vadd.f32 %v1141_v6, %v1140_v4 }
0x184b   : > { %v1143_v8 = vrot.slane %v1142_v15, 1 }
0x184d   : > { %v1144_v5 = vadd.f32 %v1143_v8, %v1142_v15 }
0x184f   : > { %1700 = vpush %v1144_v5 }
0x1880   : > { %s1701_s11 = spop %1700 }
0x1881   : > { %v1146_v9 = vstv %s1701_s11 }
0x1882   : > { %v1147_v10 = vmul.f32 %v1146_v9, %v2064_v61 }
0x1884   : > { %vm1148_vm7 = vcmp.gt.f32.partialorder %v1790_v2, %v1147_v10 }
0x1885   : > { %v1149_v17 = vsel %vm1148_vm7, 1.0, %v1875_v0 }
0x1886   : > { %v1150_v7 = vadd.f32 %v1149_v17, %v1111_v42  ;;  %v1163_v16 = vmul.f32 %v2246_v24, %v1149_v17  ;;  %v1165_v27 = vmul.f32 %v2290_v18, %v1149_v17  ;;  %v1198_v28 = vmul.f32 %v2253_v35, %v1149_v17 }
0x1887   : > { %v1200_v11 = vmul.f32 %v2259_v36, %v1149_v17  ;;  %v1233_v19 = vmul.f32 %v2265_v37, %v1149_v17  ;;  %v1235_v14 = vmul.f32 %v2277_v44, %v1149_v17  ;;  %v1268_v32 = vmul.f32 %v2240_v1, %v1149_v17 }
0x1888   : > { %v1164_v13 = vadd.f32 %v1163_v16, %v1160_v22  ;;  %v1166_v20 = vadd.f32 %v1165_v27, %v1162_v53  ;;  %v1199_v12 = vadd.f32 %v1198_v28, %v1195_v54  ;;  %v1270_v60 = vmul.f32 %v2271_v41, %v1149_v17 }
0x1889   : > { %v1201_v21 = vadd.f32 %v1200_v11, %v1197_v55  ;;  %v1234_v25 = vadd.f32 %v1233_v19, %v1229_v31  ;;  %v1236_v26 = vadd.f32 %v1235_v14, %v1231_v29 }
0x188a   : > { %v1167_v30 = vsel %vm398_vm1, %v1164_v13, 0.0 }
0x188b   : > { %1168 = vadd.xlane.f32.xlu2 %v1167_v30 }
0x18fe   : > { %v1169_v23 = vpop.xlane.xlu2 %1168 }
0x18ff   : > { %v1170_v33 = vsub.f32 %v1169_v23, %v1164_v13 }
0x1901   : > { %v1171_v38 = vadd.f32 %v1170_v33, %v2060_v39 }
0x1903   : > { %v1172_v34 = vadd.f32 %v1171_v38, %v1166_v20 }
0x1905   : > { %v1173_v42 = vmul.f32 1.442695, %v1172_v34 }
0x1907   : > { %1791 = vpow2.f32 %v1173_v42 }
0x190d   : > { %v1792_v45 = vpop.eup %1791 }
0x190e   : > { %v1175_v40 = vsel %vm398_vm1, %v1792_v45, 0.0 }
0x190f   : > { %1176 = vadd.xlane.f32.xlu0 %v1175_v40 }
0x1982   : > { %v1177_v46 = vpop.xlane.xlu0 %1176 }
0x1983   : > { %v1178_v43 = vrot.slane %v1177_v46, 4 }
0x1985   : > { %v1179_v47 = vadd.f32 %v1178_v43, %v1177_v46 }
0x1987   : > { %v1180_v49 = vrot.slane %v1179_v47, 2 }
0x1989   : > { %v1181_v50 = vadd.f32 %v1180_v49, %v1179_v47 }
0x198b   : > { %v1182_v51 = vrot.slane %v1181_v50, 1 }
0x198d   : > { %v1183_v48 = vadd.f32 %v1182_v51, %v1181_v50 }
0x198f   : > { %1702 = vpush %v1183_v48 }
0x19c0   : > { %s1703_s12 = spop %1702 }
0x19c1   : > { %v1185_v52 = vstv %s1703_s12 }
0x19c2   : > { %v1186_v22 = vmul.f32 %v1185_v52, %v2064_v61 }
0x19c4   : > { %vm1187_vm8 = vcmp.gt.f32.partialorder %v1792_v45, %v1186_v22 }
0x19c5   : > { %v1188_v53 = vsel %vm1187_vm8, 1.0, %v1875_v0 }
0x19c6   : > { %v1202_v54 = vmul.f32 %v2246_v24, %v1188_v53  ;;  %v1204_v55 = vmul.f32 %v2290_v18, %v1188_v53  ;;  %v1237_v57 = vmul.f32 %v2253_v35, %v1188_v53  ;;  %v1239_v58 = vmul.f32 %v2259_v36, %v1188_v53 }
0x19c7   : > { %v1272_v56 = vmul.f32 %v2265_v37, %v1188_v53  ;;  %v1274_v63 = vmul.f32 %v2277_v44, %v1188_v53  ;;  %v1189_v15 = vadd.f32 %v1188_v53, %v1150_v7  ;;  %v1307_v33 = vmul.f32 %v2240_v1, %v1188_v53 }
0x19c8   : > { %v1203_v2 = vadd.f32 %v1202_v54, %v1199_v12  ;;  %v1205_v59 = vadd.f32 %v1204_v55, %v1201_v21  ;;  %v1238_v3 = vadd.f32 %v1237_v57, %v1234_v25  ;;  %v1240_v62 = vadd.f32 %v1239_v58, %v1236_v26 }
0x19c9   : > { %v1273_v4 = vadd.f32 %v1272_v56, %v1268_v32  ;;  %v1275_v6 = vadd.f32 %v1274_v63, %v1270_v60  ;;  %v1309_v34 = vmul.f32 %v2271_v41, %v1188_v53 }
0x19ca   : > { %v1206_v8 = vsel %vm398_vm1, %v1203_v2, 0.0 }
0x19cb   : > { %1207 = vadd.xlane.f32.xlu1 %v1206_v8 }
0x1a3e   : > { %v1208_v5 = vpop.xlane.xlu1 %1207 }
0x1a3f   : > { %v1209_v9 = vsub.f32 %v1208_v5, %v1203_v2 }
0x1a41   : > { %v1210_v10 = vadd.f32 %v1209_v9, %v2060_v39 }
0x1a43   : > { %v1211_v31 = vadd.f32 %v1210_v10, %v1205_v59 }
0x1a45   : > { %v1212_v16 = vmul.f32 1.442695, %v1211_v31 }
0x1a47   : > { %1793 = vpow2.f32 %v1212_v16 }
0x1a4d   : > { %v1794_v17 = vpop.eup %1793 }
0x1a4e   : > { %v1214_v27 = vsel %vm398_vm1, %v1794_v17, 0.0 }
0x1a4f   : > { %1215 = vadd.xlane.f32.xlu2 %v1214_v27 }
0x1ac2   : > { %v1216_v28 = vpop.xlane.xlu2 %1215 }
0x1ac3   : > { %v1217_v11 = vrot.slane %v1216_v28, 4 }
0x1ac5   : > { %v1218_v19 = vadd.f32 %v1217_v11, %v1216_v28 }
0x1ac7   : > { %v1219_v29 = vrot.slane %v1218_v19, 2 }
0x1ac9   : > { %v1220_v14 = vadd.f32 %v1219_v29, %v1218_v19 }
0x1acb   : > { %v1221_v7 = vrot.slane %v1220_v14, 1 }
0x1acd   : > { %v1222_v13 = vadd.f32 %v1221_v7, %v1220_v14 }
0x1acf   : > { %1704 = vpush %v1222_v13 }
0x1b00   : > { %s1705_s13 = spop %1704 }
0x1b01   : > { %v1224_v20 = vstv %s1705_s13 }
0x1b02   : > { %v1225_v12 = vmul.f32 %v1224_v20, %v2064_v61 }
0x1b04   : > { %vm1226_vm9 = vcmp.gt.f32.partialorder %v1794_v17, %v1225_v12 }
0x1b05   : > { %v1227_v21 = vsel %vm1226_vm9, 1.0, %v1875_v0 }
0x1b06   : > { %v1241_v25 = vmul.f32 %v2246_v24, %v1227_v21  ;;  %v1243_v26 = vmul.f32 %v2290_v18, %v1227_v21  ;;  %v1276_v30 = vmul.f32 %v2253_v35, %v1227_v21  ;;  %v1278_v23 = vmul.f32 %v2259_v36, %v1227_v21 }
0x1b07   : > { %v1311_v38 = vmul.f32 %v2265_v37, %v1227_v21  ;;  %v1313_v42 = vmul.f32 %v2277_v44, %v1227_v21  ;;  %v1228_v50 = vadd.f32 %v1227_v21, %v1189_v15  ;;  %v1346_v9 = vmul.f32 %v2240_v1, %v1227_v21 }
0x1b08   : > { %v1242_v45 = vadd.f32 %v1241_v25, %v1238_v3  ;;  %v1244_v40 = vadd.f32 %v1243_v26, %v1240_v62  ;;  %v1277_v46 = vadd.f32 %v1276_v30, %v1273_v4  ;;  %v1279_v43 = vadd.f32 %v1278_v23, %v1275_v6 }
0x1b09   : > { %v1312_v47 = vadd.f32 %v1311_v38, %v1307_v33  ;;  %v1314_v49 = vadd.f32 %v1313_v42, %v1309_v34  ;;  %v1348_v31 = vmul.f32 %v2271_v41, %v1227_v21 }
0x1b0a   : > { %v1245_v51 = vsel %vm398_vm1, %v1242_v45, 0.0 }
0x1b0b   : > { %1246 = vadd.xlane.f32.xlu0 %v1245_v51 }
0x1b7e   : > { %v1247_v48 = vpop.xlane.xlu0 %1246 }
0x1b7f   : > { %v1248_v52 = vsub.f32 %v1247_v48, %v1242_v45 }
0x1b81   : > { %v1249_v22 = vadd.f32 %v1248_v52, %v2060_v39 }
0x1b83   : > { %v1250_v54 = vadd.f32 %v1249_v22, %v1244_v40 }
0x1b85   : > { %v1251_v55 = vmul.f32 1.442695, %v1250_v54 }
0x1b87   : > { %1795 = vpow2.f32 %v1251_v55 }
0x1b8d   : > { %v1796_v53 = vpop.eup %1795 }
0x1b8e   : > { %v1253_v57 = vsel %vm398_vm1, %v1796_v53, 0.0 }
0x1b8f   : > { %1254 = vadd.xlane.f32.xlu1 %v1253_v57 }
0x1c02   : > { %v1255_v58 = vpop.xlane.xlu1 %1254 }
0x1c03   : > { %v1256_v32 = vrot.slane %v1255_v58, 4 }
0x1c05   : > { %v1257_v56 = vadd.f32 %v1256_v32, %v1255_v58 }
0x1c07   : > { %v1258_v60 = vrot.slane %v1257_v56, 2 }
0x1c09   : > { %v1259_v63 = vadd.f32 %v1258_v60, %v1257_v56 }
0x1c0b   : > { %v1260_v2 = vrot.slane %v1259_v63, 1 }
0x1c0d   : > { %v1261_v59 = vadd.f32 %v1260_v2, %v1259_v63 }
0x1c0f   : > { %1706 = vpush %v1261_v59 }
0x1c40   : > { %s1707_s14 = spop %1706 }
0x1c41   : > { %v1263_v3 = vstv %s1707_s14 }
0x1c42   : > { %v1264_v62 = vmul.f32 %v1263_v3, %v2064_v61 }
0x1c44   : > { %vm1265_vm10 = vcmp.gt.f32.partialorder %v1796_v53, %v1264_v62 }
0x1c45   : > { %v1266_v4 = vsel %vm1265_vm10, 1.0, %v1875_v0 }
0x1c46   : > { %v1280_v6 = vmul.f32 %v2246_v24, %v1266_v4  ;;  %v1282_v15 = vmul.f32 %v2290_v18, %v1266_v4  ;;  %v1315_v8 = vmul.f32 %v2253_v35, %v1266_v4  ;;  %v1317_v5 = vmul.f32 %v2259_v36, %v1266_v4 }
0x1c47   : > { %v1350_v10 = vmul.f32 %v2265_v37, %v1266_v4  ;;  %v1352_v16 = vmul.f32 %v2277_v44, %v1266_v4  ;;  %v1267_v14 = vadd.f32 %v1266_v4, %v1228_v50  ;;  %v1385_v52 = vmul.f32 %v2240_v1, %v1266_v4 }
0x1c48   : > { %v1281_v17 = vadd.f32 %v1280_v6, %v1277_v46  ;;  %v1283_v27 = vadd.f32 %v1282_v15, %v1279_v43  ;;  %v1316_v28 = vadd.f32 %v1315_v8, %v1312_v47  ;;  %v1318_v11 = vadd.f32 %v1317_v5, %v1314_v49 }
0x1c49   : > { %v1351_v19 = vadd.f32 %v1350_v10, %v1346_v9  ;;  %v1353_v29 = vadd.f32 %v1352_v16, %v1348_v31  ;;  %v1387_v54 = vmul.f32 %v2271_v41, %v1266_v4 }
0x1c4a   : > { %v1284_v7 = vsel %vm398_vm1, %v1281_v17, 0.0 }
0x1c4b   : > { %1285 = vadd.xlane.f32.xlu2 %v1284_v7 }
0x1cbe   : > { %v1286_v13 = vpop.xlane.xlu2 %1285 }
0x1cbf   : > { %v1287_v20 = vsub.f32 %v1286_v13, %v1281_v17 }
0x1cc1   : > { %v1288_v12 = vadd.f32 %v1287_v20, %v2060_v39 }
0x1cc3   : > { %v1289_v25 = vadd.f32 %v1288_v12, %v1283_v27 }
0x1cc5   : > { %v1290_v26 = vmul.f32 1.442695, %v1289_v25 }
0x1cc7   : > { %1797 = vpow2.f32 %v1290_v26 }
0x1ccd   : > { %v1798_v21 = vpop.eup %1797 }
0x1cce   : > { %v1292_v30 = vsel %vm398_vm1, %v1798_v21, 0.0 }
0x1ccf   : > { %1293 = vadd.xlane.f32.xlu0 %v1292_v30 }
0x1d42   : > { %v1294_v23 = vpop.xlane.xlu0 %1293 }
0x1d43   : > { %v1295_v33 = vrot.slane %v1294_v23, 4 }
0x1d45   : > { %v1296_v38 = vadd.f32 %v1295_v33, %v1294_v23 }
0x1d47   : > { %v1297_v34 = vrot.slane %v1296_v38, 2 }
0x1d49   : > { %v1298_v42 = vadd.f32 %v1297_v34, %v1296_v38 }
0x1d4b   : > { %v1299_v45 = vrot.slane %v1298_v42, 1 }
0x1d4d   : > { %v1300_v40 = vadd.f32 %v1299_v45, %v1298_v42 }
0x1d4f   : > { %1708 = vpush %v1300_v40 }
0x1d80   : > { %s1709_s15 = spop %1708 }
0x1d81   : > { %v1302_v46 = vstv %s1709_s15 }
0x1d82   : > { %v1303_v43 = vmul.f32 %v1302_v46, %v2064_v61 }
0x1d84   : > { %vm1304_vm11 = vcmp.gt.f32.partialorder %v1798_v21, %v1303_v43 }
0x1d85   : > { %v1305_v47 = vsel %vm1304_vm11, 1.0, %v1875_v0 }
0x1d86   : > { %v1319_v49 = vmul.f32 %v2246_v24, %v1305_v47  ;;  %v1321_v50 = vmul.f32 %v2290_v18, %v1305_v47  ;;  %v1354_v51 = vmul.f32 %v2253_v35, %v1305_v47  ;;  %v1356_v48 = vmul.f32 %v2259_v36, %v1305_v47 }
0x1d87   : > { %v1389_v22 = vmul.f32 %v2265_v37, %v1305_v47  ;;  %v1391_v55 = vmul.f32 %v2277_v44, %v1305_v47  ;;  %v1306_v63 = vadd.f32 %v1305_v47, %v1267_v14  ;;  %v1424_v20 = vmul.f32 %v2240_v1, %v1305_v47 }
0x1d88   : > { %v1320_v53 = vadd.f32 %v1319_v49, %v1316_v28  ;;  %v1322_v57 = vadd.f32 %v1321_v50, %v1318_v11  ;;  %v1355_v58 = vadd.f32 %v1354_v51, %v1351_v19  ;;  %v1357_v32 = vadd.f32 %v1356_v48, %v1353_v29 }
0x1d89   : > { %v1390_v56 = vadd.f32 %v1389_v22, %v1385_v52  ;;  %v1392_v60 = vadd.f32 %v1391_v55, %v1387_v54  ;;  %v1426_v25 = vmul.f32 %v2271_v41, %v1305_v47 }
0x1d8a   : > { %v1323_v2 = vsel %vm398_vm1, %v1320_v53, 0.0 }
0x1d8b   : > { %1324 = vadd.xlane.f32.xlu1 %v1323_v2 }
0x1dfe   : > { %v1325_v59 = vpop.xlane.xlu1 %1324 }
0x1dff   : > { %v1326_v3 = vsub.f32 %v1325_v59, %v1320_v53 }
0x1e01   : > { %v1327_v62 = vadd.f32 %v1326_v3, %v2060_v39 }
0x1e03   : > { %v1328_v6 = vadd.f32 %v1327_v62, %v1322_v57 }
0x1e05   : > { %v1329_v15 = vmul.f32 1.442695, %v1328_v6 }
0x1e07   : > { %1799 = vpow2.f32 %v1329_v15 }
0x1e0d   : > { %v1800_v4 = vpop.eup %1799 }
0x1e0e   : > { %v1331_v8 = vsel %vm398_vm1, %v1800_v4, 0.0 }
0x1e0f   : > { %1332 = vadd.xlane.f32.xlu2 %v1331_v8 }
0x1e82   : > { %v1333_v5 = vpop.xlane.xlu2 %1332 }
0x1e83   : > { %v1334_v9 = vrot.slane %v1333_v5, 4 }
0x1e85   : > { %v1335_v10 = vadd.f32 %v1334_v9, %v1333_v5 }
0x1e87   : > { %v1336_v31 = vrot.slane %v1335_v10, 2 }
0x1e89   : > { %v1337_v16 = vadd.f32 %v1336_v31, %v1335_v10 }
0x1e8b   : > { %v1338_v17 = vrot.slane %v1337_v16, 1 }
0x1e8d   : > { %v1339_v27 = vadd.f32 %v1338_v17, %v1337_v16 }
0x1e8f   : > { %1710 = vpush %v1339_v27 }
0x1ec0   : > { %s1711_s16 = spop %1710 }
0x1ec1   : > { %v1341_v28 = vstv %s1711_s16 }
0x1ec2   : > { %v1342_v11 = vmul.f32 %v1341_v28, %v2064_v61 }
0x1ec4   : > { %vm1343_vm12 = vcmp.gt.f32.partialorder %v1800_v4, %v1342_v11 }
0x1ec5   : > { %v1344_v19 = vsel %vm1343_vm12, 1.0, %v1875_v0 }
0x1ec6   : > { %v1358_v29 = vmul.f32 %v2246_v24, %v1344_v19  ;;  %v1360_v14 = vmul.f32 %v2290_v18, %v1344_v19  ;;  %v1393_v7 = vmul.f32 %v2253_v35, %v1344_v19  ;;  %v1395_v13 = vmul.f32 %v2259_v36, %v1344_v19 }
0x1ec7   : > { %v1428_v12 = vmul.f32 %v2265_v37, %v1344_v19  ;;  %v1430_v26 = vmul.f32 %v2277_v44, %v1344_v19  ;;  %v1345_v42 = vadd.f32 %v1344_v19, %v1306_v63  ;;  %v1463_v3 = vmul.f32 %v2240_v1, %v1344_v19 }
0x1ec8   : > { %v1359_v21 = vadd.f32 %v1358_v29, %v1355_v58  ;;  %v1361_v30 = vadd.f32 %v1360_v14, %v1357_v32  ;;  %v1394_v23 = vadd.f32 %v1393_v7, %v1390_v56  ;;  %v1396_v33 = vadd.f32 %v1395_v13, %v1392_v60 }
0x1ec9   : > { %v1429_v38 = vadd.f32 %v1428_v12, %v1424_v20  ;;  %v1431_v34 = vadd.f32 %v1430_v26, %v1426_v25  ;;  %v1465_v6 = vmul.f32 %v2271_v41, %v1344_v19 }
0x1eca   : > { %v1362_v45 = vsel %vm398_vm1, %v1359_v21, 0.0 }
0x1ecb   : > { %1363 = vadd.xlane.f32.xlu0 %v1362_v45 }
0x1f3e   : > { %v1364_v40 = vpop.xlane.xlu0 %1363 }
0x1f3f   : > { %v1365_v46 = vsub.f32 %v1364_v40, %v1359_v21 }
0x1f41   : > { %v1366_v43 = vadd.f32 %v1365_v46, %v2060_v39 }
0x1f43   : > { %v1367_v49 = vadd.f32 %v1366_v43, %v1361_v30 }
0x1f45   : > { %v1368_v50 = vmul.f32 1.442695, %v1367_v49 }
0x1f47   : > { %1801 = vpow2.f32 %v1368_v50 }
0x1f4d   : > { %v1802_v47 = vpop.eup %1801 }
0x1f4e   : > { %v1370_v51 = vsel %vm398_vm1, %v1802_v47, 0.0 }
0x1f4f   : > { %1371 = vadd.xlane.f32.xlu1 %v1370_v51 }
0x1fc2   : > { %v1372_v48 = vpop.xlane.xlu1 %1371 }
0x1fc3   : > { %v1373_v52 = vrot.slane %v1372_v48, 4 }
0x1fc5   : > { %v1374_v22 = vadd.f32 %v1373_v52, %v1372_v48 }
0x1fc7   : > { %v1375_v54 = vrot.slane %v1374_v22, 2 }
0x1fc9   : > { %v1376_v55 = vadd.f32 %v1375_v54, %v1374_v22 }
0x1fcb   : > { %v1377_v53 = vrot.slane %v1376_v55, 1 }
0x1fcd   : > { %v1378_v57 = vadd.f32 %v1377_v53, %v1376_v55 }
0x1fcf   : > { %1712 = vpush %v1378_v57 }
0x2000   : > { %s1713_s17 = spop %1712 }
0x2001   : > { %v1380_v58 = vstv %s1713_s17 }
0x2002   : > { %v1381_v32 = vmul.f32 %v1380_v58, %v2064_v61 }
0x2004   : > { %vm1382_vm13 = vcmp.gt.f32.partialorder %v1802_v47, %v1381_v32 }
0x2005   : > { %v1383_v56 = vsel %vm1382_vm13, 1.0, %v1875_v0 }
0x2006   : > { %v1397_v60 = vmul.f32 %v2246_v24, %v1383_v56  ;;  %v1399_v63 = vmul.f32 %v2290_v18, %v1383_v56  ;;  %v1432_v2 = vmul.f32 %v2253_v35, %v1383_v56  ;;  %v1434_v59 = vmul.f32 %v2259_v36, %v1383_v56 }
0x2007   : > { %v1467_v62 = vmul.f32 %v2265_v37, %v1383_v56  ;;  %v1469_v15 = vmul.f32 %v2277_v44, %v1383_v56  ;;  %v1384_v16 = vadd.f32 %v1383_v56, %v1345_v42  ;;  %v1502_v46 = vmul.f32 %v2240_v1, %v1383_v56 }
0x2008   : > { %v1398_v4 = vadd.f32 %v1397_v60, %v1394_v23  ;;  %v1400_v8 = vadd.f32 %v1399_v63, %v1396_v33  ;;  %v1433_v5 = vadd.f32 %v1432_v2, %v1429_v38  ;;  %v1435_v9 = vadd.f32 %v1434_v59, %v1431_v34 }
0x2009   : > { %v1468_v10 = vadd.f32 %v1467_v62, %v1463_v3  ;;  %v1470_v31 = vadd.f32 %v1469_v15, %v1465_v6  ;;  %v1504_v49 = vmul.f32 %v2271_v41, %v1383_v56  ;;  %v1825_v6 = vld [vmem:[%s2515_s3] ss:$0 sm:$0xff] }
0x200a   : > { %v1401_v17 = vsel %vm398_vm1, %v1398_v4, 0.0 }
0x200b   : > { %1402 = vadd.xlane.f32.xlu2 %v1401_v17  ;;  %v1829_v17 = vld [vmem:[%s2515_s3 + $0x1] ss:$0 sm:$0xff] }
0x207e   : > { %v1403_v27 = vpop.xlane.xlu2 %1402 }
0x207f   : > { %v1404_v28 = vsub.f32 %v1403_v27, %v1398_v4  ;;  %v2465_v4 = vld [vmem:[%s2515_s3 + $0x3] ss:$0 sm:$0xff] }
0x2081   : > { %v1405_v11 = vadd.f32 %v1404_v28, %v2060_v39  ;;  %v1830_v28 = vld [vmem:[%s2516_s4] ss:$0 sm:$0xff] }
0x2083   : > { %v1406_v29 = vadd.f32 %v1405_v11, %v1400_v8  ;;  %v1831_v11 = vld [vmem:[%s2516_s4 + $0x1] ss:$0 sm:$0xff] }
0x2085   : > { %v1407_v14 = vmul.f32 1.442695, %v1406_v29 }
0x2087   : > { %1803 = vpow2.f32 %v1407_v14 }
0x208d   : > { %v1804_v19 = vpop.eup %1803 }
0x208e   : > { %v1409_v7 = vsel %vm398_vm1, %v1804_v19, 0.0 }
0x208f   : > { %1410 = vadd.xlane.f32.xlu0 %v1409_v7 }
0x2102   : > { %v1411_v13 = vpop.xlane.xlu0 %1410 }
0x2103   : > { %v1412_v20 = vrot.slane %v1411_v13, 4 }
0x2105   : > { %v1413_v12 = vadd.f32 %v1412_v20, %v1411_v13 }
0x2107   : > { %v1414_v25 = vrot.slane %v1413_v12, 2 }
0x2109   : > { %v1415_v26 = vadd.f32 %v1414_v25, %v1413_v12 }
0x210b   : > { %v1416_v21 = vrot.slane %v1415_v26, 1 }
0x210d   : > { %v1417_v30 = vadd.f32 %v1416_v21, %v1415_v26 }
0x210f   : > { %1714 = vpush %v1417_v30 }
0x2140   : > { %s1715_s20 = spop %1714 }
0x2141   : > { %v1419_v23 = vstv %s1715_s20 }
0x2142   : > { %v1420_v33 = vmul.f32 %v1419_v23, %v2064_v61 }
0x2144   : > { %vm1421_vm14 = vcmp.gt.f32.partialorder %v1804_v19, %v1420_v33 }
0x2145   : > { %v1422_v38 = vsel %vm1421_vm14, 1.0, %v1875_v0 }
0x2146   : > { %v1436_v34 = vmul.f32 %v2246_v24, %v1422_v38  ;;  %v1438_v42 = vmul.f32 %v2290_v18, %v1422_v38  ;;  %v1471_v45 = vmul.f32 %v2253_v35, %v1422_v38  ;;  %v1473_v40 = vmul.f32 %v2259_v36, %v1422_v38 }
0x2147   : > { %v1506_v43 = vmul.f32 %v2265_v37, %v1422_v38  ;;  %v1508_v50 = vmul.f32 %v2277_v44, %v1422_v38  ;;  %v1423_v54 = vadd.f32 %v1422_v38, %v1384_v16  ;;  %v1541_v15 = vmul.f32 %v1825_v6, %v1422_v38 }
0x2148   : > { %v1437_v47 = vadd.f32 %v1436_v34, %v1433_v5  ;;  %v1439_v51 = vadd.f32 %v1438_v42, %v1435_v9  ;;  %v1472_v48 = vadd.f32 %v1471_v45, %v1468_v10  ;;  %v1474_v52 = vadd.f32 %v1473_v40, %v1470_v31  ;;  %v1827_v9 = vld [vmem:[%s2515_s3 + $0x2] ss:$0 sm:$0xff] }
0x2149   : > { %v1507_v22 = vadd.f32 %v1506_v43, %v1502_v46  ;;  %v1509_v24 = vadd.f32 %v1508_v50, %v1504_v49  ;;  %v1828_v31 = vld [vmem:[%s2516_s4 + $0x2] ss:$0 sm:$0xff] }
0x214a   : > { %v1440_v55 = vsel %vm398_vm1, %v1437_v47, 0.0 }
0x214b   : > { %1441 = vadd.xlane.f32.xlu1 %v1440_v55 }
0x21be   : > { %v1442_v35 = vpop.xlane.xlu1 %1441 }
0x21bf   : > { %v1443_v36 = vsub.f32 %v1442_v35, %v1437_v47 }
0x21c1   : > { %v1444_v1 = vadd.f32 %v1443_v36, %v2060_v39 }
0x21c3   : > { %v1445_v53 = vadd.f32 %v1444_v1, %v1439_v51 }
0x21c5   : > { %v1446_v37 = vmul.f32 1.442695, %v1445_v53 }
0x21c7   : > { %1805 = vpow2.f32 %v1446_v37 }
0x21cd   : > { %v1806_v41 = vpop.eup %1805 }
0x21ce   : > { %v1448_v44 = vsel %vm398_vm1, %v1806_v41, 0.0 }
0x21cf   : > { %1449 = vadd.xlane.f32.xlu2 %v1448_v44 }
0x2242   : > { %v1450_v57 = vpop.xlane.xlu2 %1449 }
0x2243   : > { %v1451_v58 = vrot.slane %v1450_v57, 4 }
0x2245   : > { %v1452_v32 = vadd.f32 %v1451_v58, %v1450_v57 }
0x2247   : > { %v1453_v56 = vrot.slane %v1452_v32, 2 }
0x2249   : > { %v1454_v60 = vadd.f32 %v1453_v56, %v1452_v32 }
0x224b   : > { %v1455_v63 = vrot.slane %v1454_v60, 1 }
0x224d   : > { %v1456_v2 = vadd.f32 %v1455_v63, %v1454_v60 }
0x224f   : > { %1716 = vpush %v1456_v2 }
0x2280   : > { %s1717_s21 = spop %1716 }
0x2281   : > { %v1458_v59 = vstv %s1717_s21 }
0x2282   : > { %v1459_v3 = vmul.f32 %v1458_v59, %v2064_v61 }
0x2284   : > { %vm1460_vm15 = vcmp.gt.f32.partialorder %v1806_v41, %v1459_v3 }
0x2285   : > { %v1461_v62 = vsel %vm1460_vm15, 1.0, %v1875_v0 }
0x2286   : > { %v1475_v8 = vmul.f32 %v2465_v4, %v1461_v62  ;;  %v1477_v5 = vmul.f32 %v2290_v18, %v1461_v62  ;;  %v1510_v10 = vmul.f32 %v1827_v9, %v1461_v62  ;;  %v1512_v16 = vmul.f32 %v1828_v31, %v1461_v62 }
0x2287   : > { %v1545_v27 = vmul.f32 %v1829_v17, %v1461_v62  ;;  %v1543_v18 = vmul.f32 %v1830_v28, %v1422_v38  ;;  %v1547_v29 = vmul.f32 %v1831_v11, %v1461_v62  ;;  %v1462_v14 = vadd.f32 %v1461_v62, %v1423_v54 }
0x2288   : > { %v1476_v19 = vadd.f32 %v1475_v8, %v1472_v48  ;;  %v1478_v7 = vadd.f32 %v1477_v5, %v1474_v52  ;;  %v1511_v13 = vadd.f32 %v1510_v10, %v1507_v22  ;;  %v1513_v20 = vadd.f32 %v1512_v16, %v1509_v24  ;;  %v1832_v24 = vld [vmem:[%s2516_s4 + $0x3] ss:$0 sm:$0xff] }
0x2289   : > { %v1546_v12 = vadd.f32 %v1545_v27, %v1541_v15  ;;  %v1548_v25 = vadd.f32 %v1547_v29, %v1543_v18 }
0x228a   : > { %v1479_v26 = vsel %vm398_vm1, %v1476_v19, 0.0 }
0x228b   : > { %1480 = vadd.xlane.f32.xlu0 %v1479_v26 }
0x22fe   : > { %v1481_v21 = vpop.xlane.xlu0 %1480 }
0x22ff   : > { %v1482_v30 = vsub.f32 %v1481_v21, %v1476_v19 }
0x2301   : > { %v1483_v23 = vadd.f32 %v1482_v30, %v2060_v39 }
0x2303   : > { %v1484_v33 = vadd.f32 %v1483_v23, %v1478_v7 }
0x2305   : > { %v1485_v38 = vmul.f32 1.442695, %v1484_v33 }
0x2307   : > { %1807 = vpow2.f32 %v1485_v38 }
0x230d   : > { %v1808_v34 = vpop.eup %1807 }
0x230e   : > { %v1487_v42 = vsel %vm398_vm1, %v1808_v34, 0.0 }
0x230f   : > { %1488 = vadd.xlane.f32.xlu1 %v1487_v42 }
0x2382   : > { %v1489_v45 = vpop.xlane.xlu1 %1488 }
0x2383   : > { %v1490_v40 = vrot.slane %v1489_v45, 4 }
0x2385   : > { %v1491_v46 = vadd.f32 %v1490_v40, %v1489_v45 }
0x2387   : > { %v1492_v43 = vrot.slane %v1491_v46, 2 }
0x2389   : > { %v1493_v49 = vadd.f32 %v1492_v43, %v1491_v46 }
0x238b   : > { %v1494_v50 = vrot.slane %v1493_v49, 1 }
0x238d   : > { %v1495_v47 = vadd.f32 %v1494_v50, %v1493_v49 }
0x238f   : > { %1718 = vpush %v1495_v47 }
0x23c0   : > { %s1719_s11 = spop %1718 }
0x23c1   : > { %v1497_v51 = vstv %s1719_s11 }
0x23c2   : > { %v1498_v48 = vmul.f32 %v1497_v51, %v2064_v61 }
0x23c4   : > { %vm1499_vm0 = vcmp.gt.f32.partialorder %v1808_v34, %v1498_v48 }
0x23c5   : > { %v1500_v52 = vsel %vm1499_vm0, 1.0, %v1875_v0 }
0x23c6   : > { %v1514_v22 = vmul.f32 %v2465_v4, %v1500_v52  ;;  %v1516_v54 = vmul.f32 %v1832_v24, %v1500_v52  ;;  %v1549_v55 = vmul.f32 %v1827_v9, %v1500_v52  ;;  %v1551_v35 = vmul.f32 %v1828_v31, %v1500_v52 }
0x23c7   : > { %v1501_v36 = vadd.f32 %v1500_v52, %v1462_v14 }
0x23c8   : > { %v1515_v1 = vadd.f32 %v1514_v22, %v1511_v13  ;;  %v1517_v53 = vadd.f32 %v1516_v54, %v1513_v20  ;;  %v1550_v37 = vadd.f32 %v1549_v55, %v1546_v12  ;;  %v1552_v41 = vadd.f32 %v1551_v35, %v1548_v25 }
0x23ca   : > { %v1518_v44 = vsel %vm398_vm1, %v1515_v1, 0.0 }
0x23cb   : > { %1519 = vadd.xlane.f32.xlu2 %v1518_v44 }
0x243e   : > { %v1520_v57 = vpop.xlane.xlu2 %1519 }
0x243f   : > { %v1521_v58 = vsub.f32 %v1520_v57, %v1515_v1 }
0x2441   : > { %v1522_v32 = vadd.f32 %v1521_v58, %v2060_v39 }
0x2443   : > { %v1523_v56 = vadd.f32 %v1522_v32, %v1517_v53 }
0x2445   : > { %v1524_v60 = vmul.f32 1.442695, %v1523_v56 }
0x2447   : > { %1809 = vpow2.f32 %v1524_v60 }
0x244d   : > { %v1810_v63 = vpop.eup %1809 }
0x244e   : > { %v1526_v2 = vsel %vm398_vm1, %v1810_v63, 0.0 }
0x244f   : > { %1527 = vadd.xlane.f32.xlu0 %v1526_v2 }
0x24c2   : > { %v1528_v59 = vpop.xlane.xlu0 %1527 }
0x24c3   : > { %v1529_v3 = vrot.slane %v1528_v59, 4 }
0x24c5   : > { %v1530_v62 = vadd.f32 %v1529_v3, %v1528_v59 }
0x24c7   : > { %v1531_v6 = vrot.slane %v1530_v62, 2 }
0x24c9   : > { %v1532_v15 = vadd.f32 %v1531_v6, %v1530_v62 }
0x24cb   : > { %v1533_v8 = vrot.slane %v1532_v15, 1 }
0x24cd   : > { %v1534_v5 = vadd.f32 %v1533_v8, %v1532_v15 }
0x24cf   : > { %1720 = vpush %v1534_v5 }
0x2500   : > { %s1721_s14 = spop %1720 }
0x2501   : > { %v1536_v9 = vstv %s1721_s14 }
0x2502   : > { %v1537_v10 = vmul.f32 %v1536_v9, %v2064_v61 }
0x2504   : > { %vm1538_vm2 = vcmp.gt.f32.partialorder %v1810_v63, %v1537_v10 }
0x2505   : > { %v1539_v31 = vsel %vm1538_vm2, 1.0, %v1875_v0 }
0x2506   : > { %v1555_v16 = vmul.f32 %v1832_v24, %v1539_v31  ;;  %v1553_v17 = vmul.f32 %v2465_v4, %v1539_v31  ;;  %v1540_v27 = vadd.f32 %v1539_v31, %v1501_v36 }
0x2508   : > { %v1554_v28 = vadd.f32 %v1553_v17, %v1550_v37  ;;  %v1556_v18 = vadd.f32 %v1555_v16, %v1552_v41 }
0x250a   : > { %v1557_v11 = vsel %vm398_vm1, %v1554_v28, 0.0 }
0x250b   : > { %1558 = vadd.xlane.f32.xlu1 %v1557_v11 }
0x257e   : > { %v1559_v29 = vpop.xlane.xlu1 %1558 }
0x257f   : > { %v1560_v14 = vsub.f32 %v1559_v29, %v1554_v28 }
0x2581   : > { %v1561_v19 = vadd.f32 %v1560_v14, %v2060_v39 }
0x2583   : > { %v1562_v7 = vadd.f32 %v1561_v19, %v1556_v18 }
0x2585   : > { %v1563_v13 = vmul.f32 1.442695, %v1562_v7 }
0x2587   : > { %1811 = vpow2.f32 %v1563_v13 }
0x258d   : > { %v1812_v20 = vpop.eup %1811 }
0x258e   : > { %v1565_v12 = vsel %vm398_vm1, %v1812_v20, 0.0 }
0x258f   : > { %1566 = vadd.xlane.f32.xlu2 %v1565_v12 }
0x2602   : > { %v1567_v25 = vpop.xlane.xlu2 %1566 }
0x2603   : > { %v1568_v26 = vrot.slane %v1567_v25, 4 }
0x2605   : > { %v1569_v4 = vadd.f32 %v1568_v26, %v1567_v25 }
0x2607   : > { %v1570_v21 = vrot.slane %v1569_v4, 2 }
0x2609   : > { %v1571_v30 = vadd.f32 %v1570_v21, %v1569_v4 }
0x260b   : > { %v1572_v23 = vrot.slane %v1571_v30, 1 }
0x260d   : > { %v1573_v33 = vadd.f32 %v1572_v23, %v1571_v30 }
0x260f   : > { %1722 = vpush %v1573_v33 }
0x2640   : > { %s1723_s15 = spop %1722 }
0x2641   : > { %v1575_v38 = vstv %s1723_s15 }
0x2642   : > { %v1576_v34 = vmul.f32 %v1575_v38, %v2064_v61 }
0x2644   : > { %vm1577_vm3 = vcmp.gt.f32.partialorder %v1812_v20, %v1576_v34 }
0x2645   : > { %v1578_v39 = vsel %vm1577_vm3, 1.0, %v1875_v0 }
0x2646   : > { %v1579_v42 = vadd.f32 %v1578_v39, %v1540_v27 }
0x2648   : > { %v1581_v45 = vand.u32 2147483647, %v1579_v42  ;;  %v1580_v47 = vmax.f32 %v1579_v42, 0.0 }
0x264a   : > { %v1582_v40 = vsub.f32 0.0, %v1581_v45 }
0x264c   : > { %v1583_v46 = vmul.f32 1.442695, %v1582_v40 }
0x264e   : > { %1813 = vpow2.f32 %v1583_v46 }
0x2654   : > { %v1814_v43 = vpop.eup %1813 }
0x2655   : > { %v1585_v49 = vadd.f32 1.0, %v1814_v43 }
0x2657   : > { %1815 = vlog2.f32 %v1585_v49 }
0x265d   : > { %v1816_v50 = vpop.eup %1815 }
0x265e   : > { %v1587_v51 = vmul.f32 0.6931472, %v1816_v50 }
0x2660   : > { %v1588_v48 = vadd.f32 %v1587_v51, %v1580_v47 }
0x2662   : > { %1589 = vst.msk [vmem:[#allocation3] sm:$0x3] %vm398_vm1, %v1588_v48 }
0x2663 PF: > { %p1728_p7 = scmp.eq.s32.totalorder %s1913_s19, 7  ;;  %s1876_s16 = smov [#allocation3]  }
0x2664   : > { %s1596_s17 = sshll.u32 %s1876_s16, 4  ;;  %s1598_s22 = sshll.u32 %s2517_s5, 4  ;;  %s1597_s17 = int_to_ptr.vmem [resolvable:$true] %s1596_s17  ;;  %s1599_s22 = int_to_ptr.hbm [resolvable:$true] %s1598_s22 }
0x2665   : > { %1725 = dma.vmem_to_hbm [thread:$0]  (%p1728_p7), %s1597_s17, 32, %s1599_s22, [#allocation4]  }
0x2666   : > { %1866 = dma.done.wait (%p1728_p7), [#allocation4], 32  }
0x2667   : > { %1868 = vsyncadd (%p1728_p7), [#allocation4], 4294967264 }
0x2668 PF: > { %s16_s18 = sadd.s32 1, %s1871_s18  }
0x2669   : > { %p13_p8 = scmp.ge.s32.totalorder %s16_s18, 10  }
0x266b   :  { %15 = sbr.rel (!%p13_p8) target bundleno = 1 (0x1), region = 78 }
0x2670   :  { %1612 = vsyncpa [#allocation4], 1 }
0x2671   :  { %1614 = vsyncpa [#allocation4 + $0x1], 1 }

</bundles_post_ra>
